<compile_context>
chip_gen: v7x
topology: tpu7x:2x2x1
jax: 0.10.0
libtpu: 0.0.40
codegen_flags: <defaults>
</compile_context>

<pallas_src>
import math

import jax
import jax.numpy as jnp
from jax.experimental import pallas as pl
from jax.experimental.pallas import tpu as pltpu

# ----------------------------- configuration --------------------------------
INPUT_DIM = 32
HIDDEN_DIM = 256
OUTPUT_DIM = 2
OUT_ROWS = 8                # predictor rows padded to one sublane group
N_HIDDEN_LAYERS = 2         # module requires an int here (default None would crash)
BN_EPS = 1e-5               # nn.BatchNorm1d default eps

SELU_ALPHA = 1.6732632423543772848170429916717
SELU_SCALE = 1.0507009873554804934193349852946


def _cdiv(a, b):
    return -(-a // b)


def _round_up(a, b):
    return _cdiv(a, b) * b


def _device_config():
    """Per-generation epilogue dtype and max batch tile."""
    try:
        kind = jax.devices()[0].device_kind.lower()
    except Exception:  # pragma: no cover - defensive
        kind = ""
    is_v5 = "v5" in kind
    ep_dtype = jnp.float32 if is_v5 else jnp.bfloat16   # v5e: no bf16 VPU/EUP path
    tb_max = 2048 if is_v5 else 4096                    # v5e: 16 MiB scoped-VMEM default
    return ep_dtype, tb_max


def _choose_tb(batch, tb_max):
    """Batch tile: large (amortize ~0.35us/grid-step), multiple of 128
    (lane-dense output), and an even tile count when multi-tile (v7x megacore)."""
    tb = min(tb_max, _round_up(batch, 128))
    n = _cdiv(batch, tb)
    if n > 1 and n % 2 == 1:
        tb = max(128, _round_up(_cdiv(batch, n + 1), 128))
    return tb


# ------------------------------ Pallas kernel --------------------------------
def mlp_kernel(x_ref,
               w0_ref, b0_ref, w1_ref, b1_ref, w2_ref, b2_ref,
               wp_ref, bp_ref,
               o_ref):
    """One batch tile, feature-major: 3x (Linear[BN folded] + SELU) + predictor.

    Activations are (features, TB) with the batch on the lane axis, so every
    matmul is a standard-orientation MXU call and the output store is a
    lane-dense (OUT_ROWS, TB) tile.  The SELU output scale is folded into the
    next layer's weights, so the epilogue is only bias + where/exp."""

    def hidden(h, w_ref, b_ref):
        # bf16 operands on the MXU, f32 accumulation; epilogue runs in the
        # bias dtype (bf16 on v6e/v7x, f32 on v5e).
        z = jnp.dot(w_ref[...], h, preferred_element_type=jnp.float32)
        z = z.astype(b_ref.dtype) + b_ref[...]
        a = jnp.where(z > 0.0, z, SELU_ALPHA * (jnp.exp(z) - 1.0))
        return a.astype(jnp.bfloat16)

    h = x_ref[...]                     # (INPUT_DIM, TB) bf16
    h = hidden(h, w0_ref, b0_ref)
    h = hidden(h, w1_ref, b1_ref)
    h = hidden(h, w2_ref, b2_ref)
    out = jnp.dot(wp_ref[...], h, preferred_element_type=jnp.float32) + bp_ref[...]
    o_ref[...] = out                   # (OUT_ROWS, TB) f32, lane-dense store


def mlp_forward(x, packed_params, *, tb=None):
    """x: (B, INPUT_DIM) float32. packed_params: output of pack_params()."""
    batch = x.shape[0]
    if tb is None:
        _, tb_max = _device_config()
        tb = _choose_tb(batch, tb_max)
    n_tiles = _cdiv(batch, tb)
    b_pad = n_tiles * tb

    # Feature-major input, bf16 (halves input DMA); pad the batch (lane) axis.
    x_t = x.astype(jnp.bfloat16).T                       # (INPUT_DIM, B)
    if b_pad != batch:
        x_t = jnp.pad(x_t, ((0, 0), (0, b_pad - batch)))

    # x / out are tiled over the batch grid; weights & biases keep a constant
    # block index so they stay VMEM-resident across grid steps.
    in_specs = [pl.BlockSpec((INPUT_DIM, tb), lambda i: (0, i))]
    for p in packed_params:
        in_specs.append(pl.BlockSpec(p.shape, lambda i, nd=p.ndim: (0,) * nd))

    out_t = pl.pallas_call(
        mlp_kernel,
        out_shape=jax.ShapeDtypeStruct((OUT_ROWS, b_pad), jnp.float32),
        grid=(n_tiles,),
        in_specs=in_specs,
        out_specs=pl.BlockSpec((OUT_ROWS, tb), lambda i: (0, i)),
        compiler_params=pltpu.CompilerParams(
            dimension_semantics=("parallel",)),          # megacore sharding on v7x
    )(x_t, *packed_params)
    return out_t[:OUTPUT_DIM, :batch].T                  # (B, OUTPUT_DIM) f32


# --------------------------- parameter construction --------------------------
def _linear_init(key, in_dim, out_dim):
    """Match MLP.reset_parameters: weight ~ N(0, 1/sqrt(out)), bias ~ U(-1/sqrt(in), 1/sqrt(in))."""
    kw, kb = jax.random.split(key)
    # stored as (in, out) so x @ W + b equals PyTorch x @ W_pt.T + b
    w = jax.random.normal(kw, (in_dim, out_dim), jnp.float32) / math.sqrt(out_dim)
    bound = 1.0 / math.sqrt(in_dim)
    b = jax.random.uniform(kb, (out_dim,), jnp.float32, -bound, bound)
    return w, b


def _bn_init(key, dim):
    """Non-trivial eval-mode BN stats so the host-side fold is actually exercised."""
    kg, kb, km, kv = jax.random.split(key, 4)
    gamma = jax.random.uniform(kg, (dim,), jnp.float32, 0.8, 1.2)
    beta = 0.1 * jax.random.normal(kb, (dim,), jnp.float32)
    mean = 0.1 * jax.random.normal(km, (dim,), jnp.float32)
    var = jax.random.uniform(kv, (dim,), jnp.float32, 0.5, 1.5)
    return gamma, beta, mean, var


def init_raw_params(key):
    """Raw (unfused) params: list of per-layer tuples + predictor tuple."""
    layers = []
    dims = [(INPUT_DIM, HIDDEN_DIM)] + [(HIDDEN_DIM, HIDDEN_DIM)] * N_HIDDEN_LAYERS
    for din, dout in dims:
        key, k1, k2 = jax.random.split(key, 3)
        w, b = _linear_init(k1, din, dout)
        g, be, m, v = _bn_init(k2, dout)
        layers.append((w, b, g, be, m, v))
    key, kp = jax.random.split(key)
    wp, bp = _linear_init(kp, HIDDEN_DIM, OUTPUT_DIM)
    return layers, (wp, bp)


def pack_params(layers, predictor, ep_dtype=jnp.bfloat16):
    """Fold eval-mode BatchNorm into each Linear, fold the SELU output scale
    into the *next* layer's weights, transpose weights to (out, in) for the
    feature-major kernel, cast weights to bf16, biases to the epilogue dtype,
    and sublane-pad the predictor to OUT_ROWS rows."""
    packed = []
    for li, (w, b, g, be, m, v) in enumerate(layers):
        scale = g * jax.lax.rsqrt(v + BN_EPS)                       # (out,)
        w_f = w * scale[None, :]                                    # (in, out)
        if li > 0:
            w_f = w_f * SELU_SCALE                                  # previous layer's SELU scale
        wt = jnp.asarray(w_f.T, jnp.bfloat16)                       # (out, in) bf16
        b_f = ((b - m) * scale + be).reshape(-1, 1).astype(ep_dtype)  # (out, 1)
        packed.extend([wt, b_f])
    wp, bp = predictor
    wpt = jnp.zeros((OUT_ROWS, HIDDEN_DIM), jnp.float32)
    wpt = wpt.at[:OUTPUT_DIM, :].set((wp * SELU_SCALE).T).astype(jnp.bfloat16)
    bpt = jnp.zeros((OUT_ROWS, 1), jnp.float32).at[:OUTPUT_DIM, 0].set(bp)
    packed.extend([wpt, bpt])
    return packed


# ----------------------------- references (plain JAX) -------------------------
def mlp_reference_f32(x, layers, predictor):
    """Exact module semantics (unfused BN, full f32)."""
    h = x
    for w, b, g, be, m, v in layers:
        z = h @ w + b
        z = (z - m) * jax.lax.rsqrt(v + BN_EPS) * g + be
        h = SELU_SCALE * jnp.where(z > 0.0, z, SELU_ALPHA * (jnp.exp(z) - 1.0))
    wp, bp = predictor
    return h @ wp + bp


def mlp_reference_matched(x, packed_params):
    """Same arithmetic as the kernel (folded BN + SELU scale, feature-major,
    bf16 matmul operands, epilogue in the packed bias dtype)."""
    h = x.astype(jnp.bfloat16).T
    for i in range(1 + N_HIDDEN_LAYERS):
        w, b = packed_params[2 * i], packed_params[2 * i + 1]
        z = jnp.dot(w, h, preferred_element_type=jnp.float32).astype(b.dtype) + b
        a = jnp.where(z > 0.0, z, SELU_ALPHA * (jnp.exp(z) - 1.0))
        h = a.astype(jnp.bfloat16)
    wp, bp = packed_params[-2], packed_params[-1]
    out = jnp.dot(wp, h, preferred_element_type=jnp.float32) + bp
    return out[:OUTPUT_DIM, :].T


# ------------------------------------ main ------------------------------------
if __name__ == "__main__":
    key = jax.random.PRNGKey(0)
    kx, kp = jax.random.split(key)

    batch = 300
    x = jax.random.normal(kx, (batch, INPUT_DIM), jnp.float32)

    ep_dtype, _ = _device_config()
    layers, predictor = init_raw_params(kp)
    packed = pack_params(layers, predictor, ep_dtype)

    # Default adaptive tile (single 384-wide tile here).
    out = jax.block_until_ready(mlp_forward(x, packed))
    assert out.shape == (batch, OUTPUT_DIM), out.shape

    # Small explicit tile to also exercise the multi-tile grid + lane padding.
    out_tiled = jax.block_until_ready(mlp_forward(x, packed, tb=128))
    assert out_tiled.shape == (batch, OUTPUT_DIM), out_tiled.shape

    # The two kernel launches compute identical per-column math.
    err_tiles = float(jnp.max(jnp.abs(out - out_tiled)))
    assert jnp.allclose(out, out_tiled, atol=1e-2, rtol=1e-3), (
        f"tile-size consistency max abs err = {err_tiles}")

    # Check against a reference doing the same folded / reduced-precision math.
    ref_matched = mlp_reference_matched(x, packed)
    err_matched = float(jnp.max(jnp.abs(out - ref_matched)))
    assert jnp.allclose(out, ref_matched, atol=2e-1, rtol=5e-2), (
        f"matched-ref max abs err = {err_matched}")

    # Loose sanity check against exact f32 module semantics (bf16 rounding).
    ref_f32 = mlp_reference_f32(x, layers, predictor)
    err_f32 = float(jnp.max(jnp.abs(out - ref_f32)))
    assert jnp.allclose(out, ref_f32, atol=8e-1, rtol=1.5e-1), (
        f"f32-ref max abs err = {err_f32}")

    print("KERNEL_OK")
</pallas_src>

<mosaic_0001>
module attributes {stable_mosaic.version = 11 : i64} {
  func.func @mlp_kernel(%arg0: i32, %arg1: memref<32x384xbf16, #tpu.memory_space<vmem>>, %arg2: memref<256x32xbf16, #tpu.memory_space<vmem>>, %arg3: memref<256x1xbf16, #tpu.memory_space<vmem>>, %arg4: memref<256x256xbf16, #tpu.memory_space<vmem>>, %arg5: memref<256x1xbf16, #tpu.memory_space<vmem>>, %arg6: memref<256x256xbf16, #tpu.memory_space<vmem>>, %arg7: memref<256x1xbf16, #tpu.memory_space<vmem>>, %arg8: memref<8x256xbf16, #tpu.memory_space<vmem>>, %arg9: memref<8x1xf32, #tpu.memory_space<vmem>>, %arg10: memref<8x384xf32, #tpu.memory_space<vmem>>) attributes {dimension_semantics = [#tpu.dimension_semantics<parallel>], iteration_bounds = array<i64: 1>, scalar_prefetch = 0 : i64, scratch_operands = 0 : i64, tpu.core_type = #tpu.core_type<tc>, window_params = [{transform_indices = @transform_0, window_bounds = array<i64: 32, 384>}, {pipeline_mode = #tpu.pipeline_mode<synchronous>, transform_indices = @transform_1, window_bounds = array<i64: 256, 32>}, {pipeline_mode = #tpu.pipeline_mode<synchronous>, transform_indices = @transform_2, window_bounds = array<i64: 256, 1>}, {pipeline_mode = #tpu.pipeline_mode<synchronous>, transform_indices = @transform_3, window_bounds = array<i64: 256, 256>}, {pipeline_mode = #tpu.pipeline_mode<synchronous>, transform_indices = @transform_4, window_bounds = array<i64: 256, 1>}, {pipeline_mode = #tpu.pipeline_mode<synchronous>, transform_indices = @transform_5, window_bounds = array<i64: 256, 256>}, {pipeline_mode = #tpu.pipeline_mode<synchronous>, transform_indices = @transform_6, window_bounds = array<i64: 256, 1>}, {pipeline_mode = #tpu.pipeline_mode<synchronous>, transform_indices = @transform_7, window_bounds = array<i64: 8, 256>}, {pipeline_mode = #tpu.pipeline_mode<synchronous>, transform_indices = @transform_8, window_bounds = array<i64: 8, 1>}, {transform_indices = @transform_9, window_bounds = array<i64: 8, 384>}]} {
    %c0 = arith.constant 0 : index
    %c0_0 = arith.constant 0 : index
    %0 = vector.load %arg1[%c0, %c0_0] : memref<32x384xbf16, #tpu.memory_space<vmem>>, vector<32x384xbf16>
    %c0_1 = arith.constant 0 : index
    %c0_2 = arith.constant 0 : index
    %1 = vector.load %arg2[%c0_1, %c0_2] : memref<256x32xbf16, #tpu.memory_space<vmem>>, vector<256x32xbf16>
    %cst = arith.constant dense<0.000000e+00> : vector<256x384xf32>
    %2 = tpu.matmul %1, %0, %cst {dimension_numbers = #tpu.dot_dimension_numbers<[1], [0], [0], [1], [0, 0, 1, 1], [], []>} : vector<256x32xbf16>, vector<32x384xbf16>, vector<256x384xf32> -> vector<256x384xf32>
    %3 = arith.truncf %2 : vector<256x384xf32> to vector<256x384xbf16>
    %c0_3 = arith.constant 0 : index
    %c0_4 = arith.constant 0 : index
    %4 = vector.load %arg3[%c0_3, %c0_4] : memref<256x1xbf16, #tpu.memory_space<vmem>>, vector<256x1xbf16>
    %5 = vector.broadcast %4 : vector<256x1xbf16> to vector<256x384xbf16>
    %6 = arith.addf %3, %5 : vector<256x384xbf16>
    %cst_5 = arith.constant 0.000000e+00 : bf16
    %7 = vector.broadcast %cst_5 : bf16 to vector<256x384xbf16>
    %8 = arith.cmpf ogt, %6, %7 : vector<256x384xbf16>
    %9 = math.exp %6 : vector<256x384xbf16>
    %cst_6 = arith.constant 1.000000e+00 : bf16
    %10 = vector.broadcast %cst_6 : bf16 to vector<256x384xbf16>
    %11 = arith.subf %9, %10 : vector<256x384xbf16>
    %cst_7 = arith.constant 1.671880e+00 : bf16
    %12 = vector.broadcast %cst_7 : bf16 to vector<256x384xbf16>
    %13 = arith.mulf %12, %11 : vector<256x384xbf16>
    %14 = arith.select %8, %6, %13 : vector<256x384xi1>, vector<256x384xbf16>
    %c0_8 = arith.constant 0 : index
    %c0_9 = arith.constant 0 : index
    %15 = vector.load %arg4[%c0_8, %c0_9] : memref<256x256xbf16, #tpu.memory_space<vmem>>, vector<256x256xbf16>
    %cst_10 = arith.constant dense<0.000000e+00> : vector<256x384xf32>
    %16 = tpu.matmul %15, %14, %cst_10 {dimension_numbers = #tpu.dot_dimension_numbers<[1], [0], [0], [1], [0, 0, 1, 1], [], []>} : vector<256x256xbf16>, vector<256x384xbf16>, vector<256x384xf32> -> vector<256x384xf32>
    %17 = arith.truncf %16 : vector<256x384xf32> to vector<256x384xbf16>
    %c0_11 = arith.constant 0 : index
    %c0_12 = arith.constant 0 : index
    %18 = vector.load %arg5[%c0_11, %c0_12] : memref<256x1xbf16, #tpu.memory_space<vmem>>, vector<256x1xbf16>
    %19 = vector.broadcast %18 : vector<256x1xbf16> to vector<256x384xbf16>
    %20 = arith.addf %17, %19 : vector<256x384xbf16>
    %cst_13 = arith.constant 0.000000e+00 : bf16
    %21 = vector.broadcast %cst_13 : bf16 to vector<256x384xbf16>
    %22 = arith.cmpf ogt, %20, %21 : vector<256x384xbf16>
    %23 = math.exp %20 : vector<256x384xbf16>
    %cst_14 = arith.constant 1.000000e+00 : bf16
    %24 = vector.broadcast %cst_14 : bf16 to vector<256x384xbf16>
    %25 = arith.subf %23, %24 : vector<256x384xbf16>
    %cst_15 = arith.constant 1.671880e+00 : bf16
    %26 = vector.broadcast %cst_15 : bf16 to vector<256x384xbf16>
    %27 = arith.mulf %26, %25 : vector<256x384xbf16>
    %28 = arith.select %22, %20, %27 : vector<256x384xi1>, vector<256x384xbf16>
    %c0_16 = arith.constant 0 : index
    %c0_17 = arith.constant 0 : index
    %29 = vector.load %arg6[%c0_16, %c0_17] : memref<256x256xbf16, #tpu.memory_space<vmem>>, vector<256x256xbf16>
    %cst_18 = arith.constant dense<0.000000e+00> : vector<256x384xf32>
    %30 = tpu.matmul %29, %28, %cst_18 {dimension_numbers = #tpu.dot_dimension_numbers<[1], [0], [0], [1], [0, 0, 1, 1], [], []>} : vector<256x256xbf16>, vector<256x384xbf16>, vector<256x384xf32> -> vector<256x384xf32>
    %31 = arith.truncf %30 : vector<256x384xf32> to vector<256x384xbf16>
    %c0_19 = arith.constant 0 : index
    %c0_20 = arith.constant 0 : index
    %32 = vector.load %arg7[%c0_19, %c0_20] : memref<256x1xbf16, #tpu.memory_space<vmem>>, vector<256x1xbf16>
    %33 = vector.broadcast %32 : vector<256x1xbf16> to vector<256x384xbf16>
    %34 = arith.addf %31, %33 : vector<256x384xbf16>
    %cst_21 = arith.constant 0.000000e+00 : bf16
    %35 = vector.broadcast %cst_21 : bf16 to vector<256x384xbf16>
    %36 = arith.cmpf ogt, %34, %35 : vector<256x384xbf16>
    %37 = math.exp %34 : vector<256x384xbf16>
    %cst_22 = arith.constant 1.000000e+00 : bf16
    %38 = vector.broadcast %cst_22 : bf16 to vector<256x384xbf16>
    %39 = arith.subf %37, %38 : vector<256x384xbf16>
    %cst_23 = arith.constant 1.671880e+00 : bf16
    %40 = vector.broadcast %cst_23 : bf16 to vector<256x384xbf16>
    %41 = arith.mulf %40, %39 : vector<256x384xbf16>
    %42 = arith.select %36, %34, %41 : vector<256x384xi1>, vector<256x384xbf16>
    %c0_24 = arith.constant 0 : index
    %c0_25 = arith.constant 0 : index
    %43 = vector.load %arg8[%c0_24, %c0_25] : memref<8x256xbf16, #tpu.memory_space<vmem>>, vector<8x256xbf16>
    %cst_26 = arith.constant dense<0.000000e+00> : vector<8x384xf32>
    %44 = tpu.matmul %43, %42, %cst_26 {dimension_numbers = #tpu.dot_dimension_numbers<[1], [0], [0], [1], [0, 0, 1, 1], [], []>} : vector<8x256xbf16>, vector<256x384xbf16>, vector<8x384xf32> -> vector<8x384xf32>
    %c0_27 = arith.constant 0 : index
    %c0_28 = arith.constant 0 : index
    %45 = vector.load %arg9[%c0_27, %c0_28] : memref<8x1xf32, #tpu.memory_space<vmem>>, vector<8x1xf32>
    %46 = vector.broadcast %45 : vector<8x1xf32> to vector<8x384xf32>
    %47 = arith.addf %44, %46 : vector<8x384xf32>
    %c0_29 = arith.constant 0 : index
    %c0_30 = arith.constant 0 : index
    %48 = vector.load %arg10[%c0_29, %c0_30] : memref<8x384xf32, #tpu.memory_space<vmem>>, vector<8x384xf32>
    tpu.vector_store %arg10[%c0_29, %c0_30], %47 {strides = array<i32>} : memref<8x384xf32, #tpu.memory_space<vmem>>, vector<8x384xf32>,
    return
  }
  func.func @transform_0(%arg0: i32) -> (i32, i32) {
    %c0_i32 = arith.constant 0 : i32
    %c0_i32_0 = arith.constant 0 : i32
    return %c0_i32, %arg0 : i32, i32
  }
  func.func @transform_1(%arg0: i32) -> (i32, i32) {
    %c0_i32 = arith.constant 0 : i32
    %c0_i32_0 = arith.constant 0 : i32
    %c0_i32_1 = arith.constant 0 : i32
    return %c0_i32, %c0_i32_0 : i32, i32
  }
  func.func @transform_2(%arg0: i32) -> (i32, i32) {
    %c0_i32 = arith.constant 0 : i32
    %c0_i32_0 = arith.constant 0 : i32
    %c0_i32_1 = arith.constant 0 : i32
    return %c0_i32, %c0_i32_0 : i32, i32
  }
  func.func @transform_3(%arg0: i32) -> (i32, i32) {
    %c0_i32 = arith.constant 0 : i32
    %c0_i32_0 = arith.constant 0 : i32
    %c0_i32_1 = arith.constant 0 : i32
    return %c0_i32, %c0_i32_0 : i32, i32
  }
  func.func @transform_4(%arg0: i32) -> (i32, i32) {
    %c0_i32 = arith.constant 0 : i32
    %c0_i32_0 = arith.constant 0 : i32
    %c0_i32_1 = arith.constant 0 : i32
    return %c0_i32, %c0_i32_0 : i32, i32
  }
  func.func @transform_5(%arg0: i32) -> (i32, i32) {
    %c0_i32 = arith.constant 0 : i32
    %c0_i32_0 = arith.constant 0 : i32
    %c0_i32_1 = arith.constant 0 : i32
    return %c0_i32, %c0_i32_0 : i32, i32
  }
  func.func @transform_6(%arg0: i32) -> (i32, i32) {
    %c0_i32 = arith.constant 0 : i32
    %c0_i32_0 = arith.constant 0 : i32
    %c0_i32_1 = arith.constant 0 : i32
    return %c0_i32, %c0_i32_0 : i32, i32
  }
  func.func @transform_7(%arg0: i32) -> (i32, i32) {
    %c0_i32 = arith.constant 0 : i32
    %c0_i32_0 = arith.constant 0 : i32
    %c0_i32_1 = arith.constant 0 : i32
    return %c0_i32, %c0_i32_0 : i32, i32
  }
  func.func @transform_8(%arg0: i32) -> (i32, i32) {
    %c0_i32 = arith.constant 0 : i32
    %c0_i32_0 = arith.constant 0 : i32
    %c0_i32_1 = arith.constant 0 : i32
    return %c0_i32, %c0_i32_0 : i32, i32
  }
  func.func @transform_9(%arg0: i32) -> (i32, i32) {
    %c0_i32 = arith.constant 0 : i32
    %c0_i32_0 = arith.constant 0 : i32
    return %c0_i32, %arg0 : i32, i32
  }
}

</mosaic_0001>

<bundles_post_ra>
// kernel: tpu_custom_call.1
= control target key start
LH: loop header
LB: loop body
LE: loop exit
PB: predicated region body
PF: predicated region fallthrough
CT: control target
= control target key end

     0   :  { %14 = vsyncpa [#allocation3], 0  ;;  %s7974_s0 = inlined_call_operand.hbm [shape: bf16[32,384], index: 0, kind: input, shape index: {}]   ;;  %s7975_s1 = inlined_call_operand.vmem [shape: bf16[256,32], index: 1, kind: input, shape index: {}]   ;;  %s7976_s2 = inlined_call_operand.vmem [shape: bf16[256,1], index: 2, kind: input, shape index: {}]   ;;  %s7977_s3 = inlined_call_operand.vmem [shape: bf16[256,256], index: 3, kind: input, shape index: {}]   ;;  %s7978_s4 = inlined_call_operand.vmem [shape: bf16[256,1], index: 4, kind: input, shape index: {}]   ;;  %s7979_s5 = inlined_call_operand.vmem [shape: bf16[256,256], index: 5, kind: input, shape index: {}]   ;;  %s7980_s6 = inlined_call_operand.vmem [shape: bf16[256,1], index: 6, kind: input, shape index: {}]   ;;  %s7981_s7 = inlined_call_operand.vmem [shape: bf16[8,256], index: 7, kind: input, shape index: {}]   ;;  %s7982_s8 = inlined_call_operand.vmem [shape: f32[8,1], index: 8, kind: input, shape index: {}]   ;;  %s7983_s9 = inlined_call_operand.hbm [shape: f32[8,384], index: 9, kind: output, shape index: {}]  }
   0x1   :  { %15 = vsyncpa [#allocation4], 0  ;;  %s5581_s30 = smov [#allocation2]   ;;  %s5533_s13 = scalar_lea.hbm %s7974_s0, 768 }
   0x2   :  { %s21_s10 = sshll.u32 %s5581_s30, 4  ;;  %p5534_p0 = scmp.ne.s32.totalorder %s7974_s0, %s5533_s13  ;;  %s22_s10 = int_to_ptr.vmem [resolvable:$true] %s21_s10 }
   0x3   :  { %p5537_p1 = scmp.lt.u32.totalorder %s5533_s13, %s7974_s0 }
   0x5   :  { %p5539_p2 = pnand %p5537_p1, %p5534_p0 }
   0x7   :  { %5542 = shalt.err (!%p5539_p2)
}
   0x8   :  { %s5543_s18 = scalar_lea.vmem %s22_s10, 768  ;;  %p5548_p4 = scmp.lt.s32.totalorder %s22_s10, %s22_s10 }
   0x9   :  { %p5544_p3 = scmp.ne.s32.totalorder %s22_s10, %s5543_s18  ;;  %p5549_p5 = scmp.lt.s32.totalorder %s5543_s18, %s5543_s18 }
   0xb   :  { %p5550_p6 = por %p5549_p5, %p5548_p4 }
   0xd   :  { %p5551_p7 = pnand %p5550_p6, %p5544_p3 }
   0xf   :  { %5554 = shalt.err (!%p5551_p7)
}
  0x10   :  { %s5582_s19 = smov 192   ;;  %s5583_s20 = smov 12  }
  0x11   :  { %27 = dma.hbm_to_vmem [thread:$0]  %s7974_s0, 768, %s22_s10, [#allocation3], %s5582_s19, %s5582_s19, %s5583_s20  }
  0x12   :  { %5577 = dma.done.wait [#allocation3], 768  }
  0x13   :  { %5578 = vsyncadd [#allocation3], 4294966528  ;;  %v5584_v0 = vmov 0   ;;  %v655_v1 = vld [vmem:[%s7976_s2 + $0x8] sm:$0xf]  ;;  %v5129_v11 = vld [vmem:[%s7975_s1] sm:$0xff]  }
  0x14   :  { %5122 = vset.pattern.permute.xlu1 %v5584_v0  ;;  %5121 = vset.pattern.permute.xlu0 %v5584_v0  ;;  %v653_v2 = vld [vmem:[%s7976_s2] sm:$0xf]  ;;  %v5123_v3 = vld [vmem:[#allocation2 + $0x4] ss:$12 sps:$4 sm:$0xff]   ;;  %v656_v5 = vld [vmem:[%s7976_s2 + $0xc] sm:$0xf] }
  0x15   :  { %283 = vmatprep.mubr.bf16.mxu0 %v5584_v0  ;;  %433 = vmatprep.mubr.bf16.mxu1 %v5584_v0  ;;  %v5125_v4 = vld [vmem:[#allocation2] ss:$12 sps:$4 sm:$0xff]   ;;  %v654_v6 = vld [vmem:[%s7976_s2 + $0x4] sm:$0xf]  ;;  %v5126_v7 = vld [vmem:[#allocation2 + $0x1c] ss:$12 sps:$4 sm:$0xff]  }
  0x16   :  { %711 = vperm.xlu1 %5122, %v655_v1   ;;  %687 = vperm.xlu0 %5121, %v653_v2   ;;  %v5128_v8 = vld [vmem:[#allocation2 + $0x18] ss:$12 sps:$4 sm:$0xff]   ;;  %v658_v9 = vld [vmem:[%s7976_s2 + $0x14] sm:$0xf]  ;;  %v657_v10 = vld [vmem:[%s7976_s2 + $0x10] sm:$0xf] }
  0x17   :  { %251 = vmatprep.subr.bf16.mxu0 %v5123_v3  ;;  %5110 = vmatprep.subr.bf16.mxu1 %v5123_v3  ;;  %v5678_v12 = vld [vmem:[%s7975_s1 + $0x78] sm:$0xff]   ;;  %v5131_v13 = vld [vmem:[#allocation2 + $0x8] ss:$12 sps:$4 sm:$0xff]   ;;  %vm202_vm0 = vcmask 261120   ;;  %v5132_v16 = vld [vmem:[#allocation2 + $0x20] ss:$12 sps:$4 sm:$0xff]  }
  0x18   :  { %252 = vmatpush1.bf16.msra.mxu0 %v5125_v4  ;;  %5112 = vmatpush1.bf16.msra.mxu1 %v5125_v4  ;;  %v660_v14 = vld [vmem:[%s7976_s2 + $0x1c] sm:$0xf]  ;;  %v659_v15 = vld [vmem:[%s7976_s2 + $0x18] sm:$0xf]  ;;  %v662_v17 = vld [vmem:[%s7976_s2 + $0x24] sm:$0xf] }
  0x19   :  { %253 = vmatprep.subr.bf16.mxu0 %v5126_v7  ;;  %5111 = vmatprep.subr.bf16.mxu1 %v5126_v7  ;;  %v661_v18 = vld [vmem:[%s7976_s2 + $0x20] sm:$0xf]  ;;  %v5133_v19 = vld [vmem:[%s7975_s1 + $0x8] sm:$0xff]   ;;  %v5134_v20 = vld [vmem:[%s7975_s1 + $0x10] sm:$0xff]  }
  0x1a   :  { %723 = vperm.xlu1 %5122, %v656_v5   ;;  %699 = vperm.xlu0 %5121, %v654_v6   ;;  %v664_v21 = vld [vmem:[%s7976_s2 + $0x2c] sm:$0xf]  ;;  %v663_v22 = vld [vmem:[%s7976_s2 + $0x28] sm:$0xf]  ;;  %v666_v23 = vld [vmem:[%s7976_s2 + $0x34] sm:$0xf] }
  0x1b   :  { %v665_v24 = vld [vmem:[%s7976_s2 + $0x30] sm:$0xf]  ;;  %v5135_v25 = vld [vmem:[%s7975_s1 + $0x18] sm:$0xff]   ;;  %v5136_v26 = vld [vmem:[%s7975_s1 + $0x20] sm:$0xff]  }
  0x1c   :  { %254 = vmatpush1.bf16.msra.mxu0 %v5128_v8  ;;  %5113 = vmatpush1.bf16.msra.mxu1 %v5128_v8  ;;  %v668_v27 = vld [vmem:[%s7976_s2 + $0x3c] sm:$0xf]  ;;  %v667_v28 = vld [vmem:[%s7976_s2 + $0x38] sm:$0xf]  ;;  %v670_v29 = vld [vmem:[%s7976_s2 + $0x44] sm:$0xf] }
  0x1d   :  { %5074 = vmatprep.subr.bf16.mxu1 %v5131_v13  ;;  %v669_v30 = vld [vmem:[%s7976_s2 + $0x40] sm:$0xf]  ;;  %v5137_v31 = vld [vmem:[%s7975_s1 + $0x28] sm:$0xff]   ;;  %v5138_v32 = vld [vmem:[%s7975_s1 + $0x30] sm:$0xff]  }
  0x1e   :  { %747 = vperm.xlu1 %5122, %v658_v9   ;;  %735 = vperm.xlu0 %5121, %v657_v10   ;;  %v672_v33 = vld [vmem:[%s7976_s2 + $0x4c] sm:$0xf]  ;;  %v671_v34 = vld [vmem:[%s7976_s2 + $0x48] sm:$0xf]  ;;  %v674_v35 = vld [vmem:[%s7976_s2 + $0x54] sm:$0xf] }
  0x1f   :  { %4664 = vmatmul.mubr.msk.bf16.vlgmr.msra.gmra.mrb[0].mxu0 %vm202_vm0, %v5129_v11  ;;  %4679 = vmatmul.mubr.msk.bf16.vlgmr.msra.gmra.mrb[0].mxu1 %vm202_vm0, %v5678_v12  ;;  %v673_v36 = vld [vmem:[%s7976_s2 + $0x50] sm:$0xf]  ;;  %v5139_v37 = vld [vmem:[%s7975_s1 + $0x38] sm:$0xff]   ;;  %v5140_v38 = vld [vmem:[%s7975_s1 + $0x40] sm:$0xff]  }
  0x20   :  { %5075 = vmatpush3.bf16.msra.mxu1 %v5131_v13  ;;  %293 = vmatprep.mubr.bf16.mxu0 %v5584_v0  ;;  %v676_v39 = vld [vmem:[%s7976_s2 + $0x5c] sm:$0xf]  ;;  %v675_v40 = vld [vmem:[%s7976_s2 + $0x58] sm:$0xf]  ;;  %v678_v41 = vld [vmem:[%s7976_s2 + $0x64] sm:$0xf] }
  0x21   :  { %5076 = vmatprep.subr.bf16.mxu1 %v5132_v16  ;;  %5078 = vmatprep.mubr.msk.bf16.mxu1 %vm202_vm0, %v5129_v11  ;;  %v677_v42 = vld [vmem:[%s7976_s2 + $0x60] sm:$0xf]  ;;  %v5141_v43 = vld [vmem:[%s7975_s1 + $0x48] sm:$0xff]   ;;  %v5791_v44 = vld [vmem:[%s7975_s1 + $0x50] sm:$0xff]  }
  0x22   :  { %771 = vperm.xlu1 %5122, %v660_v14   ;;  %759 = vperm.xlu0 %5121, %v659_v15   ;;  %v680_v45 = vld [vmem:[%s7976_s2 + $0x6c] sm:$0xf]  ;;  %v679_v46 = vld [vmem:[%s7976_s2 + $0x68] sm:$0xf]  ;;  %v682_v47 = vld [vmem:[%s7976_s2 + $0x74] sm:$0xf] }
  0x23   :  { %v681_v48 = vld [vmem:[%s7976_s2 + $0x70] sm:$0xf]  ;;  %v5813_v49 = vld [vmem:[%s7975_s1 + $0x58] sm:$0xff]   ;;  %v5818_v50 = vld [vmem:[%s7975_s1 + $0x60] sm:$0xff]  }
  0x24   :  { %5077 = vmatpush3.bf16.msra.mxu1 %v5132_v16  ;;  %v684_v51 = vld [vmem:[%s7976_s2 + $0x7c] sm:$0xf]  ;;  %v683_v52 = vld [vmem:[%s7976_s2 + $0x78] sm:$0xf]  ;;  %v2144_v53 = vld [vmem:[%s7978_s4 + $0x4] sm:$0xf] }
  0x25   :  { %v2143_v54 = vld [vmem:[%s7978_s4] sm:$0xf]  ;;  %v5841_v55 = vld [vmem:[%s7975_s1 + $0x68] sm:$0xff]   ;;  %v5846_v56 = vld [vmem:[%s7975_s1 + $0x70] sm:$0xff]  }
  0x26   :  { %795 = vperm.xlu1 %5122, %v662_v17   ;;  %783 = vperm.xlu0 %5121, %v661_v18   ;;  %v2146_v57 = vld [vmem:[%s7978_s4 + $0xc] sm:$0xf]  ;;  %v2145_v58 = vld [vmem:[%s7978_s4 + $0x8] sm:$0xf]  ;;  %v2148_v59 = vld [vmem:[%s7978_s4 + $0x14] sm:$0xf] }
  0x27   :  { %4665 = vmatmul.mubr.msk.bf16.gmra.mrb[4].mxu0 %vm202_vm0, %v5133_v19  ;;  %5079 = vmatmul.mubr.msk.bf16.vlgmr.msra.gmra.mrb[4].mxu1 %vm202_vm0, %v5133_v19  ;;  %v2147_v60 = vld [vmem:[%s7978_s4 + $0x10] sm:$0xf]  ;;  %v2150_v61 = vld [vmem:[%s7978_s4 + $0x1c] sm:$0xf]  ;;  %v2149_v62 = vld [vmem:[%s7978_s4 + $0x18] sm:$0xf] }
  0x28   :  { %303 = vmatprep.mubr.bf16.mxu0 %v5584_v0  ;;  %5082 = vmatprep.mubr.msk.bf16.mxu1 %vm202_vm0, %v5134_v20  ;;  %v2152_v63 = vld [vmem:[%s7978_s4 + $0x24] sm:$0xf]  ;;  %v2151_v1 = vld [vmem:[%s7978_s4 + $0x20] sm:$0xf]  ;;  %v2154_v2 = vld [vmem:[%s7978_s4 + $0x2c] sm:$0xf] }
  0x29   :  { %v2153_v3 = vld [vmem:[%s7978_s4 + $0x28] sm:$0xf]  ;;  %v2156_v4 = vld [vmem:[%s7978_s4 + $0x34] sm:$0xf]  ;;  %v2155_v5 = vld [vmem:[%s7978_s4 + $0x30] sm:$0xf] }
  0x2a   :  { %819 = vperm.xlu1 %5122, %v664_v21   ;;  %807 = vperm.xlu0 %5121, %v663_v22   ;;  %v2158_v6 = vld [vmem:[%s7978_s4 + $0x3c] sm:$0xf]  ;;  %v2157_v7 = vld [vmem:[%s7978_s4 + $0x38] sm:$0xf]  ;;  %v2160_v8 = vld [vmem:[%s7978_s4 + $0x44] sm:$0xf] }
  0x2b   :  { %v2159_v9 = vld [vmem:[%s7978_s4 + $0x40] sm:$0xf]  ;;  %v2162_v10 = vld [vmem:[%s7978_s4 + $0x4c] sm:$0xf]  ;;  %v2161_v11 = vld [vmem:[%s7978_s4 + $0x48] sm:$0xf] }
  0x2c   :  { %v2163_v13 = vld [vmem:[%s7978_s4 + $0x50] sm:$0xf]  ;;  %v2166_v14 = vld [vmem:[%s7978_s4 + $0x5c] sm:$0xf]  ;;  %v2165_v15 = vld [vmem:[%s7978_s4 + $0x58] sm:$0xf] }
  0x2d   :  { %v2168_v16 = vld [vmem:[%s7978_s4 + $0x64] sm:$0xf]  ;;  %v2167_v17 = vld [vmem:[%s7978_s4 + $0x60] sm:$0xf]  ;;  %v2170_v18 = vld [vmem:[%s7978_s4 + $0x6c] sm:$0xf] }
  0x2e   :  { %843 = vperm.xlu1 %5122, %v666_v23   ;;  %831 = vperm.xlu0 %5121, %v665_v24   ;;  %v2169_v19 = vld [vmem:[%s7978_s4 + $0x68] sm:$0xf]  ;;  %v2171_v21 = vld [vmem:[%s7978_s4 + $0x70] sm:$0xf]  ;;  %v2174_v22 = vld [vmem:[%s7978_s4 + $0x7c] sm:$0xf] }
  0x2f   :  { %4666 = vmatmul.mubr.msk.bf16.gmra.mrb[8].mxu0 %vm202_vm0, %v5134_v20  ;;  %5083 = vmatmul.mubr.msk.bf16.gmra.mrb[8].mxu1 %vm202_vm0, %v5135_v25  ;;  %v2172_v20 = vld [vmem:[%s7978_s4 + $0x74] sm:$0xf]  ;;  %v3634_v23 = vld [vmem:[%s7980_s6 + $0x4] sm:$0xf]  ;;  %v3633_v24 = vld [vmem:[%s7980_s6] sm:$0xf] }
  0x30   :  { %313 = vmatprep.mubr.bf16.mxu0 %v5584_v0  ;;  %5086 = vmatprep.mubr.msk.bf16.mxu1 %vm202_vm0, %v5136_v26 }
  0x32   :  { %867 = vperm.xlu1 %5122, %v668_v27   ;;  %855 = vperm.xlu0 %5121, %v667_v28   ;;  %v3638_v27 = vld [vmem:[%s7980_s6 + $0x14] sm:$0xf]  ;;  %v3637_v28 = vld [vmem:[%s7980_s6 + $0x10] sm:$0xf] }
  0x36   :  { %891 = vperm.xlu1 %5122, %v670_v29   ;;  %879 = vperm.xlu0 %5121, %v669_v30   ;;  %v3640_v29 = vld [vmem:[%s7980_s6 + $0x1c] sm:$0xf]  ;;  %v3639_v30 = vld [vmem:[%s7980_s6 + $0x18] sm:$0xf] }
  0x37   :  { %4667 = vmatmul.mubr.msk.bf16.gmra.mrb[12].mxu0 %vm202_vm0, %v5135_v25  ;;  %5087 = vmatmul.mubr.msk.bf16.gmra.mrb[12].mxu1 %vm202_vm0, %v5137_v31  ;;  %v3636_v25 = vld [vmem:[%s7980_s6 + $0xc] sm:$0xf] }
  0x38   :  { %323 = vmatprep.mubr.bf16.mxu0 %v5584_v0  ;;  %5090 = vmatprep.mubr.msk.bf16.mxu1 %vm202_vm0, %v5138_v32 }
  0x3a   :  { %915 = vperm.xlu1 %5122, %v672_v33   ;;  %903 = vperm.xlu0 %5121, %v671_v34   ;;  %v3644_v33 = vld [vmem:[%s7980_s6 + $0x2c] sm:$0xf]  ;;  %v3643_v34 = vld [vmem:[%s7980_s6 + $0x28] sm:$0xf] }
  0x3e   :  { %939 = vperm.xlu1 %5122, %v674_v35   ;;  %927 = vperm.xlu0 %5121, %v673_v36   ;;  %v3646_v35 = vld [vmem:[%s7980_s6 + $0x34] sm:$0xf]  ;;  %v3645_v36 = vld [vmem:[%s7980_s6 + $0x30] sm:$0xf] }
  0x3f   :  { %4668 = vmatmul.mubr.msk.bf16.gmra.mrb[16].mxu0 %vm202_vm0, %v5136_v26  ;;  %5091 = vmatmul.mubr.msk.bf16.gmra.mrb[16].mxu1 %vm202_vm0, %v5139_v37  ;;  %v3635_v26 = vld [vmem:[%s7980_s6 + $0x8] sm:$0xf] }
  0x40   :  { %333 = vmatprep.mubr.bf16.mxu0 %v5584_v0  ;;  %5094 = vmatprep.mubr.msk.bf16.mxu1 %vm202_vm0, %v5140_v38 }
  0x42   :  { %963 = vperm.xlu1 %5122, %v676_v39   ;;  %951 = vperm.xlu0 %5121, %v675_v40   ;;  %v3650_v39 = vld [vmem:[%s7980_s6 + $0x44] sm:$0xf]  ;;  %v3649_v40 = vld [vmem:[%s7980_s6 + $0x40] sm:$0xf] }
  0x46   :  { %987 = vperm.xlu1 %5122, %v678_v41   ;;  %975 = vperm.xlu0 %5121, %v677_v42   ;;  %v3652_v41 = vld [vmem:[%s7980_s6 + $0x4c] sm:$0xf]  ;;  %v3651_v42 = vld [vmem:[%s7980_s6 + $0x48] sm:$0xf] }
  0x47   :  { %4669 = vmatmul.mubr.msk.bf16.gmra.mrb[20].mxu0 %vm202_vm0, %v5137_v31  ;;  %5095 = vmatmul.mubr.msk.bf16.gmra.mrb[20].mxu1 %vm202_vm0, %v5141_v43  ;;  %v3642_v31 = vld [vmem:[%s7980_s6 + $0x24] sm:$0xf] }
  0x48   :  { %343 = vmatprep.mubr.bf16.mxu0 %v5584_v0  ;;  %5098 = vmatprep.mubr.msk.bf16.mxu1 %vm202_vm0, %v5791_v44 }
  0x4a   :  { %1011 = vperm.xlu1 %5122, %v680_v45   ;;  %999 = vperm.xlu0 %5121, %v679_v46  }
  0x4e   :  { %1035 = vperm.xlu1 %5122, %v682_v47   ;;  %1023 = vperm.xlu0 %5121, %v681_v48   ;;  %v3656_v47 = vld [vmem:[%s7980_s6 + $0x5c] sm:$0xf]  ;;  %v3655_v48 = vld [vmem:[%s7980_s6 + $0x58] sm:$0xf] }
  0x4f   :  { %4670 = vmatmul.mubr.msk.bf16.gmra.mrb[24].mxu0 %vm202_vm0, %v5138_v32  ;;  %5099 = vmatmul.mubr.msk.bf16.gmra.mrb[24].mxu1 %vm202_vm0, %v5813_v49  ;;  %v3641_v32 = vld [vmem:[%s7980_s6 + $0x20] sm:$0xf] }
  0x50   :  { %353 = vmatprep.mubr.bf16.mxu0 %v5584_v0  ;;  %5102 = vmatprep.mubr.msk.bf16.mxu1 %vm202_vm0, %v5818_v50 }
  0x52   :  { %1059 = vperm.xlu1 %5122, %v684_v51   ;;  %1047 = vperm.xlu0 %5121, %v683_v52   ;;  %v3658_v51 = vld [vmem:[%s7980_s6 + $0x64] sm:$0xf]  ;;  %v3657_v52 = vld [vmem:[%s7980_s6 + $0x60] sm:$0xf] }
  0x56   :  { %2189 = vperm.xlu1 %5122, %v2144_v53   ;;  %2177 = vperm.xlu0 %5121, %v2143_v54   ;;  %v3660_v53 = vld [vmem:[%s7980_s6 + $0x6c] sm:$0xf]  ;;  %v3659_v54 = vld [vmem:[%s7980_s6 + $0x68] sm:$0xf] }
  0x57   :  { %4671 = vmatmul.mubr.msk.bf16.gmra.mrb[28].mxu0 %vm202_vm0, %v5139_v37  ;;  %5103 = vmatmul.mubr.msk.bf16.gmra.mrb[28].mxu1 %vm202_vm0, %v5841_v55  ;;  %v3648_v37 = vld [vmem:[%s7980_s6 + $0x3c] sm:$0xf] }
  0x58   :  { %363 = vmatprep.mubr.bf16.mxu0 %v5584_v0  ;;  %5106 = vmatprep.mubr.msk.bf16.mxu1 %vm202_vm0, %v5846_v56 }
  0x5a   :  { %2213 = vperm.xlu1 %5122, %v2146_v57   ;;  %2201 = vperm.xlu0 %5121, %v2145_v58   ;;  %v3662_v57 = vld [vmem:[%s7980_s6 + $0x74] sm:$0xf]  ;;  %v3661_v58 = vld [vmem:[%s7980_s6 + $0x70] sm:$0xf] }
  0x5e   :  { %2237 = vperm.xlu1 %5122, %v2148_v59   ;;  %2225 = vperm.xlu0 %5121, %v2147_v60  }
  0x5f   :  { %4672 = vmatmul.mubr.msk.bf16.gmra.mrb[32].mxu0 %vm202_vm0, %v5140_v38  ;;  %5107 = vmatmul.mubr.msk.bf16.gmra.mrb[32].mxu1 %vm202_vm0, %v5678_v12  ;;  %v2164_v12 = vld [vmem:[%s7978_s4 + $0x54] sm:$0xf]  ;;  %v3647_v38 = vld [vmem:[%s7980_s6 + $0x38] sm:$0xf] }
  0x60   :  { %373 = vmatprep.mubr.bf16.mxu0 %v5584_v0 }
  0x62   :  { %2261 = vperm.xlu1 %5122, %v2150_v61   ;;  %2249 = vperm.xlu0 %5121, %v2149_v62   ;;  %v3664_v61 = vld [vmem:[%s7980_s6 + $0x7c] sm:$0xf]  ;;  %v3663_v62 = vld [vmem:[%s7980_s6 + $0x78] sm:$0xf] }
  0x66   :  { %2285 = vperm.xlu1 %5122, %v2152_v63   ;;  %2273 = vperm.xlu0 %5121, %v2151_v1   ;;  %v4530_v63 = vld [vmem:[%s7982_s8] sm:$0xff] }
  0x67   :  { %4673 = vmatmul.mubr.msk.bf16.gmra.mrb[36].mxu0 %vm202_vm0, %v5141_v43  ;;  %v3654_v43 = vld [vmem:[%s7980_s6 + $0x54] sm:$0xf] }
  0x68   :  { %383 = vmatprep.mubr.bf16.mxu0 %v5584_v0 }
  0x6a   :  { %2309 = vperm.xlu1 %5122, %v2154_v2   ;;  %2297 = vperm.xlu0 %5121, %v2153_v3  }
  0x6e   :  { %2333 = vperm.xlu1 %5122, %v2156_v4   ;;  %2321 = vperm.xlu0 %5121, %v2155_v5   ;;  %v5149_v5 = vld [vmem:[%s7977_s3 + $0x4] ss:$8 sps:$4 sm:$0xff]  }
  0x6f   :  { %4674 = vmatmul.mubr.msk.bf16.gmra.mrb[40].mxu0 %vm202_vm0, %v5791_v44  ;;  %v3653_v44 = vld [vmem:[%s7980_s6 + $0x50] sm:$0xf]  ;;  %1773 = vmatprep.mubr.bf16.mxu1 %v5149_v5 }
  0x70   :  { %393 = vmatprep.mubr.bf16.mxu0 %v5584_v0 }
  0x72   :  { %2357 = vperm.xlu1 %5122, %v2158_v6   ;;  %2345 = vperm.xlu0 %5121, %v2157_v7  }
  0x76   :  { %2381 = vperm.xlu1 %5122, %v2160_v8   ;;  %2369 = vperm.xlu0 %5121, %v2159_v9   ;;  %v5585_v8 = vmov 839922192  }
  0x77   :  { %4675 = vmatmul.mubr.msk.bf16.gmra.mrb[44].mxu0 %vm202_vm0, %v5813_v49  ;;  %v691_v9 = vunpack.c.l.s4 %v5585_v8 }
  0x78   :  { %403 = vmatprep.mubr.bf16.mxu0 %v5584_v0 }
  0x7a   :  { %2405 = vperm.xlu1 %5122, %v2162_v10   ;;  %2393 = vperm.xlu0 %5121, %v2161_v11   ;;  %v693_v10 = vlaneseq }
  0x7e   :  { %2429 = vperm.xlu1 %5122, %v2164_v12   ;;  %2417 = vperm.xlu0 %5121, %v2163_v13   ;;  %v692_v13 = vunpack.c.0.s8 %v691_v9 }
  0x7f   :  { %4676 = vmatmul.mubr.msk.bf16.gmra.mrb[48].mxu0 %vm202_vm0, %v5818_v50 }
  0x80   :  { %413 = vmatprep.mubr.bf16.mxu0 %v5584_v0 }
  0x82   :  { %2453 = vperm.xlu1 %5122, %v2166_v14   ;;  %2441 = vperm.xlu0 %5121, %v2165_v15   ;;  %v694_v14 = vshrl.u32 %v693_v10, 7 }
  0x86   :  { %2477 = vperm.xlu1 %5122, %v2168_v16   ;;  %2465 = vperm.xlu0 %5121, %v2167_v17   ;;  %v6098_v17 = vsub.s32 %v692_v13, %v694_v14 }
  0x87   :  { %4677 = vmatmul.mubr.msk.bf16.gmra.mrb[52].mxu0 %vm202_vm0, %v5841_v55 }
  0x88   :  { %423 = vmatprep.mubr.bf16.mxu0 %v5584_v0  ;;  %v2173_v0 = vld [vmem:[%s7978_s4 + $0x78] sm:$0xf] }
  0x8a   :  { %2501 = vperm.xlu1 %5122, %v2170_v18   ;;  %2489 = vperm.xlu0 %5121, %v2169_v19  }
  0x8e   :  { %2525 = vperm.xlu1 %5122, %v2172_v20   ;;  %2513 = vperm.xlu0 %5121, %v2171_v21  }
  0x8f   :  { %4678 = vmatmul.mubr.msk.bf16.gmra.mrb[56].mxu0 %vm202_vm0, %v5846_v56 }
  0x90   :  { %1966 = vmatprep.mubr.bf16.mxu0 %v5149_v5 }
  0x92   :  { %2549 = vperm.xlu1 %5122, %v2174_v22   ;;  %2537 = vperm.xlu0 %5121, %v2173_v0  }
  0x95   :  { %v6030_v45 = vpop.permute.xlu1 %711  ;;  %v688_v46 = vpop.permute.xlu0 %687 }
  0x96   :  { %3679 = vperm.xlu1 %5122, %v3634_v23   ;;  %3667 = vperm.xlu0 %5121, %v3633_v24   ;;  %v696_v18 = vrot.slane %v688_v46, %v6098_v17 }
  0x99   :  { %v6038_v49 = vpop.permute.xlu1 %723  ;;  %v700_v50 = vpop.permute.xlu0 %699 }
  0x9a   :  { %3703 = vperm.xlu1 %5122, %v3636_v25   ;;  %3691 = vperm.xlu0 %5121, %v3635_v26   ;;  %v708_v19 = vrot.slane %v700_v50, %v6098_v17 }
  0x9c   :  { %v6110_v25 = vcombine.low %v696_v18, %v708_v19 }
  0x9d   :  { %v6052_v55 = vpop.permute.xlu1 %747  ;;  %v6054_v56 = vpop.permute.xlu0 %735 }
  0x9e   :  { %3727 = vperm.xlu1 %5122, %v3638_v27   ;;  %3715 = vperm.xlu0 %5121, %v3637_v28  }
  0xa1   :  { %v6062_v59 = vpop.permute.xlu1 %771  ;;  %v6064_v60 = vpop.permute.xlu0 %759 }
  0xa2   :  { %3751 = vperm.xlu1 %5122, %v3640_v29   ;;  %3739 = vperm.xlu0 %5121, %v3639_v30   ;;  %v780_v18 = vrot.slane %v6062_v59, %v6098_v17 }
  0xa5   :  { %v6075_v1 = vpop.permute.xlu1 %795  ;;  %v6077_v2 = vpop.permute.xlu0 %783 }
  0xa6   :  { %3775 = vperm.xlu1 %5122, %v3642_v31   ;;  %3763 = vperm.xlu0 %5121, %v3641_v32  }
  0xa9   :  { %v6079_v3 = vpop.permute.xlu1 %819  ;;  %v6081_v4 = vpop.permute.xlu0 %807 }
  0xaa   :  { %3799 = vperm.xlu1 %5122, %v3644_v33   ;;  %3787 = vperm.xlu0 %5121, %v3643_v34   ;;  %v720_v34 = vrot.slane %v6030_v45, %v6098_v17 }
  0xad   :  { %v6086_v6 = vpop.permute.xlu1 %843  ;;  %v6088_v7 = vpop.permute.xlu0 %831 }
  0xae   :  { %3823 = vperm.xlu1 %5122, %v3646_v35   ;;  %3811 = vperm.xlu0 %5121, %v3645_v36   ;;  %v732_v35 = vrot.slane %v6038_v49, %v6098_v17 }
  0xb0   :  { %v6140_v46 = vcombine.low %v720_v34, %v732_v35 }
  0xb1   :  { %v6090_v11 = vpop.permute.xlu1 %867  ;;  %v6092_v12 = vpop.permute.xlu0 %855 }
  0xb2   :  { %3847 = vperm.xlu1 %5122, %v3648_v37   ;;  %3835 = vperm.xlu0 %5121, %v3647_v38  }
  0xb5   :  { %v6094_v15 = vpop.permute.xlu1 %891  ;;  %v6096_v16 = vpop.permute.xlu0 %879 }
  0xb6   :  { %3871 = vperm.xlu1 %5122, %v3650_v39   ;;  %3859 = vperm.xlu0 %5121, %v3649_v40  }
  0xb9   :  { %v6102_v20 = vpop.permute.xlu1 %915  ;;  %v6104_v21 = vpop.permute.xlu0 %903 }
  0xba   :  { %3895 = vperm.xlu1 %5122, %v3652_v41   ;;  %3883 = vperm.xlu0 %5121, %v3651_v42  }
  0xbd   :  { %v6127_v37 = vpop.permute.xlu1 %939  ;;  %v6129_v38 = vpop.permute.xlu0 %927 }
  0xbe   :  { %3919 = vperm.xlu1 %5122, %v3654_v43   ;;  %3907 = vperm.xlu0 %5121, %v3653_v44  }
  0xc2   :  { %3943 = vperm.xlu1 %5122, %v3656_v47   ;;  %3931 = vperm.xlu0 %5121, %v3655_v48  }
  0xc6   :  { %3967 = vperm.xlu1 %5122, %v3658_v51   ;;  %3955 = vperm.xlu0 %5121, %v3657_v52  }
  0xca   :  { %3991 = vperm.xlu1 %5122, %v3660_v53   ;;  %3979 = vperm.xlu0 %5121, %v3659_v54  }
  0xce   :  { %4015 = vperm.xlu1 %5122, %v3662_v57   ;;  %4003 = vperm.xlu0 %5121, %v3661_v58   ;;  %v756_v57 = vrot.slane %v6052_v55, %v6098_v17  ;;  %v744_v58 = vrot.slane %v6054_v56, %v6098_v17 }
  0xd0   :  { %v6170_v56 = vcombine.low %v744_v58, %v756_v57 }
  0xd2   :  { %4039 = vperm.xlu1 %5122, %v3664_v61   ;;  %4027 = vperm.xlu0 %5121, %v3663_v62   ;;  %v6157_v62 = vpop.permute.xlu1 %963 }
  0xd6   :  { %4533 = vperm.xlu0 %5121, %v4530_v63   ;;  %v6159_v63 = vpop.permute.xlu0 %951 }
  0xf2   :  { %v285_v22 = vpop.f32.mrb[0].mxu0  ;;  %v6106_v0 = vpop.f32.mrb[0].mxu1 }
  0xf3   :  { %v287_v23 = vpop.f32.mrb[1].mxu0  ;;  %v6108_v24 = vpop.f32.mrb[1].mxu1 }
  0xf4   :  { %v289_v26 = vpop.f32.mrb[2].mxu0  ;;  %v6112_v27 = vpop.f32.mrb[2].mxu1 }
  0xf5   :  { %v605_v28 = vpack.c.bf16 %v289_v26, %v285_v22  ;;  %v291_v30 = vpop.f32.mrb[3].mxu0  ;;  %v6116_v31 = vpop.f32.mrb[3].mxu1 }
  0xf6   :  { %v606_v32 = vpack.c.bf16 %v291_v30, %v287_v23  ;;  %v768_v23 = vrot.slane %v6064_v60, %v6098_v17 }
  0xf7   :  { %v6125_v36 = vadd.bf16 %v6110_v25, %v605_v28 }
  0xf8   :  { %v6132_v39 = vadd.bf16 %v6110_v25, %v606_v32  ;;  %v6199_v57 = vcombine.low %v768_v23, %v780_v18 }
  0xf9   :  { %v1262_v40 = vmul.bf16 1069105081, %v6125_v36  ;;  %vm1213_vm2 = vcmp.gt.bf16.partialorder %v6125_v36, 0 }
  0xfa   :  { %v295_v41 = vpop.f32.mrb[4].mxu0  ;;  %v6135_v42 = vpop.f32.mrb[4].mxu1  ;;  %v1265_v43 = vmul.bf16 1069105081, %v6132_v39  ;;  %vm1214_vm1 = vcmp.gt.bf16.partialorder %v6132_v39, 0 }
  0xfb   :  { %v297_v44 = vpop.f32.mrb[5].mxu0  ;;  %v6138_v45 = vpop.f32.mrb[5].mxu1  ;;  %5245 = vpow.bf16 %v1262_v40 }
  0xfc   :  { %v299_v47 = vpop.f32.mrb[6].mxu0  ;;  %v6142_v48 = vpop.f32.mrb[6].mxu1  ;;  %5247 = vpow.bf16 %v1265_v43 }
  0xfd   :  { %v608_v49 = vpack.c.bf16 %v299_v47, %v295_v41  ;;  %v301_v51 = vpop.f32.mrb[7].mxu0  ;;  %v6146_v52 = vpop.f32.mrb[7].mxu1  ;;  %v5586_v41 = vmov 1065369472   ;;  %v792_v47 = vrot.slane %v6077_v2, %v6098_v17  ;;  %v816_v2 = vrot.slane %v6081_v4, %v6098_v17 }
  0xfe   :  { %v609_v53 = vpack.c.bf16 %v301_v51, %v297_v44  ;;  %v607_v54 = vpack.c.bf16 %v6146_v52, %v6138_v45  ;;  %v804_v44 = vrot.slane %v6075_v1, %v6098_v17  ;;  %v6194_v51 = vpop.permute.xlu0 %975  ;;  %v828_v1 = vrot.slane %v6079_v3, %v6098_v17 }
  0xff   :  { %v6155_v61 = vadd.bf16 %v6140_v46, %v608_v49  ;;  %v6192_v49 = vpop.permute.xlu1 %987 }
 0x100   :  { %v6162_v5 = vadd.bf16 %v6140_v46, %v609_v53 }
 0x101   :  { %v1271_v8 = vmul.bf16 1069105081, %v6155_v61  ;;  %vm1216_vm4 = vcmp.gt.bf16.partialorder %v6155_v61, 0 }
 0x102   :  { %v305_v9 = vpop.f32.mrb[8].mxu0  ;;  %v6165_v10 = vpop.f32.mrb[8].mxu1  ;;  %v1274_v55 = vmul.bf16 1069105081, %v6162_v5  ;;  %vm1217_vm3 = vcmp.gt.bf16.partialorder %v6162_v5, 0 }
 0x103   :  { %v307_v13 = vpop.f32.mrb[9].mxu0  ;;  %v6168_v14 = vpop.f32.mrb[9].mxu1  ;;  %5249 = vpow.bf16 %v1271_v8 }
 0x104   :  { %v309_v19 = vpop.f32.mrb[10].mxu0  ;;  %v6174_v22 = vpop.f32.mrb[10].mxu1  ;;  %5251 = vpow.bf16 %v1274_v55 }
 0x105   :  { %v611_v26 = vpack.c.bf16 %v309_v19, %v305_v9  ;;  %v311_v30 = vpop.f32.mrb[11].mxu0  ;;  %v6180_v32 = vpop.f32.mrb[11].mxu1 }
 0x106   :  { %v5246_v34 = vpop.eup %5245  ;;  %v612_v35 = vpack.c.bf16 %v311_v30, %v307_v13  ;;  %v852_v13 = vrot.slane %v6086_v6, %v6098_v17 }
 0x107   :  { %v6185_v59 = vadd.bf16 %v6170_v56, %v611_v26  ;;  %v1405_v43 = vsub.bf16 %v5246_v34, %v5586_v41  ;;  %v5248_v60 = vpop.eup %5247  ;;  %v840_v26 = vrot.slane %v6088_v7, %v6098_v17 }
 0x108   :  { %v6197_v53 = vadd.bf16 %v6170_v56, %v612_v35  ;;  %v1406_v55 = vsub.bf16 %v5248_v60, %v5586_v41  ;;  %v6216_v35 = vcombine.low %v792_v47, %v804_v44 }
 0x109   :  { %v1280_v58 = vmul.bf16 1069105081, %v6185_v59  ;;  %v1453_v34 = vmul.bf16 1071005654, %v1405_v43  ;;  %v6231_v47 = vcombine.low %v840_v26, %v852_v13  ;;  %v6246_v13 = vpop.permute.xlu0 %999  ;;  %vm1219_vm6 = vcmp.gt.bf16.partialorder %v6185_v59, 0 }
 0x10a   :  { %v315_v8 = vpop.f32.mrb[12].mxu0  ;;  %v6202_v9 = vpop.f32.mrb[12].mxu1  ;;  %v1283_v19 = vmul.bf16 1069105081, %v6197_v53  ;;  %v1454_v30 = vmul.bf16 1071005654, %v1406_v55  ;;  %v6226_v55 = vcombine.low %v816_v2, %v828_v1  ;;  %v876_v1 = vrot.slane %v6090_v11, %v6098_v17 }
 0x10b   :  { %v317_v18 = vpop.f32.mrb[13].mxu0  ;;  %v6212_v23 = vpop.f32.mrb[13].mxu1  ;;  %5253 = vpow.bf16 %v1280_v58  ;;  %v900_v2 = vrot.slane %v6094_v15, %v6098_v17  ;;  %v924_v11 = vrot.slane %v6102_v20, %v6098_v17  ;;  %vm1220_vm5 = vcmp.gt.bf16.partialorder %v6197_v53, 0 }
 0x10c   :  { %v319_v3 = vpop.f32.mrb[14].mxu0  ;;  %v6218_v60 = vpop.f32.mrb[14].mxu1  ;;  %5255 = vpow.bf16 %v1283_v19  ;;  %v1502_v7 = vsel %vm1214_vm1, %v6132_v39, %v1454_v30  ;;  %v1501_v19 = vsel %vm1213_vm2, %v6125_v36, %v1453_v34  ;;  %v888_v36 = vrot.slane %v6096_v16, %v6098_v17 }
 0x10d   :  { %v614_v4 = vpack.c.bf16 %v319_v3, %v315_v8  ;;  %v321_v29 = vpop.f32.mrb[15].mxu0  ;;  %v6223_v33 = vpop.f32.mrb[15].mxu1  ;;  %1741 = vmatprep.subr.bf16.mxu1 %v1502_v7  ;;  %v948_v7 = vrot.slane %v6127_v37, %v6098_v17  ;;  %v996_v37 = vrot.slane %v6192_v49, %v6098_v17 }
 0x10e   :  { %v5250_v58 = vpop.eup %5249  ;;  %v615_v43 = vpack.c.bf16 %v321_v29, %v317_v18  ;;  %v864_v29 = vrot.slane %v6092_v12, %v6098_v17  ;;  %v6244_v18 = vpop.permute.xlu1 %1011  ;;  %1742 = vmatpush1.bf16.msra.mxu1 %v1501_v19  ;;  %v972_v19 = vrot.slane %v6157_v62, %v6098_v17 }
 0x10f   :  { %v6234_v8 = vadd.bf16 %v6199_v57, %v614_v4  ;;  %v1408_v3 = vsub.bf16 %v5250_v58, %v5586_v41  ;;  %v5252_v39 = vpop.eup %5251  ;;  %v912_v4 = vrot.slane %v6104_v21, %v6098_v17  ;;  %v936_v58 = vrot.slane %v6129_v38, %v6098_v17 }
 0x110   :  { %v6249_v26 = vadd.bf16 %v6199_v57, %v615_v43  ;;  %v1409_v15 = vsub.bf16 %v5252_v39, %v5586_v41  ;;  %v960_v21 = vrot.slane %v6159_v63, %v6098_v17  ;;  %v984_v38 = vrot.slane %v6194_v51, %v6098_v17 }
 0x111   :  { %v1289_v30 = vmul.bf16 1069105081, %v6234_v8  ;;  %v1456_v39 = vmul.bf16 1071005654, %v1408_v3  ;;  %v6284_v49 = vcombine.low %v864_v29, %v876_v1  ;;  %v6298_v1 = vcombine.low %v936_v58, %v948_v7 }
 0x112   :  { %v325_v12 = vpop.f32.mrb[16].mxu0  ;;  %v6256_v34 = vpop.f32.mrb[16].mxu1  ;;  %v1292_v16 = vmul.bf16 1069105081, %v6249_v26  ;;  %v1457_v44 = vmul.bf16 1071005654, %v1409_v15  ;;  %v1020_v45 = vrot.slane %v6244_v18, %v6098_v17 }
 0x113   :  { %v327_v43 = vpop.f32.mrb[17].mxu0  ;;  %v6266_v20 = vpop.f32.mrb[17].mxu1  ;;  %5257 = vpow.bf16 %v1289_v30  ;;  %vm1223_vm7 = vcmp.gt.bf16.partialorder %v6249_v26, 0  ;;  %vm1222_vm8 = vcmp.gt.bf16.partialorder %v6234_v8, 0 }
 0x114   :  { %v329_v6 = vpop.f32.mrb[18].mxu0  ;;  %v6276_v40 = vpop.f32.mrb[18].mxu1  ;;  %5259 = vpow.bf16 %v1292_v16  ;;  %v1505_v63 = vsel %vm1217_vm3, %v6162_v5, %v1457_v44  ;;  %v6289_v16 = vcombine.low %v888_v36, %v900_v2  ;;  %v6296_v44 = vcombine.low %v912_v4, %v924_v11 }
 0x115   :  { %v617_v28 = vpack.c.bf16 %v329_v6, %v325_v12  ;;  %v331_v3 = vpop.f32.mrb[19].mxu0  ;;  %v6281_v30 = vpop.f32.mrb[19].mxu1  ;;  %1743 = vmatprep.subr.bf16.mxu1 %v1505_v63  ;;  %v1504_v12 = vsel %vm1216_vm4, %v6155_v61, %v1456_v39  ;;  %v6308_v2 = vadd.bf16 %v6110_v25, %v607_v54  ;;  %v6313_v61 = vcombine.low %v960_v21, %v972_v19 }
 0x116   :  { %v5254_v15 = vpop.eup %5253  ;;  %v618_v50 = vpack.c.bf16 %v331_v3, %v327_v43  ;;  %v6300_v29 = vpop.permute.xlu1 %1035  ;;  %1744 = vmatpush1.bf16.msra.mxu1 %v1504_v12  ;;  %v6315_v36 = vcombine.low %v984_v38, %v996_v37  ;;  %v1008_v25 = vrot.slane %v6246_v13, %v6098_v17 }
 0x117   :  { %v6292_v6 = vadd.bf16 %v6216_v35, %v617_v28  ;;  %v1411_v62 = vsub.bf16 %v5254_v15, %v5586_v41  ;;  %v5256_v5 = vpop.eup %5255  ;;  %v6302_v43 = vpop.permute.xlu0 %1023  ;;  %v1044_v21 = vrot.slane %v6300_v29, %v6098_v17  ;;  %v1268_v63 = vmul.bf16 1069105081, %v6308_v2 }
 0x118   :  { %v6311_v28 = vadd.bf16 %v6216_v35, %v618_v50  ;;  %v1412_v58 = vsub.bf16 %v5256_v5, %v5586_v41  ;;  %v7984_v50 = vpack.c.bf16 %v6142_v48, %v6135_v42  ;;  %v7985_v42 = vpack.c.bf16 %v6174_v22, %v6165_v10 }
 0x119   :  { %v1298_v11 = vmul.bf16 1069105081, %v6292_v6  ;;  %v1459_v38 = vmul.bf16 1071005654, %v1411_v62  ;;  %vm1215_vm10 = vcmp.gt.bf16.partialorder %v6308_v2, 0  ;;  %vm1225_vm11 = vcmp.gt.bf16.partialorder %v6292_v6, 0 }
 0x11a   :  { %v335_v4 = vpop.f32.mrb[20].mxu0  ;;  %v5096_v7 = vpop.f32.mrb[20].mxu1  ;;  %v6327_v52 = vadd.bf16 %v6140_v46, %v7984_v50  ;;  %v1301_v54 = vmul.bf16 1069105081, %v6311_v28  ;;  %v1460_v37 = vmul.bf16 1071005654, %v1412_v58  ;;  %v6339_v46 = vadd.bf16 %v6199_v57, %v7985_v42 }
 0x11b   :  { %v337_v19 = vpop.f32.mrb[21].mxu0  ;;  %v542_v39 = vpop.f32.mrb[21].mxu1  ;;  %5261 = vpow.bf16 %v1298_v11  ;;  %vm1226_vm9 = vcmp.gt.bf16.partialorder %v6311_v28, 0 }
 0x11c   :  { %v339_v48 = vpop.f32.mrb[22].mxu0  ;;  %v5097_v15 = vpop.f32.mrb[22].mxu1  ;;  %5263 = vpow.bf16 %v1301_v54  ;;  %v1508_v58 = vsel %vm1220_vm5, %v6197_v53, %v1460_v37  ;;  %v1277_v3 = vmul.bf16 1069105081, %v6327_v52  ;;  %vm1218_vm15 = vcmp.gt.bf16.partialorder %v6327_v52, 0 }
 0x11d   :  { %v620_v12 = vpack.c.bf16 %v339_v48, %v335_v4  ;;  %v634_v5 = vpack.c.bf16 %v5097_v15, %v5096_v7  ;;  %v341_v11 = vpop.f32.mrb[23].mxu0  ;;  %v545_v62 = vpop.f32.mrb[23].mxu1  ;;  %1745 = vmatprep.subr.bf16.mxu1 %v1508_v58  ;;  %v1507_v7 = vsel %vm1219_vm6, %v6185_v59, %v1459_v38  ;;  %5265 = vpow.bf16 %v1268_v63 }
 0x11e   :  { %v5258_v50 = vpop.eup %5257  ;;  %v6343_v51 = vpop.permute.xlu1 %1059  ;;  %v621_v10 = vpack.c.bf16 %v341_v11, %v337_v19  ;;  %v631_v22 = vpack.c.bf16 %v545_v62, %v542_v39  ;;  %v7986_v19 = vpack.c.bf16 %v6180_v32, %v6168_v14  ;;  %1746 = vmatpush1.bf16.msra.mxu1 %v1507_v7  ;;  %v1295_v59 = vmul.bf16 1069105081, %v6339_v46 }
 0x11f   :  { %v1068_v57 = vrot.slane %v6343_v51, %v6098_v17  ;;  %v1048_v54 = vpop.permute.xlu0 %1047  ;;  %v6350_v4 = vadd.bf16 %v6226_v55, %v620_v12  ;;  %v1414_v53 = vsub.bf16 %v5258_v50, %v5586_v41  ;;  %v5260_v37 = vpop.eup %5259  ;;  %5267 = vpow.bf16 %v1277_v3 }
 0x120   :  { %v1056_v42 = vrot.slane %v1048_v54, %v6098_v17  ;;  %v6359_v39 = vadd.bf16 %v6170_v56, %v7986_v19  ;;  %v6362_v48 = vadd.bf16 %v6226_v55, %v621_v10  ;;  %v6365_v51 = vadd.bf16 %v6289_v16, %v631_v22 }
 0x121   :  { %v1307_v38 = vmul.bf16 1069105081, %v6350_v4  ;;  %v1415_v11 = vsub.bf16 %v5260_v37, %v5586_v41  ;;  %v6371_v14 = vadd.bf16 %v6296_v44, %v634_v5  ;;  %v7987_v63 = vpack.c.bf16 %v6218_v60, %v6202_v9 }
 0x122   :  { %v345_v15 = vpop.f32.mrb[24].mxu0  ;;  %v5100_v12 = vpop.f32.mrb[24].mxu1  ;;  %v1310_v56 = vmul.bf16 1069105081, %v6362_v48  ;;  %v1340_v32 = vmul.bf16 1069105081, %v6365_v51  ;;  %v7988_v5 = vpack.c.bf16 %v6223_v33, %v6212_v23 }
 0x123   :  { %v347_v62 = vpop.f32.mrb[25].mxu0  ;;  %v558_v58 = vpop.f32.mrb[25].mxu1  ;;  %v6379_v50 = vadd.bf16 %v6226_v55, %v7987_v63  ;;  %5269 = vpow.bf16 %v1307_v38  ;;  %v1463_v10 = vmul.bf16 1071005654, %v1415_v11  ;;  %v1462_v22 = vmul.bf16 1071005654, %v1414_v53 }
 0x124   :  { %v1286_v3 = vmul.bf16 1069105081, %v6359_v39  ;;  %v6386_v54 = vadd.bf16 %v6216_v35, %v7988_v5  ;;  %v349_v7 = vpop.f32.mrb[26].mxu0  ;;  %v5101_v37 = vpop.f32.mrb[26].mxu1  ;;  %5271 = vpow.bf16 %v1310_v56  ;;  %v1349_v11 = vmul.bf16 1069105081, %v6371_v14 }
 0x125   :  { %v623_v9 = vpack.c.bf16 %v349_v7, %v345_v15  ;;  %v640_v60 = vpack.c.bf16 %v5101_v37, %v5100_v12  ;;  %v351_v55 = vpop.f32.mrb[27].mxu0  ;;  %v561_v19 = vpop.f32.mrb[27].mxu1  ;;  %v1511_v53 = vsel %vm1223_vm7, %v6249_v26, %v1463_v10  ;;  %5273 = vpow.bf16 %v1340_v32 }
 0x126   :  { %v5262_v38 = vpop.eup %5261  ;;  %v624_v33 = vpack.c.bf16 %v351_v55, %v347_v62  ;;  %v637_v23 = vpack.c.bf16 %v561_v19, %v558_v58  ;;  %1747 = vmatprep.subr.bf16.mxu1 %v1511_v53  ;;  %v6398_v35 = vcombine.low %v1008_v25, %v1020_v45  ;;  %v1313_v15 = vmul.bf16 1069105081, %v6379_v50 }
 0x127   :  { %v1510_v12 = vsel %vm1222_vm8, %v6234_v8, %v1462_v22  ;;  %v1417_v26 = vsub.bf16 %v5262_v38, %v5586_v41  ;;  %v5264_v56 = vpop.eup %5263  ;;  %5275 = vpow.bf16 %v1295_v59  ;;  %v6404_v32 = vadd.bf16 %v6231_v47, %v623_v9 }
 0x128   :  { %v6407_v62 = vadd.bf16 %v6231_v47, %v624_v33  ;;  %v6410_v18 = vadd.bf16 %v6298_v1, %v637_v23  ;;  %1748 = vmatpush1.bf16.msra.mxu1 %v1510_v12  ;;  %v7989_v8 = vrot.slane %v6302_v43, %v6098_v17  ;;  %v6420_v45 = vcombine.low %v1056_v42, %v1068_v57  ;;  %v5266_v57 = vpop.eup %5265 }
 0x129   :  { %5277 = vpow.bf16 %v1286_v3  ;;  %v1418_v58 = vsub.bf16 %v5264_v56, %v5586_v41  ;;  %v1304_v63 = vmul.bf16 1069105081, %v6386_v54  ;;  %v6425_v10 = vadd.bf16 %v6313_v61, %v640_v60 }
 0x12a   :  { %v6418_v13 = vcombine.low %v7989_v8, %v1044_v21  ;;  %v355_v25 = vpop.f32.mrb[28].mxu0  ;;  %v5104_v59 = vpop.f32.mrb[28].mxu1  ;;  %5279 = vpow.bf16 %v1349_v11  ;;  %v1319_v29 = vmul.bf16 1069105081, %v6407_v62  ;;  %v1465_v21 = vmul.bf16 1071005654, %v1417_v26 }
 0x12b   :  { %v357_v22 = vpop.f32.mrb[29].mxu0  ;;  %v574_v5 = vpop.f32.mrb[29].mxu1  ;;  %5281 = vpow.bf16 %v1313_v15  ;;  %v1466_v43 = vmul.bf16 1071005654, %v1418_v58  ;;  %v7990_v42 = vpack.c.bf16 %v6276_v40, %v6256_v34  ;;  %v7991_v7 = vpack.c.bf16 %v6281_v30, %v6266_v20 }
 0x12c   :  { %v1316_v9 = vmul.bf16 1069105081, %v6404_v32  ;;  %v1358_v60 = vmul.bf16 1069105081, %v6410_v18  ;;  %v359_v55 = vpop.f32.mrb[30].mxu0  ;;  %v5105_v19 = vpop.f32.mrb[30].mxu1  ;;  %5283 = vpow.bf16 %v1319_v29  ;;  %v1513_v15 = vsel %vm1225_vm11, %v6292_v6, %v1465_v21 }
 0x12d   :  { %v6433_v3 = vadd.bf16 %v6284_v49, %v7990_v42  ;;  %v6439_v37 = vadd.bf16 %v6231_v47, %v7991_v7  ;;  %v5268_v53 = vpop.eup %5267  ;;  %v626_v38 = vpack.c.bf16 %v359_v55, %v355_v25  ;;  %v646_v11 = vpack.c.bf16 %v5105_v19, %v5104_v59  ;;  %v361_v40 = vpop.f32.mrb[31].mxu0 }
 0x12e   :  { %v577_v34 = vpop.f32.mrb[31].mxu1  ;;  %v1514_v33 = vsel %vm1226_vm9, %v6311_v28, %v1466_v43  ;;  %v5270_v47 = vpop.eup %5269  ;;  %v1367_v20 = vmul.bf16 1069105081, %v6425_v10  ;;  %v627_v30 = vpack.c.bf16 %v361_v40, %v357_v22  ;;  %5285 = vpow.bf16 %v1304_v63 }
 0x12f   :  { %v643_v23 = vpack.c.bf16 %v577_v34, %v574_v5  ;;  %1749 = vmatprep.subr.bf16.mxu1 %v1514_v33  ;;  %v1420_v12 = vsub.bf16 %v5270_v47, %v5586_v41  ;;  %v1407_v26 = vsub.bf16 %v5266_v57, %v5586_v41  ;;  %v5272_v56 = vpop.eup %5271  ;;  %v1331_v28 = vmul.bf16 1069105081, %v6433_v3 }
 0x130   :  { %v1322_v8 = vmul.bf16 1069105081, %v6439_v37  ;;  %5287 = vpow.bf16 %v1358_v60  ;;  %v6455_v25 = vadd.bf16 %v6284_v49, %v627_v30  ;;  %1750 = vmatpush1.bf16.msra.mxu1 %v1513_v15  ;;  %v5274_v59 = vpop.eup %5273  ;;  %vm1229_vm12 = vcmp.gt.bf16.partialorder %v6362_v48, 0 }
 0x131   :  { %5289 = vpow.bf16 %v1316_v9  ;;  %v6458_v58 = vadd.bf16 %v6315_v36, %v643_v23  ;;  %v1421_v29 = vsub.bf16 %v5272_v56, %v5586_v41  ;;  %v6463_v22 = vadd.bf16 %v6284_v49, %v626_v38 }
 0x132   :  { %v365_v6 = vpop.f32.mrb[32].mxu0  ;;  %v5108_v63 = vpop.f32.mrb[32].mxu1  ;;  %5291 = vpow.bf16 %v1367_v20  ;;  %vm1239_vm13 = vcmp.gt.bf16.partialorder %v6365_v51, 0  ;;  %v1431_v21 = vsub.bf16 %v5274_v59, %v5586_v41  ;;  %v6468_v42 = vadd.bf16 %v6398_v35, %v646_v11 }
 0x133   :  { %v367_v5 = vpop.f32.mrb[33].mxu0  ;;  %v590_v43 = vpop.f32.mrb[33].mxu1  ;;  %v1469_v7 = vmul.bf16 1071005654, %v1421_v29  ;;  %v1468_v9 = vmul.bf16 1071005654, %v1420_v12  ;;  %5293 = vpow.bf16 %v1331_v28  ;;  %v1410_v34 = vsub.bf16 %v5268_v53, %v5586_v41 }
 0x134   :  { %v5276_v57 = vpop.eup %5275  ;;  %v1455_v60 = vmul.bf16 1071005654, %v1407_v26  ;;  %v1328_v19 = vmul.bf16 1069105081, %v6455_v25  ;;  %v369_v40 = vpop.f32.mrb[34].mxu0  ;;  %vm1228_vm14 = vcmp.gt.bf16.partialorder %v6350_v4, 0 }
 0x135   :  { %v5278_v55 = vpop.eup %5277  ;;  %v5109_v49 = vpop.f32.mrb[34].mxu1  ;;  %v1479_v38 = vmul.bf16 1071005654, %v1431_v21  ;;  %v1376_v47 = vmul.bf16 1069105081, %v6458_v58  ;;  %v629_v20 = vpack.c.bf16 %v369_v40, %v365_v6  ;;  %v1517_v15 = vsel %vm1229_vm12, %v6362_v48, %v1469_v7 }
 0x136   :  { %v5280_v33 = vpop.eup %5279  ;;  %v652_v30 = vpack.c.bf16 %v5109_v49, %v5108_v63  ;;  %v371_v23 = vpop.f32.mrb[35].mxu0  ;;  %v1325_v26 = vmul.bf16 1069105081, %v6463_v22  ;;  %1751 = vmatprep.subr.bf16.mxu1 %v1517_v15  ;;  %v1385_v53 = vmul.bf16 1069105081, %v6468_v42  ;;  %v1516_v48 = vsel %vm1228_vm14, %v6350_v4, %v1468_v9 }
 0x137   :  { %v593_v11 = vpop.f32.mrb[35].mxu1  ;;  %v6476_v12 = vpop.eup %5281  ;;  %v630_v56 = vpack.c.bf16 %v371_v23, %v367_v5  ;;  %v6482_v59 = vadd.bf16 %v6289_v16, %v629_v20  ;;  %v1527_v6 = vsel %vm1239_vm13, %v6365_v51, %v1479_v38  ;;  %5295 = vpow.bf16 %v1328_v19  ;;  %1752 = vmatpush1.bf16.msra.mxu1 %v1516_v48 }
 0x138   :  { %v649_v28 = vpack.c.bf16 %v593_v11, %v590_v43  ;;  %v5284_v63 = vpop.eup %5283  ;;  %v6489_v29 = vadd.bf16 %v6420_v45, %v652_v30  ;;  %4828 = vmatprep.subr.bf16.mxu0 %v1527_v6  ;;  %v1503_v5 = vsel %vm1215_vm10, %v6308_v2, %v1455_v60  ;;  %v1434_v43 = vsub.bf16 %v5280_v33, %v5586_v41 }
 0x139   :  { %5297 = vpow.bf16 %v1376_v47  ;;  %v6496_v21 = vadd.bf16 %v6289_v16, %v630_v56  ;;  %4829 = vmatpush3.bf16.msra.mxu0 %v1503_v5  ;;  %v1458_v4 = vmul.bf16 1071005654, %v1410_v34  ;;  %v6499_v7 = vpop.eup %5285  ;;  %v6505_v2 = vsub.bf16 %v5276_v57, %v5586_v41 }
 0x13a   :  { %v375_v51 = vpop.f32.mrb[36].mxu0  ;;  %5299 = vpow.bf16 %v1325_v26  ;;  %v6502_v9 = vadd.bf16 %v6418_v13, %v649_v28  ;;  %v1482_v19 = vmul.bf16 1071005654, %v1434_v43  ;;  %v1334_v16 = vmul.bf16 1069105081, %v6482_v59 }
 0x13b   :  { %v5288_v60 = vpop.eup %5287  ;;  %5301 = vpow.bf16 %v1322_v8  ;;  %vm1242_vm0 = vcmp.gt.bf16.partialorder %v6371_v14, 0  ;;  %v377_v40 = vpop.f32.mrb[37].mxu0  ;;  %v1424_v49 = vsub.bf16 %v5284_v63, %v5586_v41  ;;  %v1403_v34 = vmul.bf16 1069105081, %v6489_v29 }
 0x13c   :  { %v5290_v38 = vpop.eup %5289  ;;  %5303 = vpow.bf16 %v1385_v53  ;;  %v1530_v33 = vsel %vm1242_vm0, %v6371_v14, %v1482_v19  ;;  %v379_v47 = vpop.f32.mrb[38].mxu0  ;;  %v1413_v57 = vsub.bf16 %v5278_v55, %v5586_v41  ;;  %v1337_v30 = vmul.bf16 1069105081, %v6496_v21 }
 0x13d   :  { %v5292_v20 = vpop.eup %5291  ;;  %4830 = vmatprep.subr.bf16.mxu0 %v1530_v33  ;;  %v1506_v8 = vsel %vm1218_vm15, %v6327_v52, %v1458_v4  ;;  %v632_v23 = vpack.c.bf16 %v379_v47, %v375_v51  ;;  %v381_v11 = vpop.f32.mrb[39].mxu0  ;;  %v1472_v15 = vmul.bf16 1071005654, %v1424_v49  ;;  %v1394_v26 = vmul.bf16 1069105081, %v6502_v9 }
 0x13e   :  { %4831 = vmatpush3.bf16.msra.mxu0 %v1506_v8  ;;  %v633_v56 = vpack.c.bf16 %v381_v11, %v377_v40  ;;  %vm1232_vm1 = vcmp.gt.bf16.partialorder %v6407_v62, 0  ;;  %v1437_v14 = vsub.bf16 %v5288_v60, %v5586_v41  ;;  %v6522_v55 = vpop.eup %5293  ;;  %5305 = vpow.bf16 %v1334_v16 }
 0x13f   :  { %v6525_v28 = vadd.bf16 %v6296_v44, %v632_v23  ;;  %v1520_v53 = vsel %vm1232_vm1, %v6407_v62, %v1472_v15  ;;  %v1423_v52 = vsub.bf16 %v5290_v38, %v5586_v41  ;;  %vm1221_vm2 = vcmp.gt.bf16.partialorder %v6359_v39, 0 }
 0x140   :  { %v6530_v6 = vadd.bf16 %v6296_v44, %v633_v56  ;;  %1753 = vmatprep.subr.bf16.mxu1 %v1520_v53  ;;  %v1485_v48 = vmul.bf16 1071005654, %v1437_v14  ;;  %v1461_v63 = vmul.bf16 1071005654, %v1413_v57  ;;  %5307 = vpow.bf16 %v1337_v30 }
 0x141   :  { %vm1245_vm3 = vcmp.gt.bf16.partialorder %v6410_v18, 0  ;;  %v1471_v5 = vmul.bf16 1071005654, %v1423_v52  ;;  %v1440_v43 = vsub.bf16 %v5292_v20, %v5586_v41  ;;  %5309 = vpow.bf16 %v1394_v26 }
 0x142   :  { %v385_v51 = vpop.f32.mrb[40].mxu0  ;;  %v1343_v62 = vmul.bf16 1069105081, %v6525_v28  ;;  %v1533_v4 = vsel %vm1245_vm3, %v6410_v18, %v1485_v48  ;;  %vm1231_vm4 = vcmp.gt.bf16.partialorder %v6404_v32, 0  ;;  %v5296_v19 = vpop.eup %5295  ;;  %v1346_v60 = vmul.bf16 1069105081, %v6530_v6 }
 0x143   :  { %v387_v44 = vpop.f32.mrb[41].mxu0  ;;  %4832 = vmatprep.subr.bf16.mxu0 %v1533_v4  ;;  %v1519_v16 = vsel %vm1231_vm4, %v6404_v32, %v1471_v5  ;;  %v1509_v40 = vsel %vm1221_vm2, %v6359_v39, %v1461_v63  ;;  %v1488_v49 = vmul.bf16 1071005654, %v1440_v43  ;;  %vm1248_vm5 = vcmp.gt.bf16.partialorder %v6425_v10, 0 }
 0x144   :  { %v389_v38 = vpop.f32.mrb[42].mxu0  ;;  %v5298_v33 = vpop.eup %5297  ;;  %1754 = vmatpush1.bf16.msra.mxu1 %v1519_v16  ;;  %4833 = vmatpush3.bf16.msra.mxu0 %v1509_v40  ;;  %vm1224_vm6 = vcmp.gt.bf16.partialorder %v6339_v46, 0  ;;  %v1464_v18 = vmul.bf16 1071005654, %v6505_v2  ;;  %5311 = vpow.bf16 %v1403_v34  ;;  %v1422_v39 = vsub.bf16 %v6476_v12, %v5586_v41 }
 0x145   :  { %v391_v47 = vpop.f32.mrb[43].mxu0  ;;  %v5300_v57 = vpop.eup %5299  ;;  %v1536_v32 = vsel %vm1248_vm5, %v6425_v10, %v1488_v49  ;;  %v635_v20 = vpack.c.bf16 %v389_v38, %v385_v51  ;;  %5313 = vpow.bf16 %v1343_v62  ;;  %v1427_v23 = vsub.bf16 %v5296_v19, %v5586_v41 }
 0x146   :  { %v5302_v30 = vpop.eup %5301  ;;  %4834 = vmatprep.subr.bf16.mxu0 %v1536_v32  ;;  %v636_v8 = vpack.c.bf16 %v391_v47, %v387_v44  ;;  %v1419_v11 = vsub.bf16 %v6499_v7, %v5586_v41  ;;  %5315 = vpow.bf16 %v1346_v60  ;;  %v1512_v2 = vsel %vm1224_vm6, %v6339_v46, %v1464_v18 }
 0x147   :  { %v5304_v15 = vpop.eup %5303  ;;  %v6556_v10 = vadd.bf16 %v6298_v1, %v635_v20  ;;  %v1443_v12 = vsub.bf16 %v5298_v33, %v5586_v41  ;;  %vm1235_vm7 = vcmp.gt.bf16.partialorder %v6455_v25, 0  ;;  %v1475_v26 = vmul.bf16 1071005654, %v1427_v23 }
 0x148   :  { %4835 = vmatpush3.bf16.msra.mxu0 %v1512_v2  ;;  %v6560_v34 = vadd.bf16 %v6298_v1, %v636_v8  ;;  %v1426_v7 = vsub.bf16 %v5300_v57, %v5586_v41  ;;  %vm1251_vm8 = vcmp.gt.bf16.partialorder %v6458_v58, 0  ;;  %vm1227_vm9 = vcmp.gt.bf16.partialorder %v6386_v54, 0 }
 0x149   :  { %v1352_v56 = vmul.bf16 1069105081, %v6556_v10  ;;  %v1491_v14 = vmul.bf16 1071005654, %v1443_v12  ;;  %v5306_v46 = vpop.eup %5305  ;;  %v1523_v52 = vsel %vm1235_vm7, %v6455_v25, %v1475_v26  ;;  %v1467_v1 = vmul.bf16 1071005654, %v1419_v11 }
 0x14a   :  { %v1355_v53 = vmul.bf16 1069105081, %v6560_v34  ;;  %v1474_v48 = vmul.bf16 1071005654, %v1426_v7  ;;  %1755 = vmatprep.subr.bf16.mxu1 %v1523_v52  ;;  %vm1234_vm10 = vcmp.gt.bf16.partialorder %v6463_v22, 0  ;;  %v1446_v5 = vsub.bf16 %v5304_v15, %v5586_v41  ;;  %v395_v43 = vpop.f32.mrb[44].mxu0 }
 0x14b   :  { %5317 = vpow.bf16 %v1352_v56  ;;  %v1539_v63 = vsel %vm1251_vm8, %v6458_v58, %v1491_v14  ;;  %v5308_v51 = vpop.eup %5307  ;;  %v1515_v25 = vsel %vm1227_vm9, %v6386_v54, %v1467_v1  ;;  %v397_v4 = vpop.f32.mrb[45].mxu0  ;;  %vm1230_vm11 = vcmp.gt.bf16.partialorder %v6379_v50, 0 }
 0x14c   :  { %5319 = vpow.bf16 %v1355_v53  ;;  %4836 = vmatprep.subr.bf16.mxu0 %v1539_v63  ;;  %v1522_v62 = vsel %vm1234_vm10, %v6463_v22, %v1474_v48  ;;  %v5310_v44 = vpop.eup %5309  ;;  %v1494_v19 = vmul.bf16 1071005654, %v1446_v5  ;;  %v1470_v58 = vmul.bf16 1071005654, %v1422_v39  ;;  %v399_v60 = vpop.f32.mrb[46].mxu0 }
 0x14d   :  { %1756 = vmatpush1.bf16.msra.mxu1 %v1522_v62  ;;  %4837 = vmatpush3.bf16.msra.mxu0 %v1515_v25  ;;  %vm1254_vm12 = vcmp.gt.bf16.partialorder %v6468_v42, 0  ;;  %v638_v16 = vpack.c.bf16 %v399_v60, %v395_v43  ;;  %v401_v40 = vpop.f32.mrb[47].mxu0  ;;  %v1430_v38 = vsub.bf16 %v5308_v51, %v5586_v41  ;;  %v1425_v54 = vsub.bf16 %v5302_v30, %v5586_v41  ;;  %v6614_v51 = vld [vmem:[%s7977_s3] ss:$8 sps:$4 sm:$0xff]  }
 0x14e   :  { %v1542_v49 = vsel %vm1254_vm12, %v6468_v42, %v1494_v19  ;;  %v639_v22 = vpack.c.bf16 %v401_v40, %v397_v4  ;;  %v1518_v18 = vsel %vm1230_vm11, %v6379_v50, %v1470_v58  ;;  %v1449_v57 = vsub.bf16 %v5310_v44, %v5586_v41 }
 0x14f   :  { %v5312_v33 = vpop.eup %5311  ;;  %4838 = vmatprep.subr.bf16.mxu0 %v1542_v49  ;;  %v6583_v47 = vadd.bf16 %v6313_v61, %v638_v16  ;;  %v1428_v32 = vsub.bf16 %v6522_v55, %v5586_v41  ;;  %vm1238_vm13 = vcmp.gt.bf16.partialorder %v6496_v21, 0  ;;  %v1478_v39 = vmul.bf16 1071005654, %v1430_v38 }
 0x150   :  { %v5314_v20 = vpop.eup %5313  ;;  %v6589_v42 = vadd.bf16 %v6313_v61, %v639_v22  ;;  %v1429_v30 = vsub.bf16 %v5306_v46, %v5586_v41  ;;  %vm1257_vm14 = vcmp.gt.bf16.partialorder %v6502_v9, 0  ;;  %v1497_v11 = vmul.bf16 1071005654, %v1449_v57 }
 0x151   :  { %4839 = vmatpush3.bf16.msra.mxu0 %v1518_v18  ;;  %v5316_v50 = vpop.eup %5315  ;;  %v1361_v23 = vmul.bf16 1069105081, %v6583_v47  ;;  %vm1233_vm15 = vcmp.gt.bf16.partialorder %v6439_v37, 0  ;;  %v1526_v15 = vsel %vm1238_vm13, %v6496_v21, %v1478_v39  ;;  %v1473_v2 = vmul.bf16 1071005654, %v1425_v54 }
 0x152   :  { %v405_v8 = vpop.f32.mrb[48].mxu0  ;;  %v1364_v55 = vmul.bf16 1069105081, %v6589_v42  ;;  %v1477_v61 = vmul.bf16 1071005654, %v1429_v30  ;;  %1757 = vmatprep.subr.bf16.mxu1 %v1526_v15  ;;  %v1545_v12 = vsel %vm1257_vm14, %v6502_v9, %v1497_v11  ;;  %vm1237_vm0 = vcmp.gt.bf16.partialorder %v6482_v59, 0 }
 0x153   :  { %5321 = vpow.bf16 %v1361_v23  ;;  %v1452_v26 = vsub.bf16 %v5312_v33, %v5586_v41  ;;  %v407_v7 = vpop.f32.mrb[49].mxu0  ;;  %4840 = vmatprep.subr.bf16.mxu0 %v1545_v12  ;;  %v1521_v14 = vsel %vm1233_vm15, %v6439_v37, %v1473_v2  ;;  %vm1236_vm1 = vcmp.gt.bf16.partialorder %v6433_v3, 0 }
 0x154   :  { %5323 = vpow.bf16 %v1364_v55  ;;  %v1525_v56 = vsel %vm1237_vm0, %v6482_v59, %v1477_v61  ;;  %v409_v46 = vpop.f32.mrb[50].mxu0  ;;  %v1476_v52 = vmul.bf16 1071005654, %v1428_v32  ;;  %vm1260_vm2 = vcmp.gt.bf16.partialorder %v6489_v29, 0 }
 0x155   :  { %1758 = vmatpush1.bf16.msra.mxu1 %v1525_v56  ;;  %4841 = vmatpush3.bf16.msra.mxu0 %v1521_v14  ;;  %v1500_v21 = vmul.bf16 1071005654, %v1452_v26  ;;  %v641_v9 = vpack.c.bf16 %v409_v46, %v405_v8  ;;  %v411_v48 = vpop.f32.mrb[51].mxu0  ;;  %v1433_v5 = vsub.bf16 %v5316_v50, %v5586_v41  ;;  %v1432_v4 = vsub.bf16 %v5314_v20, %v5586_v41 }
 0x156   :  { %v5318_v53 = vpop.eup %5317  ;;  %v642_v63 = vpack.c.bf16 %v411_v48, %v407_v7  ;;  %v1524_v43 = vsel %vm1236_vm1, %v6433_v3, %v1476_v52  ;;  %vm1241_vm3 = vcmp.gt.bf16.partialorder %v6530_v6, 0  ;;  %v6625_v3 = vld [vmem:[%s7977_s3 + $0x14] ss:$8 sps:$4 sm:$0xff]   ;;  %vm1240_vm4 = vcmp.gt.bf16.partialorder %v6525_v28, 0 }
 0x157   :  { %v5320_v1 = vpop.eup %5319  ;;  %v1548_v59 = vsel %vm1260_vm2, %v6489_v29, %v1500_v21  ;;  %v6608_v37 = vadd.bf16 %v6315_v36, %v641_v9  ;;  %v1481_v25 = vmul.bf16 1071005654, %v1433_v5  ;;  %v1480_v40 = vmul.bf16 1071005654, %v1432_v4 }
 0x158   :  { %4842 = vmatprep.subr.bf16.mxu0 %v1548_v59  ;;  %v6617_v62 = vadd.bf16 %v6315_v36, %v642_v63  ;;  %v1436_v58 = vsub.bf16 %v5320_v1, %v5586_v41  ;;  %v1435_v36 = vsub.bf16 %v5318_v53, %v5586_v41  ;;  %vm1244_vm5 = vcmp.gt.bf16.partialorder %v6560_v34, 0  ;;  %v6688_v63 = vld [vmem:[%s7977_s3 + $0x20] ss:$8 sps:$4 sm:$0xff]  }
 0x159   :  { %4843 = vmatpush3.bf16.msra.mxu0 %v1524_v43  ;;  %v1370_v29 = vmul.bf16 1069105081, %v6608_v37  ;;  %v1529_v16 = vsel %vm1241_vm3, %v6530_v6, %v1481_v25  ;;  %v1528_v33 = vsel %vm1240_vm4, %v6525_v28, %v1480_v40  ;;  %v7992_v39 = vpack.c.bf16 %v6116_v31, %v6108_v24  ;;  %v6662_v31 = vld [vmem:[%s7977_s3 + $0x10] ss:$8 sps:$4 sm:$0xff]  }
 0x15a   :  { %v415_v44 = vpop.f32.mrb[52].mxu0  ;;  %v1373_v60 = vmul.bf16 1069105081, %v6617_v62  ;;  %1759 = vmatprep.subr.bf16.mxu1 %v1529_v16  ;;  %v1484_v54 = vmul.bf16 1071005654, %v1436_v58  ;;  %vm1243_vm6 = vcmp.gt.bf16.partialorder %v6556_v10, 0 }
 0x15b   :  { %v417_v19 = vpop.f32.mrb[53].mxu0  ;;  %5325 = vpow.bf16 %v1370_v29  ;;  %v1483_v57 = vmul.bf16 1071005654, %v1435_v36  ;;  %1760 = vmatpush1.bf16.msra.mxu1 %v1528_v33  ;;  %v6644_v30 = vadd.bf16 %v6420_v45, %v7992_v39  ;;  %vm1247_vm7 = vcmp.gt.bf16.partialorder %v6589_v42, 0  ;;  %v5158_v36 = vld [vmem:[%s7977_s3 + $0x30] ss:$8 sps:$4 sm:$0xff]  }
 0x15c   :  { %v419_v49 = vpop.f32.mrb[54].mxu0  ;;  %5327 = vpow.bf16 %v1373_v60  ;;  %1967 = vmatmul.mubr.bf16.vlgmr.msra.gmra.mrb[60].mxu0 %v6614_v51  ;;  %v1532_v32 = vsel %vm1244_vm5, %v6560_v34, %v1484_v54  ;;  %v7993_v34 = vpack.c.bf16 %v6112_v27, %v6106_v0  ;;  %v6669_v0 = vld [vmem:[%s7977_s3 + $0x24] ss:$8 sps:$4 sm:$0xff]   ;;  %vm1246_vm8 = vcmp.gt.bf16.partialorder %v6583_v47, 0 }
 0x15d   :  { %v644_v22 = vpack.c.bf16 %v419_v49, %v415_v44  ;;  %v421_v38 = vpop.f32.mrb[55].mxu0  ;;  %1974 = vmatprep.mubr.bf16.mxu0 %v6625_v3  ;;  %1761 = vmatprep.subr.bf16.mxu1 %v1532_v32  ;;  %vm1250_vm9 = vcmp.gt.bf16.partialorder %v6617_v62, 0  ;;  %vm1249_vm10 = vcmp.gt.bf16.partialorder %v6608_v37, 0  ;;  %v5159_v16 = vld [vmem:[%s7977_s3 + $0x44] ss:$8 sps:$4 sm:$0xff]   ;;  %vm1259_vm14 = vcmp.gt.bf16.partialorder %v6644_v30, 0 }
 0x15e   :  { %v645_v18 = vpack.c.bf16 %v421_v38, %v417_v19  ;;  %v5322_v20 = vpop.eup %5321  ;;  %v6656_v11 = vadd.bf16 %v6420_v45, %v7993_v34  ;;  %v1400_v45 = vmul.bf16 1069105081, %v6644_v30 }
 0x15f   :  { %v6636_v6 = vadd.bf16 %v6398_v35, %v644_v22  ;;  %v5324_v28 = vpop.eup %5323  ;;  %v1438_v23 = vsub.bf16 %v5322_v20, %v5586_v41  ;;  %v5161_v20 = vld [vmem:[%s7977_s3 + $0x40] ss:$8 sps:$4 sm:$0xff]  }
 0x160   :  { %v6647_v8 = vadd.bf16 %v6398_v35, %v645_v18  ;;  %v1531_v35 = vsel %vm1243_vm6, %v6556_v10, %v1483_v57  ;;  %v1439_v15 = vsub.bf16 %v5324_v28, %v5586_v41  ;;  %v1397_v10 = vmul.bf16 1069105081, %v6656_v11 }
 0x161   :  { %v1379_v50 = vmul.bf16 1069105081, %v6636_v6  ;;  %1762 = vmatpush1.bf16.msra.mxu1 %v1531_v35  ;;  %v1486_v27 = vmul.bf16 1071005654, %v1438_v23  ;;  %vm1252_vm12 = vcmp.gt.bf16.partialorder %v6636_v6, 0  ;;  %vm1258_vm0 = vcmp.gt.bf16.partialorder %v6656_v11, 0 }
 0x162   :  { %v1382_v24 = vmul.bf16 1069105081, %v6647_v8  ;;  %v425_v55 = vpop.f32.mrb[56].mxu0  ;;  %v1487_v12 = vmul.bf16 1071005654, %v1439_v15  ;;  %vm1253_vm11 = vcmp.gt.bf16.partialorder %v6647_v8, 0 }
 0x163   :  { %5329 = vpow.bf16 %v1379_v50  ;;  %v427_v61 = vpop.f32.mrb[57].mxu0  ;;  %v1534_v53 = vsel %vm1246_vm8, %v6583_v47, %v1486_v27  ;;  %v5164_v35 = vld [vmem:[%s7977_s3 + $0x50] ss:$8 sps:$4 sm:$0xff]   ;;  %v5174_v15 = vld [vmem:[%s7977_s3 + $0x94] ss:$8 sps:$4 sm:$0xff]  }
 0x164   :  { %5331 = vpow.bf16 %v1382_v24  ;;  %v429_v2 = vpop.f32.mrb[58].mxu0  ;;  %1975 = vmatmul.mubr.bf16.gmra.mrb[64].mxu0 %v6662_v31  ;;  %v1535_v14 = vsel %vm1247_vm7, %v6589_v42, %v1487_v12  ;;  %v5179_v27 = vld [vmem:[%s7977_s3 + $0xa0] ss:$8 sps:$4 sm:$0xff]   ;;  %v5183_v12 = vld [vmem:[%s7977_s3 + $0xc4] ss:$8 sps:$4 sm:$0xff]  }
 0x165   :  { %v647_v26 = vpack.c.bf16 %v429_v2, %v425_v55  ;;  %v431_v7 = vpop.f32.mrb[59].mxu0  ;;  %1982 = vmatprep.mubr.bf16.mxu0 %v6669_v0  ;;  %1763 = vmatprep.subr.bf16.mxu1 %v1535_v14  ;;  %5333 = vpow.bf16 %v1400_v45  ;;  %v5165_v55 = vld [vmem:[%s7977_s3 + $0x64] ss:$8 sps:$4 sm:$0xff]   ;;  %v5180_v45 = vld [vmem:[%s7977_s3 + $0xb4] ss:$8 sps:$4 sm:$0xff]  }
 0x166   :  { %v648_v56 = vpack.c.bf16 %v431_v7, %v427_v61  ;;  %v5326_v21 = vpop.eup %5325  ;;  %1764 = vmatpush1.bf16.msra.mxu1 %v1534_v53  ;;  %5335 = vpow.bf16 %v1397_v10  ;;  %v5176_v61 = vld [vmem:[%s7977_s3 + $0x90] ss:$8 sps:$4 sm:$0xff]   ;;  %v5186_v7 = vld [vmem:[%s7977_s3 + $0xd4] ss:$8 sps:$4 sm:$0xff]   ;;  %v5191_v14 = vld [vmem:[%s7977_s3 + $0xe0] ss:$8 sps:$4 sm:$0xff]  }
 0x167   :  { %v6678_v46 = vadd.bf16 %v6418_v13, %v647_v26  ;;  %v5328_v9 = vpop.eup %5327  ;;  %v1441_v42 = vsub.bf16 %v5326_v21, %v5586_v41  ;;  %v5182_v2 = vld [vmem:[%s7977_s3 + $0xb0] ss:$8 sps:$4 sm:$0xff]   ;;  %v5185_v26 = vld [vmem:[%s7977_s3 + $0xc0] ss:$8 sps:$4 sm:$0xff]   ;;  %v6799_v21 = vpop.permute.xlu1 %2189 }
 0x168   :  { %v1208_v52 = vadd.bf16 %v6418_v13, %v648_v56  ;;  %v1442_v5 = vsub.bf16 %v5328_v9, %v5586_v41  ;;  %v6694_v13 = vld [vmem:[%s7977_s3 + $0x34] ss:$8 sps:$4 sm:$0xff]   ;;  %v5188_v10 = vld [vmem:[%s7977_s3 + $0xd0] ss:$8 sps:$4 sm:$0xff]   ;;  %v5189_v56 = vld [vmem:[%s7977_s3 + $0xe4] ss:$8 sps:$4 sm:$0xff]  }
 0x169   :  { %v1388_v48 = vmul.bf16 1069105081, %v6678_v46  ;;  %v1489_v47 = vmul.bf16 1071005654, %v1441_v42  ;;  %vm1255_vm15 = vcmp.gt.bf16.partialorder %v6678_v46, 0 }
 0x16a   :  { %v1391_v1 = vmul.bf16 1069105081, %v1208_v52  ;;  %v1490_v59 = vmul.bf16 1071005654, %v1442_v5  ;;  %vm1256_vm13 = vcmp.gt.bf16.partialorder %v1208_v52, 0 }
 0x16b   :  { %5337 = vpow.bf16 %v1388_v48  ;;  %v1537_v44 = vsel %vm1249_vm10, %v6608_v37, %v1489_v47  ;;  %v5194_v53 = vld [vmem:[%s7977_s3 + $0xf0] ss:$8 sps:$4 sm:$0xff]   ;;  %v6803_v9 = vpop.permute.xlu1 %2213 }
 0x16c   :  { %5339 = vpow.bf16 %v1391_v1  ;;  %1983 = vmatmul.mubr.bf16.gmra.mrb[68].mxu0 %v6688_v63  ;;  %v1538_v25 = vsel %vm1250_vm9, %v6617_v62, %v1490_v59 }
 0x16d   :  { %1990 = vmatprep.mubr.bf16.mxu0 %v6694_v13  ;;  %1765 = vmatprep.subr.bf16.mxu1 %v1538_v25 }
 0x16e   :  { %v5330_v43 = vpop.eup %5329  ;;  %1766 = vmatpush1.bf16.msra.mxu1 %v1537_v44 }
 0x16f   :  { %v5332_v4 = vpop.eup %5331  ;;  %v1444_v29 = vsub.bf16 %v5330_v43, %v5586_v41  ;;  %v6807_v42 = vpop.permute.xlu1 %2237 }
 0x170   :  { %v1445_v19 = vsub.bf16 %v5332_v4, %v5586_v41  ;;  %v5334_v62 = vpop.eup %5333 }
 0x171   :  { %v1492_v58 = vmul.bf16 1071005654, %v1444_v29  ;;  %v5336_v40 = vpop.eup %5335  ;;  %v1451_v38 = vsub.bf16 %v5334_v62, %v5586_v41 }
 0x172   :  { %v1493_v60 = vmul.bf16 1071005654, %v1445_v19  ;;  %v1450_v32 = vsub.bf16 %v5336_v40, %v5586_v41 }
 0x173   :  { %v1540_v49 = vsel %vm1252_vm12, %v6636_v6, %v1492_v58  ;;  %v1499_v6 = vmul.bf16 1071005654, %v1451_v38 }
 0x174   :  { %v1541_v37 = vsel %vm1253_vm11, %v6647_v8, %v1493_v60  ;;  %1991 = vmatmul.mubr.bf16.gmra.mrb[72].mxu0 %v5158_v36  ;;  %v5162_v8 = vld [vmem:[%s7977_s3 + $0x54] ss:$8 sps:$4 sm:$0xff]   ;;  %v1498_v23 = vmul.bf16 1071005654, %v1450_v32 }
 0x175   :  { %1767 = vmatprep.subr.bf16.mxu1 %v1541_v37  ;;  %1998 = vmatprep.mubr.bf16.mxu0 %v5159_v16  ;;  %v1547_v34 = vsel %vm1259_vm14, %v6644_v30, %v1499_v6  ;;  %v5167_v30 = vld [vmem:[%s7977_s3 + $0x60] ss:$8 sps:$4 sm:$0xff]  }
 0x176   :  { %v5338_v22 = vpop.eup %5337  ;;  %1768 = vmatpush1.bf16.msra.mxu1 %v1540_v49  ;;  %v1546_v24 = vsel %vm1258_vm0, %v6656_v11, %v1498_v23  ;;  %v5168_v11 = vld [vmem:[%s7977_s3 + $0x74] ss:$8 sps:$4 sm:$0xff]  }
 0x177   :  { %v5340_v54 = vpop.eup %5339  ;;  %v1447_v33 = vsub.bf16 %v5338_v22, %v5586_v41 }
 0x178   :  { %v1448_v18 = vsub.bf16 %v5340_v54, %v5586_v41 }
 0x179   :  { %v1495_v57 = vmul.bf16 1071005654, %v1447_v33 }
 0x17a   :  { %v1496_v39 = vmul.bf16 1071005654, %v1448_v18 }
 0x17b   :  { %v1543_v50 = vsel %vm1255_vm15, %v6678_v46, %v1495_v57  ;;  %v5192_v46 = vld [vmem:[%s7977_s3 + $0xf4] ss:$8 sps:$4 sm:$0xff]  }
 0x17c   :  { %v1544_v28 = vsel %vm1256_vm13, %v1208_v52, %v1496_v39  ;;  %1999 = vmatmul.mubr.bf16.gmra.mrb[76].mxu0 %v5161_v20  ;;  %v6801_v52 = vpop.permute.xlu0 %2177 }
 0x17d   :  { %1769 = vmatprep.subr.bf16.mxu1 %v1544_v28  ;;  %2006 = vmatprep.mubr.bf16.mxu0 %v5162_v8  ;;  %v5197_v28 = vld [vmem:[%s7979_s5 + $0x4] ss:$8 sps:$4 sm:$0xff]  }
 0x17e   :  { %1770 = vmatpush1.bf16.msra.mxu1 %v1543_v50 }
 0x17f   :  { %1771 = vmatprep.subr.bf16.mxu1 %v1547_v34 }
 0x180   :  { %v6805_v48 = vpop.permute.xlu0 %2201 }
 0x182   :  { %1772 = vmatpush1.bf16.msra.mxu1 %v1546_v24 }
 0x184   :  { %2007 = vmatmul.mubr.bf16.gmra.mrb[80].mxu0 %v5164_v35  ;;  %v6809_v1 = vpop.permute.xlu0 %2225 }
 0x185   :  { %1774 = vmatmul.mubr.bf16.vlgmr.msra.gmra.mrb[36].mxu1 %v6614_v51  ;;  %2014 = vmatprep.mubr.bf16.mxu0 %v5165_v55  ;;  %v5170_v51 = vld [vmem:[%s7977_s3 + $0x70] ss:$8 sps:$4 sm:$0xff]  }
 0x186   :  { %1783 = vmatprep.mubr.bf16.mxu1 %v6625_v3  ;;  %v5171_v3 = vld [vmem:[%s7977_s3 + $0x84] ss:$8 sps:$4 sm:$0xff]  }
 0x188   :  { %v6813_v47 = vpop.permute.xlu0 %2249 }
 0x18c   :  { %2015 = vmatmul.mubr.bf16.gmra.mrb[84].mxu0 %v5167_v30  ;;  %v6823_v19 = vpop.permute.xlu0 %2273 }
 0x18d   :  { %1784 = vmatmul.mubr.bf16.gmra.mrb[40].mxu1 %v6662_v31  ;;  %2022 = vmatprep.mubr.bf16.mxu0 %v5168_v11  ;;  %v5173_v31 = vld [vmem:[%s7977_s3 + $0x80] ss:$8 sps:$4 sm:$0xff]  }
 0x18e   :  { %1793 = vmatprep.mubr.bf16.mxu1 %v6669_v0  ;;  %v5177_v0 = vld [vmem:[%s7977_s3 + $0xa4] ss:$8 sps:$4 sm:$0xff]  }
 0x190   :  { %v6831_v49 = vpop.permute.xlu0 %2297 }
 0x194   :  { %2023 = vmatmul.mubr.bf16.gmra.mrb[88].mxu0 %v5170_v51 }
 0x195   :  { %1794 = vmatmul.mubr.bf16.gmra.mrb[44].mxu1 %v6688_v63  ;;  %2030 = vmatprep.mubr.bf16.mxu0 %v5171_v3  ;;  %v6811_v63 = vpop.permute.xlu1 %2261 }
 0x196   :  { %1803 = vmatprep.mubr.bf16.mxu1 %v6694_v13 }
 0x199   :  { %v6817_v25 = vpop.permute.xlu1 %2285 }
 0x19c   :  { %2031 = vmatmul.mubr.bf16.gmra.mrb[92].mxu0 %v5173_v31 }
 0x19d   :  { %1804 = vmatmul.mubr.bf16.gmra.mrb[48].mxu1 %v5158_v36  ;;  %2038 = vmatprep.mubr.bf16.mxu0 %v5174_v15  ;;  %v6825_v36 = vpop.permute.xlu1 %2309 }
 0x19e   :  { %1813 = vmatprep.mubr.bf16.mxu1 %v5159_v16 }
 0x1a1   :  { %v6835_v38 = vpop.permute.xlu1 %2333 }
 0x1a4   :  { %2039 = vmatmul.mubr.bf16.gmra.mrb[96].mxu0 %v5176_v61 }
 0x1a5   :  { %1814 = vmatmul.mubr.bf16.gmra.mrb[52].mxu1 %v5161_v20  ;;  %2046 = vmatprep.mubr.bf16.mxu0 %v5177_v0  ;;  %v6839_v20 = vpop.permute.xlu0 %2321  ;;  %v6843_v6 = vpop.permute.xlu1 %2357 }
 0x1a6   :  { %1823 = vmatprep.mubr.bf16.mxu1 %v5162_v8 }
 0x1a9   :  { %v6850_v34 = vpop.permute.xlu0 %2345 }
 0x1ac   :  { %2047 = vmatmul.mubr.bf16.gmra.mrb[100].mxu0 %v5179_v27 }
 0x1ad   :  { %1824 = vmatmul.mubr.bf16.gmra.mrb[56].mxu1 %v5164_v35  ;;  %2054 = vmatprep.mubr.bf16.mxu0 %v5180_v45 }
 0x1ae   :  { %1833 = vmatprep.mubr.bf16.mxu1 %v5165_v55  ;;  %v6854_v55 = vpop.permute.xlu1 %2381 }
 0x1b4   :  { %2055 = vmatmul.mubr.bf16.gmra.mrb[104].mxu0 %v5182_v2 }
 0x1b5   :  { %1834 = vmatmul.mubr.bf16.gmra.mrb[60].mxu1 %v5167_v30  ;;  %2062 = vmatprep.mubr.bf16.mxu0 %v5183_v12 }
 0x1b6   :  { %1843 = vmatprep.mubr.bf16.mxu1 %v5168_v11 }
 0x1bc   :  { %2063 = vmatmul.mubr.bf16.gmra.mrb[108].mxu0 %v5185_v26 }
 0x1bd   :  { %1844 = vmatmul.mubr.bf16.gmra.mrb[64].mxu1 %v5170_v51  ;;  %2070 = vmatprep.mubr.bf16.mxu0 %v5186_v7 }
 0x1be   :  { %1853 = vmatprep.mubr.bf16.mxu1 %v5171_v3  ;;  %v6860_v3 = vpop.permute.xlu0 %2369 }
 0x1c4   :  { %2071 = vmatmul.mubr.bf16.gmra.mrb[112].mxu0 %v5188_v10 }
 0x1c5   :  { %1854 = vmatmul.mubr.bf16.gmra.mrb[68].mxu1 %v5173_v31  ;;  %2078 = vmatprep.mubr.bf16.mxu0 %v5189_v56 }
 0x1c6   :  { %1863 = vmatprep.mubr.bf16.mxu1 %v5174_v15  ;;  %v6862_v15 = vpop.permute.xlu1 %2405 }
 0x1cc   :  { %2079 = vmatmul.mubr.bf16.gmra.mrb[116].mxu0 %v5191_v14 }
 0x1cd   :  { %1864 = vmatmul.mubr.bf16.gmra.mrb[72].mxu1 %v5176_v61  ;;  %2086 = vmatprep.mubr.bf16.mxu0 %v5192_v46 }
 0x1ce   :  { %1873 = vmatprep.mubr.bf16.mxu1 %v5177_v0 }
 0x1d4   :  { %2087 = vmatmul.mubr.bf16.gmra.mrb[120].mxu0 %v5194_v53 }
 0x1d5   :  { %1874 = vmatmul.mubr.bf16.gmra.mrb[76].mxu1 %v5179_v27  ;;  %3456 = vmatprep.mubr.bf16.mxu0 %v5197_v28 }
 0x1d6   :  { %1883 = vmatprep.mubr.bf16.mxu1 %v5180_v45 }
 0x1dd   :  { %1884 = vmatmul.mubr.bf16.gmra.mrb[80].mxu1 %v5182_v2 }
 0x1de   :  { %1893 = vmatprep.mubr.bf16.mxu1 %v5183_v12  ;;  %v2198_v12 = vrot.slane %v6799_v21, %v6098_v17 }
 0x1e5   :  { %1894 = vmatmul.mubr.bf16.gmra.mrb[84].mxu1 %v5185_v26  ;;  %v2186_v26 = vrot.slane %v6801_v52, %v6098_v17 }
 0x1e6   :  { %1903 = vmatprep.mubr.bf16.mxu1 %v5186_v7  ;;  %v6872_v7 = vpop.permute.xlu0 %2393 }
 0x1ed   :  { %1904 = vmatmul.mubr.bf16.gmra.mrb[88].mxu1 %v5188_v10 }
 0x1ee   :  { %1913 = vmatprep.mubr.bf16.mxu1 %v5189_v56  ;;  %v6876_v56 = vpop.permute.xlu1 %2429 }
 0x1f5   :  { %1914 = vmatmul.mubr.bf16.gmra.mrb[92].mxu1 %v5191_v14 }
 0x1f6   :  { %1923 = vmatprep.mubr.bf16.mxu1 %v5192_v46 }
 0x1fd   :  { %1924 = vmatmul.mubr.bf16.gmra.mrb[96].mxu1 %v5194_v53 }
 0x1fe   :  { %3263 = vmatprep.mubr.bf16.mxu1 %v5197_v28  ;;  %v6890_v28 = vpop.permute.xlu0 %2417 }
 0x22f   :  { %v4844_v5 = vpop.f32.mrb[60].mxu0 }
 0x230   :  { %v4845_v13 = vpop.f32.mrb[61].mxu0 }
 0x231   :  { %v6815_v59 = vadd.f32 %v4845_v13, %v4844_v5  ;;  %v4847_v43 = vpop.f32.mrb[62].mxu0 }
 0x232   :  { %v4848_v4 = vpop.f32.mrb[63].mxu0 }
 0x233   :  { %v6819_v44 = vadd.f32 %v4848_v4, %v4847_v43  ;;  %v4744_v43 = vcombine.low %v2186_v26, %v2198_v12 }
 0x235   :  { %v2097_v29 = vpack.c.bf16 %v6819_v44, %v6815_v59  ;;  %v2306_v59 = vrot.slane %v6831_v49, %v6098_v17  ;;  %v2342_v44 = vrot.slane %v6835_v38, %v6098_v17  ;;  %v2354_v49 = vrot.slane %v6850_v34, %v6098_v17 }
 0x236   :  { %v2390_v38 = vrot.slane %v6854_v55, %v6098_v17  ;;  %v2414_v34 = vrot.slane %v6862_v15, %v6098_v17  ;;  %v2402_v55 = vrot.slane %v6872_v7, %v6098_v17  ;;  %v2426_v15 = vrot.slane %v6890_v28, %v6098_v17 }
 0x237   :  { %v4850_v58 = vpop.f32.mrb[64].mxu0 }
 0x238   :  { %v4851_v60 = vpop.f32.mrb[65].mxu0 }
 0x239   :  { %v6827_v62 = vadd.f32 %v4851_v60, %v4850_v58  ;;  %v4853_v16 = vpop.f32.mrb[66].mxu0 }
 0x23a   :  { %v4854_v37 = vpop.f32.mrb[67].mxu0 }
 0x23b   :  { %v6829_v40 = vadd.f32 %v4854_v37, %v4853_v16 }
 0x23d   :  { %v2100_v22 = vpack.c.bf16 %v6829_v40, %v6827_v62 }
 0x23f   :  { %v4856_v54 = vpop.f32.mrb[68].mxu0 }
 0x240   :  { %v4857_v33 = vpop.f32.mrb[69].mxu0 }
 0x241   :  { %v6837_v18 = vadd.f32 %v4857_v33, %v4856_v54  ;;  %v4859_v57 = vpop.f32.mrb[70].mxu0 }
 0x242   :  { %v4860_v32 = vpop.f32.mrb[71].mxu0 }
 0x243   :  { %v6841_v39 = vadd.f32 %v4860_v32, %v4859_v57  ;;  %v2222_v57 = vrot.slane %v6803_v9, %v6098_v17  ;;  %v2210_v32 = vrot.slane %v6805_v48, %v6098_v17  ;;  %v2246_v48 = vrot.slane %v6807_v42, %v6098_v17 }
 0x244   :  { %v2282_v42 = vrot.slane %v6823_v19, %v6098_v17 }
 0x245   :  { %v2103_v8 = vpack.c.bf16 %v6841_v39, %v6837_v18  ;;  %v6898_v12 = vcombine.low %v2210_v32, %v2222_v57 }
 0x247   :  { %v4862_v50 = vpop.f32.mrb[72].mxu0 }
 0x248   :  { %v4863_v23 = vpop.f32.mrb[73].mxu0 }
 0x249   :  { %v6852_v24 = vadd.f32 %v4863_v23, %v4862_v50  ;;  %v4865_v35 = vpop.f32.mrb[74].mxu0 }
 0x24a   :  { %v4866_v30 = vpop.f32.mrb[75].mxu0 }
 0x24b   :  { %v6856_v11 = vadd.f32 %v4866_v30, %v4865_v35  ;;  %v6895_v35 = vpop.permute.xlu1 %2453 }
 0x24c   :  { %v2462_v40 = vrot.slane %v6895_v35, %v6098_v17 }
 0x24d   :  { %v2106_v51 = vpack.c.bf16 %v6856_v11, %v6852_v24 }
 0x24f   :  { %v4868_v31 = vpop.f32.mrb[76].mxu0 }
 0x250   :  { %v4869_v61 = vpop.f32.mrb[77].mxu0 }
 0x251   :  { %v6864_v0 = vadd.f32 %v4869_v61, %v4868_v31  ;;  %v4871_v27 = vpop.f32.mrb[78].mxu0 }
 0x252   :  { %v4872_v45 = vpop.f32.mrb[79].mxu0 }
 0x253   :  { %v6866_v2 = vadd.f32 %v4872_v45, %v4871_v27 }
 0x255   :  { %v2109_v10 = vpack.c.bf16 %v6866_v2, %v6864_v0 }
 0x257   :  { %v4874_v46 = vpop.f32.mrb[80].mxu0 }
 0x258   :  { %v1775_v14 = vpop.f32.mrb[36].mxu1  ;;  %v4875_v5 = vpop.f32.mrb[81].mxu0 }
 0x259   :  { %v1777_v53 = vpop.f32.mrb[37].mxu1  ;;  %v6878_v4 = vadd.f32 %v4875_v5, %v4874_v46  ;;  %v4877_v58 = vpop.f32.mrb[82].mxu0  ;;  %v2234_v5 = vrot.slane %v6809_v1, %v6098_v17 }
 0x25a   :  { %v1779_v13 = vpop.f32.mrb[38].mxu1  ;;  %v4878_v16 = vpop.f32.mrb[83].mxu0 }
 0x25b   :  { %v2095_v21 = vpack.c.bf16 %v1779_v13, %v1775_v14  ;;  %v1781_v60 = vpop.f32.mrb[39].mxu1  ;;  %v6880_v37 = vadd.f32 %v4878_v16, %v4877_v58  ;;  %v2270_v13 = vrot.slane %v6811_v63, %v6098_v17  ;;  %v2258_v58 = vrot.slane %v6813_v47, %v6098_v17  ;;  %v6922_v63 = vpop.permute.xlu0 %2441 }
 0x25c   :  { %v2096_v52 = vpack.c.bf16 %v1781_v60, %v1777_v53  ;;  %v2294_v16 = vrot.slane %v6817_v25, %v6098_v17  ;;  %v6932_v25 = vadd.bf16 %v4744_v43, %v2097_v29 }
 0x25d   :  { %v6882_v54 = vadd.bf16 %v4744_v43, %v2095_v21  ;;  %v2112_v50 = vpack.c.bf16 %v6880_v37, %v6878_v4 }
 0x25e   :  { %v6884_v33 = vadd.bf16 %v4744_v43, %v2096_v52  ;;  %vm2705_vm10 = vcmp.gt.bf16.partialorder %v6932_v25, 0 }
 0x25f   :  { %v2752_v23 = vmul.bf16 1069105081, %v6882_v54  ;;  %v4880_v61 = vpop.f32.mrb[84].mxu0  ;;  %vm2703_vm2 = vcmp.gt.bf16.partialorder %v6882_v54, 0 }
 0x260   :  { %v2755_v30 = vmul.bf16 1069105081, %v6884_v33  ;;  %v1785_v31 = vpop.f32.mrb[40].mxu1  ;;  %v4881_v45 = vpop.f32.mrb[85].mxu0  ;;  %vm2704_vm1 = vcmp.gt.bf16.partialorder %v6884_v33, 0 }
 0x261   :  { %5341 = vpow.bf16 %v2752_v23  ;;  %v1787_v27 = vpop.f32.mrb[41].mxu1  ;;  %v6902_v26 = vadd.f32 %v4881_v45, %v4880_v61  ;;  %v4883_v14 = vpop.f32.mrb[86].mxu0  ;;  %v6937_v61 = vcombine.low %v2258_v58, %v2270_v13 }
 0x262   :  { %5343 = vpow.bf16 %v2755_v30  ;;  %v1789_v9 = vpop.f32.mrb[42].mxu1  ;;  %v4884_v21 = vpop.f32.mrb[87].mxu0 }
 0x263   :  { %v2098_v46 = vpack.c.bf16 %v1789_v9, %v1785_v31  ;;  %v1791_v53 = vpop.f32.mrb[43].mxu1  ;;  %v6914_v52 = vadd.f32 %v4884_v21, %v4883_v14  ;;  %v6927_v23 = vpop.permute.xlu1 %2477  ;;  %v6935_v31 = vcombine.low %v2234_v5, %v2246_v48  ;;  %v2318_v14 = vrot.slane %v6825_v36, %v6098_v17 }
 0x264   :  { %v2099_v60 = vpack.c.bf16 %v1791_v53, %v1787_v27  ;;  %v6939_v27 = vcombine.low %v2282_v42, %v2294_v16  ;;  %v2330_v48 = vrot.slane %v6839_v20, %v6098_v17  ;;  %v2758_v21 = vmul.bf16 1069105081, %v6932_v25 }
 0x265   :  { %v6917_v57 = vadd.bf16 %v6898_v12, %v2098_v46  ;;  %v2366_v46 = vrot.slane %v6843_v6, %v6098_v17  ;;  %v2378_v6 = vrot.slane %v6860_v3, %v6098_v17  ;;  %v2438_v3 = vrot.slane %v6876_v56, %v6098_v17 }
 0x266   :  { %v6920_v1 = vadd.bf16 %v6898_v12, %v2099_v60  ;;  %v6988_v56 = vcombine.low %v2330_v48, %v2342_v44 }
 0x267   :  { %v2761_v32 = vmul.bf16 1069105081, %v6917_v57  ;;  %v4886_v45 = vpop.f32.mrb[88].mxu0  ;;  %v6983_v7 = vpop.permute.xlu1 %2501  ;;  %vm2706_vm4 = vcmp.gt.bf16.partialorder %v6917_v57, 0 }
 0x268   :  { %v2764_v19 = vmul.bf16 1069105081, %v6920_v1  ;;  %v1795_v30 = vpop.f32.mrb[44].mxu1  ;;  %v4887_v29 = vpop.f32.mrb[89].mxu0  ;;  %vm2707_vm3 = vcmp.gt.bf16.partialorder %v6920_v1, 0 }
 0x269   :  { %5345 = vpow.bf16 %v2761_v32  ;;  %v1797_v9 = vpop.f32.mrb[45].mxu1  ;;  %v6951_v53 = vadd.f32 %v4887_v29, %v4886_v45  ;;  %v4889_v5 = vpop.f32.mrb[90].mxu0 }
 0x26a   :  { %5347 = vpow.bf16 %v2764_v19  ;;  %v1799_v43 = vpop.f32.mrb[46].mxu1  ;;  %v4890_v60 = vpop.f32.mrb[91].mxu0 }
 0x26b   :  { %v2101_v13 = vpack.c.bf16 %v1799_v43, %v1795_v30  ;;  %v1801_v36 = vpop.f32.mrb[47].mxu1  ;;  %v6960_v42 = vadd.f32 %v4890_v60, %v4889_v5  ;;  %5349 = vpow.bf16 %v2758_v21  ;;  %v6986_v60 = vcombine.low %v2306_v59, %v2318_v14 }
 0x26c   :  { %v5342_v58 = vpop.eup %5341  ;;  %v2102_v16 = vpack.c.bf16 %v1801_v36, %v1797_v9  ;;  %v6976_v9 = vpop.permute.xlu0 %2465  ;;  %v6999_v14 = vadd.bf16 %v6898_v12, %v2100_v22 }
 0x26d   :  { %v5344_v20 = vpop.eup %5343  ;;  %v6963_v32 = vadd.bf16 %v6935_v31, %v2101_v13  ;;  %v2895_v19 = vsub.bf16 %v5342_v58, %v5586_v41 }
 0x26e   :  { %v6971_v30 = vadd.bf16 %v6935_v31, %v2102_v16  ;;  %v2896_v45 = vsub.bf16 %v5344_v20, %v5586_v41  ;;  %v2767_v35 = vmul.bf16 1069105081, %v6999_v14  ;;  %vm2708_vm11 = vcmp.gt.bf16.partialorder %v6999_v14, 0 }
 0x26f   :  { %v2770_v43 = vmul.bf16 1069105081, %v6963_v32  ;;  %v2943_v5 = vmul.bf16 1071005654, %v2895_v19  ;;  %v4892_v16 = vpop.f32.mrb[92].mxu0  ;;  %v6991_v19 = vcombine.low %v2354_v49, %v2366_v46  ;;  %vm2709_vm6 = vcmp.gt.bf16.partialorder %v6963_v32, 0 }
 0x270   :  { %v2773_v13 = vmul.bf16 1069105081, %v6971_v30  ;;  %v1805_v36 = vpop.f32.mrb[48].mxu1  ;;  %v2944_v58 = vmul.bf16 1071005654, %v2896_v45  ;;  %v4893_v29 = vpop.f32.mrb[93].mxu0 }
 0x271   :  { %5351 = vpow.bf16 %v2770_v43  ;;  %v1807_v20 = vpop.f32.mrb[49].mxu1  ;;  %v4894_v59 = vadd.f32 %v4893_v29, %v4892_v16  ;;  %v4895_v44 = vpop.f32.mrb[94].mxu0  ;;  %v2991_v46 = vsel %vm2703_vm2, %v6882_v54, %v2943_v5  ;;  %v7002_v43 = vcombine.low %v2378_v6, %v2390_v38 }
 0x272   :  { %5353 = vpow.bf16 %v2773_v13  ;;  %v1809_v28 = vpop.f32.mrb[50].mxu1  ;;  %v2992_v21 = vsel %vm2704_vm1, %v6884_v33, %v2944_v58  ;;  %v7004_v13 = vcombine.low %v2402_v55, %v2414_v34  ;;  %v7006_v33 = vcombine.low %v2426_v15, %v2438_v3  ;;  %v4896_v58 = vpop.f32.mrb[95].mxu0 }
 0x273   :  { %v2104_v48 = vpack.c.bf16 %v1809_v28, %v1805_v36  ;;  %v1811_v45 = vpop.f32.mrb[51].mxu1  ;;  %3231 = vmatprep.subr.bf16.mxu1 %v2992_v21  ;;  %v4897_v22 = vadd.f32 %v4896_v58, %v4895_v44  ;;  %v2450_v38 = vrot.slane %v6922_v63, %v6098_v17  ;;  %v2486_v6 = vrot.slane %v6927_v23, %v6098_v17  ;;  %v2490_v3 = vpop.permute.xlu0 %2489 }
 0x274   :  { %v5346_v49 = vpop.eup %5345  ;;  %v2105_v47 = vpack.c.bf16 %v1811_v45, %v1807_v20  ;;  %3232 = vmatpush1.bf16.msra.mxu1 %v2991_v46  ;;  %v2474_v36 = vrot.slane %v6976_v9, %v6098_v17  ;;  %v2510_v63 = vrot.slane %v6983_v7, %v6098_v17  ;;  %v7028_v16 = vpop.permute.xlu1 %2525  ;;  %v2498_v28 = vrot.slane %v2490_v3, %v6098_v17 }
 0x275   :  { %v5348_v62 = vpop.eup %5347  ;;  %v7011_v12 = vadd.bf16 %v6937_v61, %v2104_v48  ;;  %v2898_v54 = vsub.bf16 %v5346_v49, %v5586_v41  ;;  %v2121_v29 = vpack.c.bf16 %v4897_v22, %v4894_v59  ;;  %v7040_v9 = vadd.bf16 %v6935_v31, %v2103_v8 }
 0x276   :  { %v7019_v34 = vadd.bf16 %v6937_v61, %v2105_v47  ;;  %v2899_v55 = vsub.bf16 %v5348_v62, %v5586_v41  ;;  %v5350_v46 = vpop.eup %5349  ;;  %v7046_v8 = vcombine.low %v2450_v38, %v2462_v40  ;;  %v7048_v31 = vcombine.low %v2474_v36, %v2486_v6 }
 0x277   :  { %v2779_v5 = vmul.bf16 1069105081, %v7011_v12  ;;  %v2946_v15 = vmul.bf16 1071005654, %v2898_v54  ;;  %v7033_v21 = vadd.bf16 %v7002_v43, %v2121_v29  ;;  %v4898_v59 = vpop.f32.mrb[96].mxu0  ;;  %v2514_v6 = vpop.permute.xlu0 %2513  ;;  %vm2710_vm5 = vcmp.gt.bf16.partialorder %v6971_v30, 0 }
 0x278   :  { %v2782_v47 = vmul.bf16 1069105081, %v7019_v34  ;;  %v1815_v23 = vpop.f32.mrb[52].mxu1  ;;  %v2947_v20 = vmul.bf16 1071005654, %v2899_v55  ;;  %v4899_v7 = vpop.f32.mrb[97].mxu0  ;;  %v2522_v24 = vrot.slane %v2514_v6, %v6098_v17 }
 0x279   :  { %5355 = vpow.bf16 %v2779_v5  ;;  %v1817_v44 = vpop.f32.mrb[53].mxu1  ;;  %v2830_v49 = vmul.bf16 1069105081, %v7033_v21  ;;  %v4900_v58 = vadd.f32 %v4899_v7, %v4898_v59  ;;  %v4901_v62 = vpop.f32.mrb[98].mxu0  ;;  %v2994_v18 = vsel %vm2706_vm4, %v6917_v57, %v2946_v15 }
 0x27a   :  { %5357 = vpow.bf16 %v2782_v47  ;;  %v1819_v48 = vpop.f32.mrb[54].mxu1  ;;  %v2995_v45 = vsel %vm2707_vm3, %v6920_v1, %v2947_v20  ;;  %v4902_v55 = vpop.f32.mrb[99].mxu0  ;;  %v7060_v57 = vadd.bf16 %v6937_v61, %v2106_v51  ;;  %vm2712_vm7 = vcmp.gt.bf16.partialorder %v7011_v12, 0 }
 0x27b   :  { %v2107_v22 = vpack.c.bf16 %v1819_v48, %v1815_v23  ;;  %v1821_v54 = vpop.f32.mrb[55].mxu1  ;;  %3233 = vmatprep.subr.bf16.mxu1 %v2995_v45  ;;  %5359 = vpow.bf16 %v2767_v35  ;;  %v4903_v29 = vadd.f32 %v4902_v55, %v4901_v62  ;;  %v7054_v23 = vcombine.low %v2498_v28, %v2510_v63  ;;  %v7071_v11 = vpop.permute.xlu1 %2549 }
 0x27c   :  { %v5352_v39 = vpop.eup %5351  ;;  %v2108_v1 = vpack.c.bf16 %v1821_v54, %v1817_v44  ;;  %3234 = vmatpush1.bf16.msra.mxu1 %v2994_v18  ;;  %5361 = vpow.bf16 %v2830_v49  ;;  %v2776_v35 = vmul.bf16 1069105081, %v7040_v9  ;;  %v2534_v63 = vrot.slane %v7028_v16, %v6098_v17 }
 0x27d   :  { %v5354_v3 = vpop.eup %5353  ;;  %v7051_v5 = vadd.bf16 %v6939_v27, %v2107_v22  ;;  %v2901_v47 = vsub.bf16 %v5352_v39, %v5586_v41  ;;  %v2124_v15 = vpack.c.bf16 %v4903_v29, %v4900_v58  ;;  %v7079_v48 = vsub.bf16 %v5350_v46, %v5586_v41 }
 0x27e   :  { %v7063_v40 = vadd.bf16 %v6939_v27, %v2108_v1  ;;  %v2902_v38 = vsub.bf16 %v5354_v3, %v5586_v41  ;;  %v2785_v16 = vmul.bf16 1069105081, %v7060_v57  ;;  %v7086_v1 = vcombine.low %v2522_v24, %v2534_v63 }
 0x27f   :  { %v2788_v36 = vmul.bf16 1069105081, %v7051_v5  ;;  %v2949_v20 = vmul.bf16 1071005654, %v2901_v47  ;;  %v7075_v59 = vadd.bf16 %v7004_v13, %v2124_v15  ;;  %v4904_v44 = vpop.f32.mrb[100].mxu0  ;;  %v2558_v3 = vrot.slane %v7071_v11, %v6098_v17 }
 0x280   :  { %v2791_v51 = vmul.bf16 1069105081, %v7063_v40  ;;  %v1825_v61 = vpop.f32.mrb[56].mxu1  ;;  %v2950_v28 = vmul.bf16 1071005654, %v2902_v38  ;;  %v4905_v45 = vpop.f32.mrb[101].mxu0 }
 0x281   :  { %5363 = vpow.bf16 %v2788_v36  ;;  %v1827_v7 = vpop.f32.mrb[57].mxu1  ;;  %v2839_v62 = vmul.bf16 1069105081, %v7075_v59  ;;  %v4906_v22 = vadd.f32 %v4905_v45, %v4904_v44  ;;  %v4907_v54 = vpop.f32.mrb[102].mxu0  ;;  %v2997_v55 = vsel %vm2709_vm6, %v6963_v32, %v2949_v20 }
 0x282   :  { %5365 = vpow.bf16 %v2791_v51  ;;  %v1829_v49 = vpop.f32.mrb[58].mxu1  ;;  %v2998_v58 = vsel %vm2710_vm5, %v6971_v30, %v2950_v28  ;;  %v4908_v29 = vpop.f32.mrb[103].mxu0  ;;  %vm2713_vm8 = vcmp.gt.bf16.partialorder %v7019_v34, 0  ;;  %vm2729_vm9 = vcmp.gt.bf16.partialorder %v7033_v21, 0 }
 0x283   :  { %v2110_v18 = vpack.c.bf16 %v1829_v49, %v1825_v61  ;;  %v1831_v39 = vpop.f32.mrb[59].mxu1  ;;  %3235 = vmatprep.subr.bf16.mxu1 %v2998_v58  ;;  %5367 = vpow.bf16 %v2776_v35  ;;  %v7090_v38 = vpop.permute.xlu0 %2537  ;;  %v4909_v6 = vadd.f32 %v4908_v29, %v4907_v54  ;;  %v2945_v35 = vmul.bf16 1071005654, %v7079_v48 }
 0x284   :  { %v5356_v46 = vpop.eup %5355  ;;  %v2111_v30 = vpack.c.bf16 %v1831_v39, %v1827_v7  ;;  %3236 = vmatpush1.bf16.msra.mxu1 %v2997_v55  ;;  %5369 = vpow.bf16 %v2839_v62  ;;  %v2546_v36 = vrot.slane %v7090_v38, %v6098_v17  ;;  %v7108_v7 = vadd.bf16 %v6939_v27, %v2109_v10 }
 0x285   :  { %v5358_v47 = vpop.eup %5357  ;;  %v7093_v15 = vadd.bf16 %v6986_v60, %v2110_v18  ;;  %v2904_v32 = vsub.bf16 %v5356_v46, %v5586_v41  ;;  %5371 = vpow.bf16 %v2785_v16  ;;  %v2127_v51 = vpack.c.bf16 %v4909_v6, %v4906_v22 }
 0x286   :  { %v7099_v20 = vadd.bf16 %v6986_v60, %v2111_v30  ;;  %v2905_v63 = vsub.bf16 %v5358_v47, %v5586_v41  ;;  %v5360_v24 = vpop.eup %5359  ;;  %v2794_v6 = vmul.bf16 1069105081, %v7108_v7  ;;  %vm2716_vm12 = vcmp.gt.bf16.partialorder %v7063_v40, 0 }
 0x287   :  { %v2797_v61 = vmul.bf16 1069105081, %v7093_v15  ;;  %v2952_v28 = vmul.bf16 1071005654, %v2904_v32  ;;  %v5362_v44 = vpop.eup %5361  ;;  %v7113_v48 = vadd.bf16 %v7006_v33, %v2127_v51  ;;  %v4910_v16 = vpop.f32.mrb[104].mxu0  ;;  %v2900_v54 = vsub.bf16 %v5360_v24, %v5586_v41 }
 0x288   :  { %v2800_v45 = vmul.bf16 1069105081, %v7099_v20  ;;  %v1835_v49 = vpop.f32.mrb[60].mxu1  ;;  %v2953_v58 = vmul.bf16 1071005654, %v2905_v63  ;;  %v2921_v62 = vsub.bf16 %v5362_v44, %v5586_v41  ;;  %v4911_v0 = vpop.f32.mrb[105].mxu0 }
 0x289   :  { %5373 = vpow.bf16 %v2797_v61  ;;  %v1837_v22 = vpop.f32.mrb[61].mxu1  ;;  %v3000_v27 = vsel %vm2712_vm7, %v7011_v12, %v2952_v28  ;;  %v2848_v18 = vmul.bf16 1069105081, %v7113_v48  ;;  %v4912_v39 = vadd.f32 %v4911_v0, %v4910_v16  ;;  %v4913_v55 = vpop.f32.mrb[106].mxu0 }
 0x28a   :  { %5375 = vpow.bf16 %v2800_v45  ;;  %v1839_v2 = vpop.f32.mrb[62].mxu1  ;;  %v3001_v10 = vsel %vm2713_vm8, %v7019_v34, %v2953_v58  ;;  %v2969_v46 = vmul.bf16 1071005654, %v2921_v62  ;;  %v4914_v32 = vpop.f32.mrb[107].mxu0  ;;  %v2993_v61 = vsel %vm2705_vm10, %v6932_v25, %v2945_v35 }
 0x28b   :  { %v2113_v29 = vpack.c.bf16 %v1839_v2, %v1835_v49  ;;  %v1841_v30 = vpop.f32.mrb[63].mxu1  ;;  %3237 = vmatprep.subr.bf16.mxu1 %v3001_v10  ;;  %5377 = vpow.bf16 %v2848_v18  ;;  %v4915_v63 = vadd.f32 %v4914_v32, %v4913_v55  ;;  %vm2715_vm13 = vcmp.gt.bf16.partialorder %v7051_v5, 0 }
 0x28c   :  { %v5364_v47 = vpop.eup %5363  ;;  %v2114_v34 = vpack.c.bf16 %v1841_v30, %v1837_v22  ;;  %3238 = vmatpush1.bf16.msra.mxu1 %v3000_v27  ;;  %v3017_v24 = vsel %vm2729_vm9, %v7033_v21, %v2969_v46  ;;  %v2948_v21 = vmul.bf16 1071005654, %v2900_v54  ;;  %5379 = vpow.bf16 %v2794_v6 }
 0x28d   :  { %v5366_v12 = vpop.eup %5365  ;;  %v7126_v51 = vadd.bf16 %v6988_v56, %v2113_v29  ;;  %4940 = vmatprep.subr.bf16.mxu0 %v3017_v24  ;;  %v2907_v45 = vsub.bf16 %v5364_v47, %v5586_v41  ;;  %v2130_v58 = vpack.c.bf16 %v4915_v63, %v4912_v39  ;;  %vm2732_vm14 = vcmp.gt.bf16.partialorder %v7075_v59, 0 }
 0x28e   :  { %v7130_v28 = vadd.bf16 %v6988_v56, %v2114_v34  ;;  %v2908_v44 = vsub.bf16 %v5366_v12, %v5586_v41  ;;  %v5368_v49 = vpop.eup %5367  ;;  %4941 = vmatpush3.bf16.msra.mxu0 %v2993_v61  ;;  %vm2711_vm15 = vcmp.gt.bf16.partialorder %v7040_v9, 0  ;;  %vm2719_vm0 = vcmp.gt.bf16.partialorder %v7099_v20, 0 }
 0x28f   :  { %v2806_v16 = vmul.bf16 1069105081, %v7126_v51  ;;  %v5370_v62 = vpop.eup %5369  ;;  %v7139_v0 = vadd.bf16 %v7046_v8, %v2130_v58  ;;  %v4916_v2 = vpop.f32.mrb[108].mxu0  ;;  %v2955_v18 = vmul.bf16 1071005654, %v2907_v45  ;;  %v2903_v29 = vsub.bf16 %v5368_v49, %v5586_v41 }
 0x290   :  { %v2809_v22 = vmul.bf16 1069105081, %v7130_v28  ;;  %v1845_v25 = vpop.f32.mrb[64].mxu1  ;;  %v2956_v35 = vmul.bf16 1071005654, %v2908_v44  ;;  %v2924_v10 = vsub.bf16 %v5370_v62, %v5586_v41  ;;  %v5372_v39 = vpop.eup %5371  ;;  %v7159_v62 = vadd.bf16 %v6986_v60, %v2112_v50 }
 0x291   :  { %5381 = vpow.bf16 %v2806_v16  ;;  %v1847_v27 = vpop.f32.mrb[65].mxu1  ;;  %v4917_v55 = vpop.f32.mrb[109].mxu0  ;;  %v2857_v30 = vmul.bf16 1069105081, %v7139_v0  ;;  %v3003_v44 = vsel %vm2715_vm13, %v7051_v5, %v2955_v18  ;;  %v7171_v60 = vsub.bf16 %v5372_v39, %v5586_v41 }
 0x292   :  { %5383 = vpow.bf16 %v2809_v22  ;;  %v1849_v54 = vpop.f32.mrb[66].mxu1  ;;  %v3004_v46 = vsel %vm2716_vm12, %v7063_v40, %v2956_v35  ;;  %v4918_v47 = vadd.f32 %v4917_v55, %v4916_v2  ;;  %v4919_v6 = vpop.f32.mrb[110].mxu0  ;;  %v2972_v32 = vmul.bf16 1071005654, %v2924_v10 }
 0x293   :  { %v2116_v34 = vpack.c.bf16 %v1849_v54, %v1845_v25  ;;  %v1851_v12 = vpop.f32.mrb[67].mxu1  ;;  %3239 = vmatprep.subr.bf16.mxu1 %v3004_v46  ;;  %v4920_v24 = vpop.f32.mrb[111].mxu0  ;;  %v2996_v40 = vsel %vm2708_vm11, %v6999_v14, %v2948_v21  ;;  %5385 = vpow.bf16 %v2857_v30  ;;  %v2951_v25 = vmul.bf16 1071005654, %v2903_v29 }
 0x294   :  { %v5374_v63 = vpop.eup %5373  ;;  %v2117_v61 = vpack.c.bf16 %v1851_v12, %v1847_v27  ;;  %v4921_v49 = vadd.f32 %v4920_v24, %v4919_v6  ;;  %v3020_v58 = vsel %vm2732_vm14, %v7075_v59, %v2972_v32  ;;  %3240 = vmatpush1.bf16.msra.mxu1 %v3003_v44  ;;  %v2803_v54 = vmul.bf16 1069105081, %v7159_v62 }
 0x295   :  { %v5376_v45 = vpop.eup %5375  ;;  %v7153_v16 = vadd.bf16 %v6991_v19, %v2116_v34  ;;  %4942 = vmatprep.subr.bf16.mxu0 %v3020_v58  ;;  %v2910_v21 = vsub.bf16 %v5374_v63, %v5586_v41  ;;  %vm2718_vm1 = vcmp.gt.bf16.partialorder %v7093_v15, 0  ;;  %vm2714_vm2 = vcmp.gt.bf16.partialorder %v7060_v57, 0 }
 0x296   :  { %v7162_v14 = vadd.bf16 %v6991_v19, %v2117_v61  ;;  %v2911_v5 = vsub.bf16 %v5376_v45, %v5586_v41  ;;  %v2133_v22 = vpack.c.bf16 %v4921_v49, %v4918_v47  ;;  %4943 = vmatpush3.bf16.msra.mxu0 %v2996_v40  ;;  %v5378_v35 = vpop.eup %5377  ;;  %vm2735_vm3 = vcmp.gt.bf16.partialorder %v7113_v48, 0 }
 0x297   :  { %v2815_v59 = vmul.bf16 1069105081, %v7153_v16  ;;  %v4922_v10 = vpop.f32.mrb[112].mxu0  ;;  %v2927_v27 = vsub.bf16 %v5378_v35, %v5586_v41  ;;  %v2958_v55 = vmul.bf16 1071005654, %v2910_v21  ;;  %v5380_v39 = vpop.eup %5379  ;;  %v7994_v21 = vpack.c.bf16 %v6914_v52, %v6902_v26 }
 0x298   :  { %v2818_v4 = vmul.bf16 1069105081, %v7162_v14  ;;  %v1855_v37 = vpop.f32.mrb[68].mxu1  ;;  %v2959_v50 = vmul.bf16 1071005654, %v2911_v5  ;;  %v7174_v2 = vadd.bf16 %v7048_v31, %v2133_v22  ;;  %v4923_v46 = vpop.f32.mrb[113].mxu0 }
 0x299   :  { %5387 = vpow.bf16 %v2815_v59  ;;  %v1857_v18 = vpop.f32.mrb[69].mxu1  ;;  %v4924_v6 = vadd.f32 %v4923_v46, %v4922_v10  ;;  %v4925_v32 = vpop.f32.mrb[114].mxu0  ;;  %v2975_v34 = vmul.bf16 1071005654, %v2927_v27  ;;  %v3006_v44 = vsel %vm2718_vm1, %v7093_v15, %v2958_v55 }
 0x29a   :  { %5389 = vpow.bf16 %v2818_v4  ;;  %v1859_v29 = vpop.f32.mrb[70].mxu1  ;;  %v3007_v30 = vsel %vm2719_vm0, %v7099_v20, %v2959_v50  ;;  %v2866_v47 = vmul.bf16 1069105081, %v7174_v2  ;;  %v4926_v40 = vpop.f32.mrb[115].mxu0  ;;  %v2999_v20 = vsel %vm2711_vm15, %v7040_v9, %v2951_v25 }
 0x29b   :  { %v2119_v12 = vpack.c.bf16 %v1859_v29, %v1855_v37  ;;  %v1861_v63 = vpop.f32.mrb[71].mxu1  ;;  %3241 = vmatprep.subr.bf16.mxu1 %v3007_v30  ;;  %v4927_v49 = vadd.f32 %v4926_v40, %v4925_v32  ;;  %v3023_v58 = vsel %vm2735_vm3, %v7113_v48, %v2975_v34  ;;  %v7195_v22 = vadd.bf16 %v6988_v56, %v7994_v21 }
 0x29c   :  { %v5382_v24 = vpop.eup %5381  ;;  %v2120_v61 = vpack.c.bf16 %v1861_v63, %v1857_v18  ;;  %5391 = vpow.bf16 %v2866_v47  ;;  %3242 = vmatpush1.bf16.msra.mxu1 %v3006_v44  ;;  %4944 = vmatprep.subr.bf16.mxu0 %v3023_v58  ;;  %v2954_v35 = vmul.bf16 1071005654, %v7171_v60  ;;  %vm2722_vm4 = vcmp.gt.bf16.partialorder %v7130_v28, 0 }
 0x29d   :  { %v5384_v45 = vpop.eup %5383  ;;  %v7189_v5 = vadd.bf16 %v7002_v43, %v2119_v12  ;;  %v2913_v59 = vsub.bf16 %v5382_v24, %v5586_v41  ;;  %5393 = vpow.bf16 %v2803_v54  ;;  %v2136_v48 = vpack.c.bf16 %v4927_v49, %v4924_v6  ;;  %4945 = vmatpush3.bf16.msra.mxu0 %v2999_v20 }
 0x29e   :  { %v7198_v9 = vadd.bf16 %v7002_v43, %v2120_v61  ;;  %v2914_v15 = vsub.bf16 %v5384_v45, %v5586_v41  ;;  %v5386_v4 = vpop.eup %5385  ;;  %v2909_v43 = vsub.bf16 %v5380_v39, %v5586_v41  ;;  %v2812_v60 = vmul.bf16 1069105081, %v7195_v22 }
 0x29f   :  { %v2824_v25 = vmul.bf16 1069105081, %v7189_v5  ;;  %v7208_v37 = vadd.bf16 %v7054_v23, %v2136_v48  ;;  %v4928_v50 = vpop.f32.mrb[116].mxu0  ;;  %v2930_v10 = vsub.bf16 %v5386_v4, %v5586_v41  ;;  %v2961_v18 = vmul.bf16 1071005654, %v2913_v59 }
 0x2a0   :  { %v2827_v26 = vmul.bf16 1069105081, %v7198_v9  ;;  %v1865_v52 = vpop.f32.mrb[72].mxu1  ;;  %v2962_v56 = vmul.bf16 1071005654, %v2914_v15  ;;  %v4929_v55 = vpop.f32.mrb[117].mxu0  ;;  %v3002_v63 = vsel %vm2714_vm2, %v7060_v57, %v2954_v35  ;;  %v7995_v15 = vpack.c.bf16 %v6960_v42, %v6951_v53 }
 0x2a1   :  { %5395 = vpow.bf16 %v2824_v25  ;;  %v1867_v27 = vpop.f32.mrb[73].mxu1  ;;  %vm2721_vm5 = vcmp.gt.bf16.partialorder %v7126_v51, 0  ;;  %v2875_v29 = vmul.bf16 1069105081, %v7208_v37  ;;  %v4930_v30 = vadd.f32 %v4929_v55, %v4928_v50  ;;  %v4931_v39 = vpop.f32.mrb[118].mxu0 }
 0x2a2   :  { %5397 = vpow.bf16 %v2827_v26  ;;  %v1869_v54 = vpop.f32.mrb[74].mxu1  ;;  %v3010_v46 = vsel %vm2722_vm4, %v7130_v28, %v2962_v56  ;;  %v2978_v47 = vmul.bf16 1071005654, %v2930_v10  ;;  %v4932_v12 = vpop.f32.mrb[119].mxu0  ;;  %vm2738_vm6 = vcmp.gt.bf16.partialorder %v7139_v0, 0 }
 0x2a3   :  { %v2122_v6 = vpack.c.bf16 %v1869_v54, %v1865_v52  ;;  %v1871_v32 = vpop.f32.mrb[75].mxu1  ;;  %3243 = vmatprep.subr.bf16.mxu1 %v3010_v46  ;;  %v3009_v28 = vsel %vm2721_vm5, %v7126_v51, %v2961_v18  ;;  %5399 = vpow.bf16 %v2875_v29  ;;  %v4933_v20 = vadd.f32 %v4932_v12, %v4931_v39 }
 0x2a4   :  { %v5388_v34 = vpop.eup %5387  ;;  %v2123_v24 = vpack.c.bf16 %v1871_v32, %v1867_v27  ;;  %v3026_v61 = vsel %vm2738_vm6, %v7139_v0, %v2978_v47  ;;  %3244 = vmatpush1.bf16.msra.mxu1 %v3009_v28  ;;  %v2957_v49 = vmul.bf16 1071005654, %v2909_v43  ;;  %5401 = vpow.bf16 %v2812_v60 }
 0x2a5   :  { %v5390_v40 = vpop.eup %5389  ;;  %v7222_v44 = vadd.bf16 %v7004_v13, %v2122_v6  ;;  %4946 = vmatprep.subr.bf16.mxu0 %v3026_v61  ;;  %v2916_v57 = vsub.bf16 %v5388_v34, %v5586_v41  ;;  %v2139_v51 = vpack.c.bf16 %v4933_v20, %v4930_v30  ;;  %vm2717_vm7 = vcmp.gt.bf16.partialorder %v7108_v7, 0 }
 0x2a6   :  { %v7225_v45 = vadd.bf16 %v7004_v13, %v2123_v24  ;;  %v2917_v58 = vsub.bf16 %v5390_v40, %v5586_v41  ;;  %4947 = vmatpush3.bf16.msra.mxu0 %v3002_v63  ;;  %v7235_v59 = vadd.bf16 %v6991_v19, %v7995_v15  ;;  %vm2725_vm8 = vcmp.gt.bf16.partialorder %v7162_v14, 0 }
 0x2a7   :  { %v2833_v21 = vmul.bf16 1069105081, %v7222_v44  ;;  %v5392_v0 = vpop.eup %5391  ;;  %v7240_v35 = vadd.bf16 %v7086_v1, %v2139_v51  ;;  %v4934_v4 = vpop.f32.mrb[120].mxu0  ;;  %v2964_v56 = vmul.bf16 1071005654, %v2916_v57  ;;  %v3005_v42 = vsel %vm2717_vm7, %v7108_v7, %v2957_v49 }
 0x2a8   :  { %v2836_v13 = vmul.bf16 1069105081, %v7225_v45  ;;  %v1875_v48 = vpop.f32.mrb[76].mxu1  ;;  %v2965_v25 = vmul.bf16 1071005654, %v2917_v58  ;;  %v2933_v26 = vsub.bf16 %v5392_v0, %v5586_v41  ;;  %v5394_v43 = vpop.eup %5393  ;;  %vm2724_vm9 = vcmp.gt.bf16.partialorder %v7153_v16, 0 }
 0x2a9   :  { %5403 = vpow.bf16 %v2833_v21  ;;  %v1877_v52 = vpop.f32.mrb[77].mxu1  ;;  %v4935_v53 = vpop.f32.mrb[121].mxu0  ;;  %v2884_v10 = vmul.bf16 1069105081, %v7240_v35  ;;  %v2821_v29 = vmul.bf16 1069105081, %v7235_v59  ;;  %v3012_v39 = vsel %vm2724_vm9, %v7153_v16, %v2964_v56 }
 0x2aa   :  { %5405 = vpow.bf16 %v2836_v13  ;;  %v1879_v19 = vpop.f32.mrb[78].mxu1  ;;  %v3013_v50 = vsel %vm2725_vm8, %v7162_v14, %v2965_v25  ;;  %v4936_v27 = vadd.f32 %v4935_v53, %v4934_v4  ;;  %v4937_v18 = vpop.f32.mrb[122].mxu0  ;;  %v2981_v60 = vmul.bf16 1071005654, %v2933_v26 }
 0x2ab   :  { %v2125_v55 = vpack.c.bf16 %v1879_v19, %v1875_v48  ;;  %v1881_v54 = vpop.f32.mrb[79].mxu1  ;;  %3245 = vmatprep.subr.bf16.mxu1 %v3013_v50  ;;  %v4938_v30 = vpop.f32.mrb[123].mxu0  ;;  %vm2741_vm10 = vcmp.gt.bf16.partialorder %v7174_v2, 0  ;;  %5407 = vpow.bf16 %v2884_v10  ;;  %v2912_v12 = vsub.bf16 %v5394_v43, %v5586_v41 }
 0x2ac   :  { %v5396_v46 = vpop.eup %5395  ;;  %v2126_v7 = vpack.c.bf16 %v1881_v54, %v1877_v52  ;;  %v4939_v47 = vadd.f32 %v4938_v30, %v4937_v18  ;;  %v3029_v6 = vsel %vm2741_vm10, %v7174_v2, %v2981_v60  ;;  %3246 = vmatpush1.bf16.msra.mxu1 %v3012_v39  ;;  %v7268_v16 = vcombine.low %v2546_v36, %v2558_v3 }
 0x2ad   :  { %v5398_v14 = vpop.eup %5397  ;;  %v7254_v32 = vadd.bf16 %v7006_v33, %v2125_v55  ;;  %4948 = vmatprep.subr.bf16.mxu0 %v3029_v6  ;;  %v2919_v24 = vsub.bf16 %v5396_v46, %v5586_v41  ;;  %5409 = vpow.bf16 %v2821_v29  ;;  %vm2728_vm11 = vcmp.gt.bf16.partialorder %v7198_v9, 0 }
 0x2ae   :  { %v7257_v34 = vadd.bf16 %v7006_v33, %v2126_v7  ;;  %v2920_v63 = vsub.bf16 %v5398_v14, %v5586_v41  ;;  %v2142_v2 = vpack.c.bf16 %v4939_v47, %v4936_v27  ;;  %4949 = vmatpush3.bf16.msra.mxu0 %v3005_v42  ;;  %v5400_v33 = vpop.eup %5399  ;;  %v2960_v58 = vmul.bf16 1071005654, %v2912_v12 }
 0x2af   :  { %v2842_v28 = vmul.bf16 1069105081, %v7254_v32  ;;  %v2936_v11 = vsub.bf16 %v5400_v33, %v5586_v41  ;;  %v2967_v38 = vmul.bf16 1071005654, %v2919_v24  ;;  %v5402_v36 = vpop.eup %5401  ;;  %vm2727_vm12 = vcmp.gt.bf16.partialorder %v7189_v5, 0 }
 0x2b0   :  { %v2845_v40 = vmul.bf16 1069105081, %v7257_v34  ;;  %v1885_v20 = vpop.f32.mrb[80].mxu1  ;;  %v2968_v61 = vmul.bf16 1071005654, %v2920_v63  ;;  %v7274_v49 = vadd.bf16 %v7268_v16, %v2142_v2  ;;  %vm2744_vm13 = vcmp.gt.bf16.partialorder %v7208_v37, 0 }
 0x2b1   :  { %5411 = vpow.bf16 %v2842_v28  ;;  %v1887_v3 = vpop.f32.mrb[81].mxu1  ;;  %v2984_v0 = vmul.bf16 1071005654, %v2936_v11  ;;  %v3015_v48 = vsel %vm2727_vm12, %v7189_v5, %v2967_v38  ;;  %vm2720_vm14 = vcmp.gt.bf16.partialorder %v7159_v62, 0 }
 0x2b2   :  { %5413 = vpow.bf16 %v2845_v40  ;;  %v1889_v57 = vpop.f32.mrb[82].mxu1  ;;  %v3016_v51 = vsel %vm2728_vm11, %v7198_v9, %v2968_v61  ;;  %v2893_v21 = vmul.bf16 1069105081, %v7274_v49  ;;  %v3008_v43 = vsel %vm2720_vm14, %v7159_v62, %v2960_v58 }
 0x2b3   :  { %v2128_v15 = vpack.c.bf16 %v1889_v57, %v1885_v20  ;;  %v1891_v13 = vpop.f32.mrb[83].mxu1  ;;  %3247 = vmatprep.subr.bf16.mxu1 %v3016_v51  ;;  %v3032_v9 = vsel %vm2744_vm13, %v7208_v37, %v2984_v0  ;;  %v2915_v53 = vsub.bf16 %v5402_v36, %v5586_v41  ;;  %vm2731_vm15 = vcmp.gt.bf16.partialorder %v7225_v45, 0 }
 0x2b4   :  { %v5404_v25 = vpop.eup %5403  ;;  %v2129_v4 = vpack.c.bf16 %v1891_v13, %v1887_v3  ;;  %3248 = vmatpush1.bf16.msra.mxu1 %v3015_v48  ;;  %5415 = vpow.bf16 %v2893_v21  ;;  %4950 = vmatprep.subr.bf16.mxu0 %v3032_v9  ;;  %vm2730_vm0 = vcmp.gt.bf16.partialorder %v7222_v44, 0  ;;  %vm2747_vm1 = vcmp.gt.bf16.partialorder %v7240_v35, 0 }
 0x2b5   :  { %v5406_v26 = vpop.eup %5405  ;;  %v7285_v52 = vadd.bf16 %v7046_v8, %v2128_v15  ;;  %v2922_v56 = vsub.bf16 %v5404_v25, %v5586_v41  ;;  %4951 = vmatpush3.bf16.msra.mxu0 %v3008_v43  ;;  %vm2723_vm2 = vcmp.gt.bf16.partialorder %v7195_v22, 0  ;;  %vm2734_vm3 = vcmp.gt.bf16.partialorder %v7257_v34, 0 }
 0x2b6   :  { %v7290_v5 = vadd.bf16 %v7046_v8, %v2129_v4  ;;  %v2923_v42 = vsub.bf16 %v5406_v26, %v5586_v41  ;;  %v5408_v37 = vpop.eup %5407  ;;  %v2963_v8 = vmul.bf16 1071005654, %v2915_v53  ;;  %vm2733_vm4 = vcmp.gt.bf16.partialorder %v7254_v32, 0 }
 0x2b7   :  { %v2851_v19 = vmul.bf16 1069105081, %v7285_v52  ;;  %v2970_v50 = vmul.bf16 1071005654, %v2922_v56  ;;  %v2939_v60 = vsub.bf16 %v5408_v37, %v5586_v41  ;;  %vm2750_vm5 = vcmp.gt.bf16.partialorder %v7274_v49, 0 }
 0x2b8   :  { %v2854_v10 = vmul.bf16 1069105081, %v7290_v5  ;;  %v1895_v27 = vpop.f32.mrb[84].mxu1  ;;  %v2971_v18 = vmul.bf16 1071005654, %v2923_v42  ;;  %v5410_v46 = vpop.eup %5409  ;;  %v3011_v24 = vsel %vm2723_vm2, %v7195_v22, %v2963_v8  ;;  %vm2726_vm6 = vcmp.gt.bf16.partialorder %v7235_v59, 0 }
 0x2b9   :  { %5417 = vpow.bf16 %v2851_v19  ;;  %v1897_v62 = vpop.f32.mrb[85].mxu1  ;;  %v2987_v29 = vmul.bf16 1071005654, %v2939_v60  ;;  %v3018_v39 = vsel %vm2730_vm0, %v7222_v44, %v2970_v50  ;;  %v2918_v2 = vsub.bf16 %v5410_v46, %v5586_v41  ;;  %v7342_v56 = vld [vmem:[%s7979_s5 + $0x14] ss:$8 sps:$4 sm:$0xff]  }
 0x2ba   :  { %5419 = vpow.bf16 %v2854_v10  ;;  %v1899_v55 = vpop.f32.mrb[86].mxu1  ;;  %v3019_v54 = vsel %vm2731_vm15, %v7225_v45, %v2971_v18  ;;  %vm2737_vm7 = vcmp.gt.bf16.partialorder %v7290_v5, 0  ;;  %vm2736_vm8 = vcmp.gt.bf16.partialorder %v7285_v52, 0 }
 0x2bb   :  { %v2131_v30 = vpack.c.bf16 %v1899_v55, %v1895_v27  ;;  %v1901_v7 = vpop.f32.mrb[87].mxu1  ;;  %3249 = vmatprep.subr.bf16.mxu1 %v3019_v54  ;;  %v3035_v12 = vsel %vm2747_vm1, %v7240_v35, %v2987_v29  ;;  %v7366_v29 = vld [vmem:[%s7979_s5 + $0x24] ss:$8 sps:$4 sm:$0xff]  }
 0x2bc   :  { %v5412_v14 = vpop.eup %5411  ;;  %v2132_v47 = vpack.c.bf16 %v1901_v7, %v1897_v62  ;;  %3250 = vmatpush1.bf16.msra.mxu1 %v3018_v39  ;;  %4952 = vmatprep.subr.bf16.mxu0 %v3035_v12 }
 0x2bd   :  { %v5414_v6 = vpop.eup %5413  ;;  %v7305_v45 = vadd.bf16 %v7048_v31, %v2131_v30  ;;  %v2925_v63 = vsub.bf16 %v5412_v14, %v5586_v41  ;;  %4953 = vmatpush3.bf16.msra.mxu0 %v3011_v24 }
 0x2be   :  { %v7310_v44 = vadd.bf16 %v7048_v31, %v2132_v47  ;;  %v2926_v28 = vsub.bf16 %v5414_v6, %v5586_v41  ;;  %v2966_v31 = vmul.bf16 1071005654, %v2918_v2 }
 0x2bf   :  { %v2860_v35 = vmul.bf16 1069105081, %v7305_v45  ;;  %v2973_v33 = vmul.bf16 1071005654, %v2925_v63  ;;  %v5416_v40 = vpop.eup %5415  ;;  %vm2739_vm10 = vcmp.gt.bf16.partialorder %v7305_v45, 0 }
 0x2c0   :  { %v2863_v20 = vmul.bf16 1069105081, %v7310_v44  ;;  %v1905_v61 = vpop.f32.mrb[88].mxu1  ;;  %v2974_v11 = vmul.bf16 1071005654, %v2926_v28  ;;  %v2942_v3 = vsub.bf16 %v5416_v40, %v5586_v41  ;;  %v3014_v4 = vsel %vm2726_vm6, %v7235_v59, %v2966_v31 }
 0x2c1   :  { %5421 = vpow.bf16 %v2860_v35  ;;  %v1907_v22 = vpop.f32.mrb[89].mxu1  ;;  %v3021_v21 = vsel %vm2733_vm4, %v7254_v32, %v2973_v33  ;;  %v7332_v32 = vld [vmem:[%s7979_s5] ss:$8 sps:$4 sm:$0xff]   ;;  %vm2740_vm9 = vcmp.gt.bf16.partialorder %v7310_v44, 0 }
 0x2c2   :  { %5423 = vpow.bf16 %v2863_v20  ;;  %v1909_v38 = vpop.f32.mrb[90].mxu1  ;;  %v3022_v36 = vsel %vm2734_vm3, %v7257_v34, %v2974_v11  ;;  %v2990_v58 = vmul.bf16 1071005654, %v2942_v3 }
 0x2c3   :  { %v2134_v57 = vpack.c.bf16 %v1909_v38, %v1905_v61  ;;  %v1911_v51 = vpop.f32.mrb[91].mxu1  ;;  %3251 = vmatprep.subr.bf16.mxu1 %v3022_v36 }
 0x2c4   :  { %v5418_v0 = vpop.eup %5417  ;;  %v2135_v15 = vpack.c.bf16 %v1911_v51, %v1907_v22  ;;  %3252 = vmatpush1.bf16.msra.mxu1 %v3021_v21  ;;  %v3038_v48 = vsel %vm2750_vm5, %v7274_v49, %v2990_v58  ;;  %v5206_v51 = vld [vmem:[%s7979_s5 + $0x30] ss:$8 sps:$4 sm:$0xff]  }
 0x2c5   :  { %v5420_v13 = vpop.eup %5419  ;;  %v7325_v34 = vadd.bf16 %v7054_v23, %v2134_v57  ;;  %v2928_v25 = vsub.bf16 %v5418_v0, %v5586_v41  ;;  %4954 = vmatprep.subr.bf16.mxu0 %v3038_v48  ;;  %v5207_v0 = vld [vmem:[%s7979_s5 + $0x44] ss:$8 sps:$4 sm:$0xff]  }
 0x2c6   :  { %v7335_v26 = vadd.bf16 %v7054_v23, %v2135_v15  ;;  %v2929_v49 = vsub.bf16 %v5420_v13, %v5586_v41  ;;  %4955 = vmatpush3.bf16.msra.mxu0 %v3014_v4 }
 0x2c7   :  { %v2869_v9 = vmul.bf16 1069105081, %v7325_v34  ;;  %v2976_v43 = vmul.bf16 1071005654, %v2928_v25  ;;  %vm2742_vm12 = vcmp.gt.bf16.partialorder %v7325_v34, 0 }
 0x2c8   :  { %v2872_v59 = vmul.bf16 1069105081, %v7335_v26  ;;  %v1915_v53 = vpop.f32.mrb[92].mxu1  ;;  %v2977_v42 = vmul.bf16 1071005654, %v2929_v49  ;;  %vm2743_vm11 = vcmp.gt.bf16.partialorder %v7335_v26, 0 }
 0x2c9   :  { %5425 = vpow.bf16 %v2869_v9  ;;  %v1917_v19 = vpop.f32.mrb[93].mxu1  ;;  %3457 = vmatmul.mubr.bf16.vlgmr.msra.gmra.mrb[124].mxu0 %v7332_v32  ;;  %v3024_v27 = vsel %vm2736_vm8, %v7285_v52, %v2976_v43  ;;  %v5209_v49 = vld [vmem:[%s7979_s5 + $0x40] ss:$8 sps:$4 sm:$0xff]   ;;  %v5210_v43 = vld [vmem:[%s7979_s5 + $0x54] ss:$8 sps:$4 sm:$0xff]  }
 0x2ca   :  { %5427 = vpow.bf16 %v2872_v59  ;;  %v1919_v23 = vpop.f32.mrb[94].mxu1  ;;  %v3025_v50 = vsel %vm2737_vm7, %v7290_v5, %v2977_v42  ;;  %3464 = vmatprep.mubr.bf16.mxu0 %v7342_v56  ;;  %v7358_v5 = vld [vmem:[%s7979_s5 + $0x10] ss:$8 sps:$4 sm:$0xff]  }
 0x2cb   :  { %v2137_v37 = vpack.c.bf16 %v1919_v23, %v1915_v53  ;;  %v1921_v10 = vpop.f32.mrb[95].mxu1  ;;  %3253 = vmatprep.subr.bf16.mxu1 %v3025_v50  ;;  %v5212_v23 = vld [vmem:[%s7979_s5 + $0x50] ss:$8 sps:$4 sm:$0xff]   ;;  %v5213_v50 = vld [vmem:[%s7979_s5 + $0x64] ss:$8 sps:$4 sm:$0xff]  }
 0x2cc   :  { %v5422_v18 = vpop.eup %5421  ;;  %v2138_v60 = vpack.c.bf16 %v1921_v10, %v1917_v19  ;;  %3254 = vmatpush1.bf16.msra.mxu1 %v3024_v27  ;;  %v5216_v10 = vld [vmem:[%s7979_s5 + $0x74] ss:$8 sps:$4 sm:$0xff]   ;;  %v5221_v27 = vld [vmem:[%s7979_s5 + $0x80] ss:$8 sps:$4 sm:$0xff]  }
 0x2cd   :  { %v5424_v62 = vpop.eup %5423  ;;  %v7352_v8 = vadd.bf16 %v7086_v1, %v2137_v37  ;;  %v2931_v55 = vsub.bf16 %v5422_v18, %v5586_v41  ;;  %v5215_v37 = vld [vmem:[%s7979_s5 + $0x60] ss:$8 sps:$4 sm:$0xff]   ;;  %v5222_v18 = vld [vmem:[%s7979_s5 + $0x94] ss:$8 sps:$4 sm:$0xff]  }
 0x2ce   :  { %v2698_v54 = vadd.bf16 %v7086_v1, %v2138_v60  ;;  %v2932_v46 = vsub.bf16 %v5424_v62, %v5586_v41  ;;  %v5224_v60 = vld [vmem:[%s7979_s5 + $0x90] ss:$8 sps:$4 sm:$0xff]   ;;  %v5225_v62 = vld [vmem:[%s7979_s5 + $0xa4] ss:$8 sps:$4 sm:$0xff]  }
 0x2cf   :  { %v2878_v52 = vmul.bf16 1069105081, %v7352_v8  ;;  %v2979_v30 = vmul.bf16 1071005654, %v2931_v55  ;;  %vm2745_vm14 = vcmp.gt.bf16.partialorder %v7352_v8, 0 }
 0x2d0   :  { %v2881_v7 = vmul.bf16 1069105081, %v2698_v54  ;;  %v1925_v39 = vpop.f32.mrb[96].mxu1  ;;  %v2980_v14 = vmul.bf16 1071005654, %v2932_v46  ;;  %vm2746_vm13 = vcmp.gt.bf16.partialorder %v2698_v54, 0 }
 0x2d1   :  { %5429 = vpow.bf16 %v2878_v52  ;;  %v1927_v47 = vpop.f32.mrb[97].mxu1  ;;  %3465 = vmatmul.mubr.bf16.gmra.mrb[128].mxu0 %v7358_v5  ;;  %v3027_v24 = vsel %vm2739_vm10, %v7305_v45, %v2979_v30  ;;  %v5204_v45 = vld [vmem:[%s7979_s5 + $0x34] ss:$8 sps:$4 sm:$0xff]   ;;  %v5233_v46 = vld [vmem:[%s7979_s5 + $0xc0] ss:$8 sps:$4 sm:$0xff]  }
 0x2d2   :  { %5431 = vpow.bf16 %v2881_v7  ;;  %v1929_v1 = vpop.f32.mrb[98].mxu1  ;;  %v3028_v6 = vsel %vm2740_vm9, %v7310_v44, %v2980_v14  ;;  %3472 = vmatprep.mubr.bf16.mxu0 %v7366_v29  ;;  %v5203_v44 = vld [vmem:[%s7979_s5 + $0x20] ss:$8 sps:$4 sm:$0xff]   ;;  %v5228_v55 = vld [vmem:[%s7979_s5 + $0xb4] ss:$8 sps:$4 sm:$0xff]  }
 0x2d3   :  { %v2140_v12 = vpack.c.bf16 %v1929_v1, %v1925_v39  ;;  %v1931_v63 = vpop.f32.mrb[99].mxu1  ;;  %3255 = vmatprep.subr.bf16.mxu1 %v3028_v6  ;;  %v5234_v52 = vld [vmem:[%s7979_s5 + $0xd4] ss:$8 sps:$4 sm:$0xff]   ;;  %v5237_v30 = vld [vmem:[%s7979_s5 + $0xe4] ss:$8 sps:$4 sm:$0xff]   ;;  %v3668_v6 = vpop.permute.xlu0 %3667 }
 0x2d4   :  { %v5426_v2 = vpop.eup %5425  ;;  %v2141_v28 = vpack.c.bf16 %v1931_v63, %v1927_v47  ;;  %3256 = vmatpush1.bf16.msra.mxu1 %v3027_v24  ;;  %v5239_v7 = vld [vmem:[%s7979_s5 + $0xe0] ss:$8 sps:$4 sm:$0xff]   ;;  %v5240_v39 = vld [vmem:[%s7979_s5 + $0xf4] ss:$8 sps:$4 sm:$0xff]   ;;  %v5242_v14 = vld [vmem:[%s7979_s5 + $0xf0] ss:$8 sps:$4 sm:$0xff]   ;;  %v3680_v47 = vpop.permute.xlu1 %3679  ;;  %v3676_v24 = vrot.slane %v3668_v6, %v6098_v17 }
 0x2d5   :  { %v5428_v35 = vpop.eup %5427  ;;  %v2700_v33 = vadd.bf16 %v7268_v16, %v2140_v12  ;;  %v2934_v40 = vsub.bf16 %v5426_v2, %v5586_v41  ;;  %v3688_v63 = vrot.slane %v3680_v47, %v6098_v17 }
 0x2d6   :  { %v2701_v20 = vadd.bf16 %v7268_v16, %v2141_v28  ;;  %v2935_v61 = vsub.bf16 %v5428_v35, %v5586_v41 }
 0x2d7   :  { %v2887_v11 = vmul.bf16 1069105081, %v2700_v33  ;;  %v2982_v3 = vmul.bf16 1071005654, %v2934_v40  ;;  %vm2748_vm0 = vcmp.gt.bf16.partialorder %v2700_v33, 0  ;;  %v7475_v40 = vcombine.low %v3676_v24, %v3688_v63 }
 0x2d8   :  { %v2890_v22 = vmul.bf16 1069105081, %v2701_v20  ;;  %v2983_v31 = vmul.bf16 1071005654, %v2935_v61  ;;  %vm2749_vm15 = vcmp.gt.bf16.partialorder %v2701_v20, 0 }
 0x2d9   :  { %5433 = vpow.bf16 %v2887_v11  ;;  %3473 = vmatmul.mubr.bf16.gmra.mrb[132].mxu0 %v5203_v44  ;;  %v3030_v16 = vsel %vm2742_vm12, %v7325_v34, %v2982_v3 }
 0x2da   :  { %5435 = vpow.bf16 %v2890_v22  ;;  %v3031_v38 = vsel %vm2743_vm11, %v7335_v26, %v2983_v31  ;;  %3480 = vmatprep.mubr.bf16.mxu0 %v5204_v45 }
 0x2db   :  { %3257 = vmatprep.subr.bf16.mxu1 %v3031_v38 }
 0x2dc   :  { %v5430_v36 = vpop.eup %5429  ;;  %3258 = vmatpush1.bf16.msra.mxu1 %v3030_v16 }
 0x2dd   :  { %v5432_v58 = vpop.eup %5431  ;;  %v2937_v57 = vsub.bf16 %v5430_v36, %v5586_v41 }
 0x2de   :  { %v2938_v21 = vsub.bf16 %v5432_v58, %v5586_v41 }
 0x2df   :  { %v2985_v15 = vmul.bf16 1071005654, %v2937_v57 }
 0x2e0   :  { %v2986_v13 = vmul.bf16 1071005654, %v2938_v21 }
 0x2e1   :  { %3481 = vmatmul.mubr.bf16.gmra.mrb[136].mxu0 %v5206_v51  ;;  %v3033_v34 = vsel %vm2745_vm14, %v7352_v8, %v2985_v15  ;;  %v5227_v8 = vld [vmem:[%s7979_s5 + $0xa0] ss:$8 sps:$4 sm:$0xff]  }
 0x2e2   :  { %v3034_v48 = vsel %vm2746_vm13, %v2698_v54, %v2986_v13  ;;  %3488 = vmatprep.mubr.bf16.mxu0 %v5207_v0  ;;  %v5231_v54 = vld [vmem:[%s7979_s5 + $0xc4] ss:$8 sps:$4 sm:$0xff]  }
 0x2e3   :  { %3259 = vmatprep.subr.bf16.mxu1 %v3034_v48 }
 0x2e4   :  { %v5434_v25 = vpop.eup %5433  ;;  %3260 = vmatpush1.bf16.msra.mxu1 %v3033_v34 }
 0x2e5   :  { %v5436_v4 = vpop.eup %5435  ;;  %v2940_v26 = vsub.bf16 %v5434_v25, %v5586_v41 }
 0x2e6   :  { %v2941_v9 = vsub.bf16 %v5436_v4, %v5586_v41 }
 0x2e7   :  { %v2988_v59 = vmul.bf16 1071005654, %v2940_v26 }
 0x2e8   :  { %v2989_v53 = vmul.bf16 1071005654, %v2941_v9 }
 0x2e9   :  { %3489 = vmatmul.mubr.bf16.gmra.mrb[140].mxu0 %v5209_v49  ;;  %v3036_v19 = vsel %vm2748_vm0, %v2700_v33, %v2988_v59 }
 0x2ea   :  { %v3037_v42 = vsel %vm2749_vm15, %v2701_v20, %v2989_v53  ;;  %3496 = vmatprep.mubr.bf16.mxu0 %v5210_v43  ;;  %v3704_v20 = vpop.permute.xlu1 %3703 }
 0x2eb   :  { %3261 = vmatprep.subr.bf16.mxu1 %v3037_v42  ;;  %v3712_v22 = vrot.slane %v3704_v20, %v6098_v17 }
 0x2ec   :  { %3262 = vmatpush1.bf16.msra.mxu1 %v3036_v19 }
 0x2ee   :  { %v3728_v21 = vpop.permute.xlu1 %3727 }
 0x2ef   :  { %3264 = vmatmul.mubr.bf16.vlgmr.msra.gmra.mrb[100].mxu1 %v7332_v32  ;;  %v5218_v32 = vld [vmem:[%s7979_s5 + $0x70] ss:$8 sps:$4 sm:$0xff]   ;;  %v3736_v34 = vrot.slane %v3728_v21, %v6098_v17 }
 0x2f0   :  { %3273 = vmatprep.mubr.bf16.mxu1 %v7342_v56  ;;  %v5219_v56 = vld [vmem:[%s7979_s5 + $0x84] ss:$8 sps:$4 sm:$0xff]  }
 0x2f1   :  { %3497 = vmatmul.mubr.bf16.gmra.mrb[144].mxu0 %v5212_v23 }
 0x2f2   :  { %3504 = vmatprep.mubr.bf16.mxu0 %v5213_v50  ;;  %v3752_v53 = vpop.permute.xlu1 %3751 }
 0x2f7   :  { %3274 = vmatmul.mubr.bf16.gmra.mrb[104].mxu1 %v7358_v5  ;;  %v5230_v5 = vld [vmem:[%s7979_s5 + $0xb0] ss:$8 sps:$4 sm:$0xff]  }
 0x2f8   :  { %3283 = vmatprep.mubr.bf16.mxu1 %v7366_v29  ;;  %v5236_v29 = vld [vmem:[%s7979_s5 + $0xd0] ss:$8 sps:$4 sm:$0xff]  }
 0x2f9   :  { %3505 = vmatmul.mubr.bf16.gmra.mrb[148].mxu0 %v5215_v37 }
 0x2fa   :  { %3512 = vmatprep.mubr.bf16.mxu0 %v5216_v10 }
 0x2ff   :  { %3284 = vmatmul.mubr.bf16.gmra.mrb[108].mxu1 %v5203_v44 }
 0x300   :  { %3293 = vmatprep.mubr.bf16.mxu1 %v5204_v45  ;;  %v3692_v45 = vpop.permute.xlu0 %3691 }
 0x301   :  { %3513 = vmatmul.mubr.bf16.gmra.mrb[152].mxu0 %v5218_v32  ;;  %v3700_v31 = vrot.slane %v3692_v45, %v6098_v17 }
 0x302   :  { %3520 = vmatprep.mubr.bf16.mxu0 %v5219_v56 }
 0x303   :  { %v7482_v57 = vcombine.low %v3700_v31, %v3712_v22 }
 0x304   :  { %v3716_v13 = vpop.permute.xlu0 %3715 }
 0x305   :  { %v3724_v25 = vrot.slane %v3716_v13, %v6098_v17 }
 0x307   :  { %3294 = vmatmul.mubr.bf16.gmra.mrb[112].mxu1 %v5206_v51 }
 0x308   :  { %3303 = vmatprep.mubr.bf16.mxu1 %v5207_v0 }
 0x309   :  { %3521 = vmatmul.mubr.bf16.gmra.mrb[156].mxu0 %v5221_v27 }
 0x30a   :  { %3528 = vmatprep.mubr.bf16.mxu0 %v5222_v18 }
 0x30f   :  { %3304 = vmatmul.mubr.bf16.gmra.mrb[116].mxu1 %v5209_v49 }
 0x310   :  { %3313 = vmatprep.mubr.bf16.mxu1 %v5210_v43  ;;  %v7489_v43 = vcombine.low %v3724_v25, %v3736_v34 }
 0x311   :  { %3529 = vmatmul.mubr.bf16.gmra.mrb[160].mxu0 %v5224_v60 }
 0x312   :  { %3536 = vmatprep.mubr.bf16.mxu0 %v5225_v62 }
 0x317   :  { %3314 = vmatmul.mubr.bf16.gmra.mrb[120].mxu1 %v5212_v23  ;;  %v3740_v23 = vpop.permute.xlu0 %3739 }
 0x318   :  { %3323 = vmatprep.mubr.bf16.mxu1 %v5213_v50 }
 0x319   :  { %3537 = vmatmul.mubr.bf16.gmra.mrb[164].mxu0 %v5227_v8 }
 0x31a   :  { %3544 = vmatprep.mubr.bf16.mxu0 %v5228_v55 }
 0x31f   :  { %3324 = vmatmul.mubr.bf16.gmra.mrb[124].mxu1 %v5215_v37  ;;  %v3760_v37 = vrot.slane %v3752_v53, %v6098_v17 }
 0x320   :  { %3333 = vmatprep.mubr.bf16.mxu1 %v5216_v10  ;;  %v3748_v10 = vrot.slane %v3740_v23, %v6098_v17 }
 0x321   :  { %3545 = vmatmul.mubr.bf16.gmra.mrb[168].mxu0 %v5230_v5 }
 0x322   :  { %3552 = vmatprep.mubr.bf16.mxu0 %v5231_v54 }
 0x327   :  { %3334 = vmatmul.mubr.bf16.gmra.mrb[128].mxu1 %v5218_v32 }
 0x328   :  { %3343 = vmatprep.mubr.bf16.mxu1 %v5219_v56 }
 0x329   :  { %3553 = vmatmul.mubr.bf16.gmra.mrb[172].mxu0 %v5233_v46 }
 0x32a   :  { %3560 = vmatprep.mubr.bf16.mxu0 %v5234_v52 }
 0x32f   :  { %3344 = vmatmul.mubr.bf16.gmra.mrb[132].mxu1 %v5221_v27 }
 0x330   :  { %3353 = vmatprep.mubr.bf16.mxu1 %v5222_v18 }
 0x331   :  { %3561 = vmatmul.mubr.bf16.gmra.mrb[176].mxu0 %v5236_v29 }
 0x332   :  { %3568 = vmatprep.mubr.bf16.mxu0 %v5237_v30 }
 0x337   :  { %3354 = vmatmul.mubr.bf16.gmra.mrb[136].mxu1 %v5224_v60  ;;  %v7496_v60 = vcombine.low %v3748_v10, %v3760_v37 }
 0x338   :  { %3363 = vmatprep.mubr.bf16.mxu1 %v5225_v62 }
 0x339   :  { %3569 = vmatmul.mubr.bf16.gmra.mrb[180].mxu0 %v5239_v7 }
 0x33a   :  { %3576 = vmatprep.mubr.bf16.mxu0 %v5240_v39 }
 0x33f   :  { %3364 = vmatmul.mubr.bf16.gmra.mrb[140].mxu1 %v5227_v8  ;;  %v3776_v8 = vpop.permute.xlu1 %3775 }
 0x340   :  { %3373 = vmatprep.mubr.bf16.mxu1 %v5228_v55 }
 0x341   :  { %3577 = vmatmul.mubr.bf16.gmra.mrb[184].mxu0 %v5242_v14 }
 0x343   :  { %v3800_v6 = vpop.permute.xlu1 %3799 }
 0x344   :  { %v3808_v45 = vrot.slane %v3800_v6, %v6098_v17 }
 0x347   :  { %3374 = vmatmul.mubr.bf16.gmra.mrb[144].mxu1 %v5230_v5 }
 0x348   :  { %3383 = vmatprep.mubr.bf16.mxu1 %v5231_v54  ;;  %v3764_v54 = vpop.permute.xlu0 %3763 }
 0x34c   :  { %v3788_v24 = vpop.permute.xlu0 %3787 }
 0x34f   :  { %3384 = vmatmul.mubr.bf16.gmra.mrb[148].mxu1 %v5233_v46 }
 0x350   :  { %3393 = vmatprep.mubr.bf16.mxu1 %v5234_v52  ;;  %v3784_v52 = vrot.slane %v3776_v8, %v6098_v17 }
 0x357   :  { %3394 = vmatmul.mubr.bf16.gmra.mrb[152].mxu1 %v5236_v29  ;;  %v3772_v29 = vrot.slane %v3764_v54, %v6098_v17 }
 0x358   :  { %3403 = vmatprep.mubr.bf16.mxu1 %v5237_v30 }
 0x35f   :  { %3404 = vmatmul.mubr.bf16.gmra.mrb[156].mxu1 %v5239_v7 }
 0x360   :  { %3413 = vmatprep.mubr.bf16.mxu1 %v5240_v39 }
 0x367   :  { %3414 = vmatmul.mubr.bf16.gmra.mrb[160].mxu1 %v5242_v14 }
 0x39c   :  { %v4956_v1 = vpop.f32.mrb[124].mxu0 }
 0x39d   :  { %v4957_v12 = vpop.f32.mrb[125].mxu0 }
 0x39e   :  { %v4958_v2 = vadd.f32 %v4957_v12, %v4956_v1  ;;  %v4959_v28 = vpop.f32.mrb[126].mxu0  ;;  %v7503_v1 = vcombine.low %v3772_v29, %v3784_v52 }
 0x39f   :  { %v4960_v35 = vpop.f32.mrb[127].mxu0 }
 0x3a0   :  { %v4961_v33 = vadd.f32 %v4960_v35, %v4959_v28 }
 0x3a2   :  { %v3587_v44 = vpack.c.bf16 %v4961_v33, %v4958_v2 }
 0x3a4   :  { %v7478_v61 = vadd.bf16 %v7475_v40, %v3587_v44  ;;  %v4962_v11 = vpop.f32.mrb[128].mxu0 }
 0x3a5   :  { %v4963_v3 = vpop.f32.mrb[129].mxu0 }
 0x3a6   :  { %v4964_v38 = vadd.f32 %v4963_v3, %v4962_v11  ;;  %v4965_v16 = vpop.f32.mrb[130].mxu0  ;;  %v3796_v3 = vrot.slane %v3788_v24, %v6098_v17 }
 0x3a7   :  { %v4966_v36 = vpop.f32.mrb[131].mxu0 }
 0x3a8   :  { %v4967_v58 = vadd.f32 %v4966_v36, %v4965_v16  ;;  %v7518_v13 = vcombine.low %v3796_v3, %v3808_v45  ;;  %v7547_v45 = vld [vmem:[%s7981_s7] sm:$0xff]  ;;  %s5587_s7 = smov [#allocation5]  }
 0x3a9   :  { %s4633_s28 = sshll.u32 %s5587_s7, 4  ;;  %s4634_s28 = int_to_ptr.vmem [resolvable:$true] %s4633_s28 }
 0x3aa   :  { %v3590_v51 = vpack.c.bf16 %v4967_v58, %v4964_v38  ;;  %s5555_s29 = scalar_lea.vmem %s4634_s28, 384  ;;  %p5560_p9 = scmp.lt.s32.totalorder %s4634_s28, %s4634_s28 }
 0x3ab   :  { %p5556_p8 = scmp.ne.s32.totalorder %s4634_s28, %s5555_s29  ;;  %p5561_p10 = scmp.lt.s32.totalorder %s5555_s29, %s5555_s29 }
 0x3ac   :  { %v7485_v0 = vadd.bf16 %v7482_v57, %v3590_v51  ;;  %v4968_v15 = vpop.f32.mrb[132].mxu0 }
 0x3ad   :  { %v4969_v48 = vpop.f32.mrb[133].mxu0  ;;  %p5562_p11 = por %p5561_p10, %p5560_p9 }
 0x3ae   :  { %v4970_v4 = vadd.f32 %v4969_v48, %v4968_v15  ;;  %v4971_v26 = vpop.f32.mrb[134].mxu0  ;;  %v3824_v48 = vpop.permute.xlu1 %3823 }
 0x3af   :  { %v4972_v49 = vpop.f32.mrb[135].mxu0  ;;  %v3832_v23 = vrot.slane %v3824_v48, %v6098_v17  ;;  %p5563_p12 = pnand %p5562_p11, %p5556_p8 }
 0x3b0   :  { %v4973_v9 = vadd.f32 %v4972_v49, %v4971_v26 }
 0x3b2   :  { %v3593_v59 = vpack.c.bf16 %v4973_v9, %v4970_v4  ;;  %v3812_v4 = vpop.permute.xlu0 %3811 }
 0x3b4   :  { %v7492_v42 = vadd.bf16 %v7489_v43, %v3593_v59  ;;  %v4974_v19 = vpop.f32.mrb[136].mxu0 }
 0x3b5   :  { %v4975_v50 = vpop.f32.mrb[137].mxu0 }
 0x3b6   :  { %v4976_v32 = vadd.f32 %v4975_v50, %v4974_v19  ;;  %v4977_v56 = vpop.f32.mrb[138].mxu0  ;;  %v3820_v50 = vrot.slane %v3812_v4, %v6098_v17 }
 0x3b7   :  { %v4978_v27 = vpop.f32.mrb[139].mxu0 }
 0x3b8   :  { %v4979_v18 = vadd.f32 %v4978_v27, %v4977_v56  ;;  %v7533_v54 = vcombine.low %v3820_v50, %v3832_v23 }
 0x3ba   :  { %v3596_v62 = vpack.c.bf16 %v4979_v18, %v4976_v32 }
 0x3bc   :  { %v7499_v55 = vadd.bf16 %v7496_v60, %v3596_v62  ;;  %v4980_v5 = vpop.f32.mrb[140].mxu0 }
 0x3bd   :  { %v4981_v46 = vpop.f32.mrb[141].mxu0 }
 0x3be   :  { %v4982_v30 = vadd.f32 %v4981_v46, %v4980_v5  ;;  %v4983_v7 = vpop.f32.mrb[142].mxu0  ;;  %v3848_v46 = vpop.permute.xlu1 %3847 }
 0x3bf   :  { %v4984_v39 = vpop.f32.mrb[143].mxu0 }
 0x3c0   :  { %v4985_v14 = vadd.f32 %v4984_v39, %v4983_v7 }
 0x3c2   :  { %v3265_v47 = vpop.f32.mrb[100].mxu1  ;;  %v3599_v12 = vpack.c.bf16 %v4985_v14, %v4982_v30  ;;  %v3836_v30 = vpop.permute.xlu0 %3835 }
 0x3c3   :  { %v3267_v63 = vpop.f32.mrb[101].mxu1 }
 0x3c4   :  { %v3269_v2 = vpop.f32.mrb[102].mxu1  ;;  %v7506_v28 = vadd.bf16 %v7503_v1, %v3599_v12  ;;  %v4986_v35 = vpop.f32.mrb[144].mxu0  ;;  %v3856_v12 = vrot.slane %v3848_v46, %v6098_v17 }
 0x3c5   :  { %v3585_v33 = vpack.c.bf16 %v3269_v2, %v3265_v47  ;;  %v3271_v44 = vpop.f32.mrb[103].mxu1  ;;  %v4987_v20 = vpop.f32.mrb[145].mxu0 }
 0x3c6   :  { %v3586_v11 = vpack.c.bf16 %v3271_v44, %v3267_v63  ;;  %v4988_v22 = vadd.f32 %v4987_v20, %v4986_v35  ;;  %v4989_v31 = vpop.f32.mrb[146].mxu0  ;;  %v3844_v35 = vrot.slane %v3836_v30, %v6098_v17 }
 0x3c7   :  { %v7511_v38 = vadd.bf16 %v7475_v40, %v3585_v33  ;;  %v4990_v16 = vpop.f32.mrb[147].mxu0 }
 0x3c8   :  { %v7514_v36 = vadd.bf16 %v7475_v40, %v3586_v11  ;;  %v4991_v58 = vadd.f32 %v4990_v16, %v4989_v31  ;;  %v7555_v16 = vcombine.high %v7547_v45, %v7547_v45 }
 0x3c9   :  { %v4242_v51 = vmul.bf16 1069105081, %v7511_v38  ;;  %vm4193_vm2 = vcmp.gt.bf16.partialorder %v7511_v38, 0 }
 0x3ca   :  { %v4245_v21 = vmul.bf16 1069105081, %v7514_v36  ;;  %v3275_v15 = vpop.f32.mrb[104].mxu1  ;;  %v3602_v34 = vpack.c.bf16 %v4991_v58, %v4988_v22  ;;  %4575 = vmatprep.mubr.bf16.mxu1 %v7555_v16  ;;  %vm4194_vm1 = vcmp.gt.bf16.partialorder %v7514_v36, 0 }
 0x3cb   :  { %5437 = vpow.bf16 %v4242_v51  ;;  %v3277_v25 = vpop.f32.mrb[105].mxu1 }
 0x3cc   :  { %5439 = vpow.bf16 %v4245_v21  ;;  %v3279_v26 = vpop.f32.mrb[106].mxu1  ;;  %v7521_v49 = vadd.bf16 %v7518_v13, %v3602_v34  ;;  %v4992_v40 = vpop.f32.mrb[148].mxu0 }
 0x3cd   :  { %v3588_v9 = vpack.c.bf16 %v3279_v26, %v3275_v15  ;;  %v3281_v59 = vpop.f32.mrb[107].mxu1  ;;  %v4993_v53 = vpop.f32.mrb[149].mxu0 }
 0x3ce   :  { %v3589_v19 = vpack.c.bf16 %v3281_v59, %v3277_v25  ;;  %v4994_v37 = vadd.f32 %v4993_v53, %v4992_v40  ;;  %v4995_v10 = vpop.f32.mrb[150].mxu0  ;;  %v7560_v25 = vcombine.low %v3844_v35, %v3856_v12 }
 0x3cf   :  { %v7526_v32 = vadd.bf16 %v7482_v57, %v3588_v9  ;;  %v4996_v56 = vpop.f32.mrb[151].mxu0 }
 0x3d0   :  { %v7529_v27 = vadd.bf16 %v7482_v57, %v3589_v19  ;;  %v4997_v18 = vadd.f32 %v4996_v56, %v4995_v10 }
 0x3d1   :  { %v4251_v62 = vmul.bf16 1069105081, %v7526_v32  ;;  %vm4196_vm4 = vcmp.gt.bf16.partialorder %v7526_v32, 0 }
 0x3d2   :  { %v4254_v8 = vmul.bf16 1069105081, %v7529_v27  ;;  %v3285_v5 = vpop.f32.mrb[108].mxu1  ;;  %v3605_v52 = vpack.c.bf16 %v4997_v18, %v4994_v37  ;;  %vm4197_vm3 = vcmp.gt.bf16.partialorder %v7529_v27, 0 }
 0x3d3   :  { %5441 = vpow.bf16 %v4251_v62  ;;  %v3287_v29 = vpop.f32.mrb[109].mxu1 }
 0x3d4   :  { %5443 = vpow.bf16 %v4254_v8  ;;  %v3289_v7 = vpop.f32.mrb[110].mxu1  ;;  %v7536_v39 = vadd.bf16 %v7533_v54, %v3605_v52  ;;  %v4998_v57 = vpop.f32.mrb[152].mxu0 }
 0x3d5   :  { %v3591_v14 = vpack.c.bf16 %v3289_v7, %v3285_v5  ;;  %v3291_v47 = vpop.f32.mrb[111].mxu1  ;;  %v4999_v63 = vpop.f32.mrb[153].mxu0 }
 0x3d6   :  { %v5438_v6 = vpop.eup %5437  ;;  %v3592_v24 = vpack.c.bf16 %v3291_v47, %v3287_v29  ;;  %v5000_v33 = vadd.f32 %v4999_v63, %v4998_v57  ;;  %v5001_v44 = vpop.f32.mrb[154].mxu0 }
 0x3d7   :  { %v5440_v2 = vpop.eup %5439  ;;  %v7541_v20 = vadd.bf16 %v7489_v43, %v3591_v14  ;;  %v4385_v11 = vsub.bf16 %v5438_v6, %v5586_v41  ;;  %v5002_v3 = vpop.f32.mrb[155].mxu0 }
 0x3d8   :  { %v7550_v22 = vadd.bf16 %v7489_v43, %v3592_v24  ;;  %v4386_v31 = vsub.bf16 %v5440_v2, %v5586_v41  ;;  %v5003_v58 = vadd.f32 %v5002_v3, %v5001_v44 }
 0x3d9   :  { %v4260_v51 = vmul.bf16 1069105081, %v7541_v20  ;;  %v4433_v21 = vmul.bf16 1071005654, %v4385_v11  ;;  %vm4199_vm6 = vcmp.gt.bf16.partialorder %v7541_v20, 0 }
 0x3da   :  { %v4263_v15 = vmul.bf16 1069105081, %v7550_v22  ;;  %v3295_v48 = vpop.f32.mrb[112].mxu1  ;;  %v4434_v34 = vmul.bf16 1071005654, %v4386_v31  ;;  %v3608_v43 = vpack.c.bf16 %v5003_v58, %v5000_v33  ;;  %vm4200_vm5 = vcmp.gt.bf16.partialorder %v7550_v22, 0 }
 0x3db   :  { %5445 = vpow.bf16 %v4260_v51  ;;  %v3297_v4 = vpop.f32.mrb[113].mxu1  ;;  %v4481_v23 = vsel %vm4193_vm2, %v7511_v38, %v4433_v21 }
 0x3dc   :  { %5447 = vpow.bf16 %v4263_v15  ;;  %v3299_v26 = vpop.f32.mrb[114].mxu1  ;;  %v4482_v40 = vsel %vm4194_vm1, %v7514_v36, %v4434_v34  ;;  %v7566_v9 = vadd.bf16 %v7560_v25, %v3608_v43  ;;  %v5004_v59 = vpop.f32.mrb[156].mxu0 }
 0x3dd   :  { %v3594_v53 = vpack.c.bf16 %v3299_v26, %v3295_v48  ;;  %v3301_v19 = vpop.f32.mrb[115].mxu1  ;;  %4543 = vmatprep.subr.bf16.mxu1 %v4482_v40  ;;  %v5005_v37 = vpop.f32.mrb[157].mxu0 }
 0x3de   :  { %v5442_v50 = vpop.eup %5441  ;;  %v3595_v10 = vpack.c.bf16 %v3301_v19, %v3297_v4  ;;  %4544 = vmatpush1.bf16.msra.mxu1 %v4481_v23  ;;  %v7569_v18 = vadd.f32 %v5005_v37, %v5004_v59  ;;  %v5007_v62 = vpop.f32.mrb[158].mxu0 }
 0x3df   :  { %v5444_v56 = vpop.eup %5443  ;;  %v7572_v36 = vadd.bf16 %v7496_v60, %v3594_v53  ;;  %v4388_v8 = vsub.bf16 %v5442_v50, %v5586_v41  ;;  %v5008_v5 = vpop.f32.mrb[159].mxu0 }
 0x3e0   :  { %v7576_v46 = vadd.bf16 %v7496_v60, %v3595_v10  ;;  %v4389_v52 = vsub.bf16 %v5444_v56, %v5586_v41  ;;  %v7579_v38 = vadd.f32 %v5008_v5, %v5007_v62 }
 0x3e1   :  { %v4269_v29 = vmul.bf16 1069105081, %v7572_v36  ;;  %v4436_v30 = vmul.bf16 1071005654, %v4388_v8  ;;  %vm4202_vm8 = vcmp.gt.bf16.partialorder %v7572_v36, 0 }
 0x3e2   :  { %v4272_v7 = vmul.bf16 1069105081, %v7576_v46  ;;  %v3305_v57 = vpop.f32.mrb[116].mxu1  ;;  %v4437_v14 = vmul.bf16 1071005654, %v4389_v52  ;;  %v3611_v47 = vpack.c.bf16 %v7579_v38, %v7569_v18  ;;  %vm4203_vm7 = vcmp.gt.bf16.partialorder %v7576_v46, 0 }
 0x3e3   :  { %5449 = vpow.bf16 %v4269_v29  ;;  %v3307_v6 = vpop.f32.mrb[117].mxu1  ;;  %v4484_v35 = vsel %vm4196_vm4, %v7526_v32, %v4436_v30 }
 0x3e4   :  { %5451 = vpow.bf16 %v4272_v7  ;;  %v3309_v60 = vpop.f32.mrb[118].mxu1  ;;  %v4485_v12 = vsel %vm4197_vm3, %v7529_v27, %v4437_v14  ;;  %v5010_v63 = vpop.f32.mrb[160].mxu0 }
 0x3e5   :  { %v3597_v24 = vpack.c.bf16 %v3309_v60, %v3305_v57  ;;  %v3311_v2 = vpop.f32.mrb[119].mxu1  ;;  %4545 = vmatprep.subr.bf16.mxu1 %v4485_v12  ;;  %v5011_v44 = vpop.f32.mrb[161].mxu0 }
 0x3e6   :  { %v5446_v33 = vpop.eup %5445  ;;  %v3598_v11 = vpack.c.bf16 %v3311_v2, %v3307_v6  ;;  %4546 = vmatpush1.bf16.msra.mxu1 %v4484_v35  ;;  %v7589_v31 = vadd.f32 %v5011_v44, %v5010_v63  ;;  %v5013_v58 = vpop.f32.mrb[162].mxu0 }
 0x3e7   :  { %v5448_v3 = vpop.eup %5447  ;;  %v7592_v51 = vadd.bf16 %v7503_v1, %v3597_v24  ;;  %v4391_v27 = vsub.bf16 %v5446_v33, %v5586_v41  ;;  %v5014_v21 = vpop.f32.mrb[163].mxu0 }
 0x3e8   :  { %v7596_v15 = vadd.bf16 %v7503_v1, %v3598_v11  ;;  %v4392_v48 = vsub.bf16 %v5448_v3, %v5586_v41  ;;  %v7599_v32 = vadd.f32 %v5014_v21, %v5013_v58 }
 0x3e9   :  { %v4278_v34 = vmul.bf16 1069105081, %v7592_v51  ;;  %v4439_v43 = vmul.bf16 1071005654, %v4391_v27  ;;  %vm4205_vm10 = vcmp.gt.bf16.partialorder %v7592_v51, 0 }
 0x3ea   :  { %v4281_v4 = vmul.bf16 1069105081, %v7596_v15  ;;  %v3315_v26 = vpop.f32.mrb[120].mxu1  ;;  %v4440_v40 = vmul.bf16 1071005654, %v4392_v48  ;;  %v3614_v59 = vpack.c.bf16 %v7599_v32, %v7589_v31  ;;  %vm4206_vm9 = vcmp.gt.bf16.partialorder %v7596_v15, 0 }
 0x3eb   :  { %5453 = vpow.bf16 %v4278_v34  ;;  %v3317_v53 = vpop.f32.mrb[121].mxu1  ;;  %v4487_v10 = vsel %vm4199_vm6, %v7541_v20, %v4439_v43  ;;  %v4248_v32 = vmul.bf16 1069105081, %v7478_v61 }
 0x3ec   :  { %5455 = vpow.bf16 %v4281_v4  ;;  %v3319_v1 = vpop.f32.mrb[122].mxu1  ;;  %v4488_v19 = vsel %vm4200_vm5, %v7550_v22, %v4440_v40  ;;  %v5016_v23 = vpop.f32.mrb[164].mxu0 }
 0x3ed   :  { %v3600_v50 = vpack.c.bf16 %v3319_v1, %v3315_v26  ;;  %v3321_v37 = vpop.f32.mrb[123].mxu1  ;;  %4547 = vmatprep.subr.bf16.mxu1 %v4488_v19  ;;  %v5017_v62 = vpop.f32.mrb[165].mxu0 }
 0x3ee   :  { %v5450_v56 = vpop.eup %5449  ;;  %v3601_v8 = vpack.c.bf16 %v3321_v37, %v3317_v53  ;;  %4548 = vmatpush1.bf16.msra.mxu1 %v4487_v10  ;;  %v7609_v52 = vadd.f32 %v5017_v62, %v5016_v23  ;;  %v5019_v29 = vpop.f32.mrb[166].mxu0 }
 0x3ef   :  { %v5452_v5 = vpop.eup %5451  ;;  %v7612_v30 = vadd.bf16 %v7518_v13, %v3600_v50  ;;  %v4394_v22 = vsub.bf16 %v5450_v56, %v5586_v41  ;;  %v5020_v7 = vpop.f32.mrb[167].mxu0 }
 0x3f0   :  { %v7616_v57 = vadd.bf16 %v7518_v13, %v3601_v8  ;;  %v4395_v14 = vsub.bf16 %v5452_v5, %v5586_v41  ;;  %v7619_v20 = vadd.f32 %v5020_v7, %v5019_v29 }
 0x3f1   :  { %v4287_v6 = vmul.bf16 1069105081, %v7612_v30  ;;  %v4442_v60 = vmul.bf16 1071005654, %v4394_v22  ;;  %vm4208_vm12 = vcmp.gt.bf16.partialorder %v7612_v30, 0 }
 0x3f2   :  { %v4290_v12 = vmul.bf16 1069105081, %v7616_v57  ;;  %v3325_v63 = vpop.f32.mrb[124].mxu1  ;;  %v4443_v24 = vmul.bf16 1071005654, %v4395_v14  ;;  %v3617_v2 = vpack.c.bf16 %v7619_v20, %v7609_v52  ;;  %vm4209_vm11 = vcmp.gt.bf16.partialorder %v7616_v57, 0 }
 0x3f3   :  { %5457 = vpow.bf16 %v4287_v6  ;;  %v3327_v35 = vpop.f32.mrb[125].mxu1  ;;  %v4490_v58 = vsel %vm4202_vm8, %v7572_v36, %v4442_v60  ;;  %v3860_v60 = vpop.permute.xlu0 %3859 }
 0x3f4   :  { %5459 = vpow.bf16 %v4290_v12  ;;  %v3329_v13 = vpop.f32.mrb[126].mxu1  ;;  %v4491_v33 = vsel %vm4203_vm7, %v7576_v46, %v4443_v24  ;;  %v5022_v44 = vpop.f32.mrb[168].mxu0 }
 0x3f5   :  { %v3603_v11 = vpack.c.bf16 %v3329_v13, %v3325_v63  ;;  %v3331_v3 = vpop.f32.mrb[127].mxu1  ;;  %4549 = vmatprep.subr.bf16.mxu1 %v4491_v33  ;;  %v5023_v21 = vpop.f32.mrb[169].mxu0 }
 0x3f6   :  { %v5454_v27 = vpop.eup %5453  ;;  %v3604_v48 = vpack.c.bf16 %v3331_v3, %v3327_v35  ;;  %4550 = vmatpush1.bf16.msra.mxu1 %v4490_v58  ;;  %v7629_v43 = vadd.f32 %v5023_v21, %v5022_v44  ;;  %v5025_v4 = vpop.f32.mrb[170].mxu0  ;;  %v3868_v58 = vrot.slane %v3860_v60, %v6098_v17 }
 0x3f7   :  { %v5456_v34 = vpop.eup %5455  ;;  %v7632_v26 = vadd.bf16 %v7533_v54, %v3603_v11  ;;  %v4397_v46 = vsub.bf16 %v5454_v27, %v5586_v41  ;;  %v5026_v40 = vpop.f32.mrb[171].mxu0 }
 0x3f8   :  { %v7636_v53 = vadd.bf16 %v7533_v54, %v3604_v48  ;;  %v4398_v1 = vsub.bf16 %v5456_v34, %v5586_v41  ;;  %v7639_v36 = vadd.f32 %v5026_v40, %v5025_v4  ;;  %v3872_v54 = vpop.permute.xlu1 %3871 }
 0x3f9   :  { %v4296_v19 = vmul.bf16 1069105081, %v7632_v26  ;;  %v4445_v23 = vmul.bf16 1071005654, %v4397_v46  ;;  %v3880_v44 = vrot.slane %v3872_v54, %v6098_v17  ;;  %vm4211_vm14 = vcmp.gt.bf16.partialorder %v7632_v26, 0 }
 0x3fa   :  { %v4299_v50 = vmul.bf16 1069105081, %v7636_v53  ;;  %v3335_v37 = vpop.f32.mrb[128].mxu1  ;;  %v4446_v10 = vmul.bf16 1071005654, %v4398_v1  ;;  %v3620_v56 = vpack.c.bf16 %v7639_v36, %v7629_v43  ;;  %vm4212_vm13 = vcmp.gt.bf16.partialorder %v7636_v53, 0 }
 0x3fb   :  { %5461 = vpow.bf16 %v4296_v19  ;;  %v3337_v62 = vpop.f32.mrb[129].mxu1  ;;  %v4493_v14 = vsel %vm4205_vm10, %v7592_v51, %v4445_v23 }
 0x3fc   :  { %5463 = vpow.bf16 %v4299_v50  ;;  %v3339_v8 = vpop.f32.mrb[130].mxu1  ;;  %v4494_v5 = vsel %vm4206_vm9, %v7596_v15, %v4446_v10  ;;  %v5028_v29 = vpop.f32.mrb[172].mxu0  ;;  %v7670_v50 = vcombine.low %v3868_v58, %v3880_v44 }
 0x3fd   :  { %v3606_v22 = vpack.c.bf16 %v3339_v8, %v3335_v37  ;;  %v3341_v7 = vpop.f32.mrb[131].mxu1  ;;  %4551 = vmatprep.subr.bf16.mxu1 %v4494_v5  ;;  %v5029_v12 = vpop.f32.mrb[173].mxu0 }
 0x3fe   :  { %v5458_v6 = vpop.eup %5457  ;;  %v3607_v63 = vpack.c.bf16 %v3341_v7, %v3337_v62  ;;  %4552 = vmatpush1.bf16.msra.mxu1 %v4493_v14  ;;  %v7649_v35 = vadd.f32 %v5029_v12, %v5028_v29  ;;  %v5031_v13 = vpop.f32.mrb[174].mxu0 }
 0x3ff   :  { %v5460_v24 = vpop.eup %5459  ;;  %v7652_v33 = vadd.bf16 %v7560_v25, %v3606_v22  ;;  %v4400_v15 = vsub.bf16 %v5458_v6, %v5586_v41  ;;  %v5032_v11 = vpop.f32.mrb[175].mxu0 }
 0x400   :  { %v7657_v3 = vadd.bf16 %v7560_v25, %v3607_v63  ;;  %v4401_v51 = vsub.bf16 %v5460_v24, %v5586_v41  ;;  %v7661_v27 = vadd.f32 %v5032_v11, %v5031_v13  ;;  %v3896_v25 = vpop.permute.xlu1 %3895  ;;  %v3884_v5 = vpop.permute.xlu0 %3883 }
 0x401   :  { %v4305_v21 = vmul.bf16 1069105081, %v7652_v33  ;;  %v4448_v48 = vmul.bf16 1071005654, %v4400_v15  ;;  %v3904_v12 = vrot.slane %v3896_v25, %v6098_v17  ;;  %v3892_v13 = vrot.slane %v3884_v5, %v6098_v17 }
 0x402   :  { %v4308_v34 = vmul.bf16 1069105081, %v7657_v3  ;;  %v3345_v4 = vpop.f32.mrb[132].mxu1  ;;  %v4449_v46 = vmul.bf16 1071005654, %v4401_v51  ;;  %v3623_v40 = vpack.c.bf16 %v7661_v27, %v7649_v35  ;;  %vm4215_vm15 = vcmp.gt.bf16.partialorder %v7657_v3, 0 }
 0x403   :  { %5465 = vpow.bf16 %v4305_v21  ;;  %v3347_v1 = vpop.f32.mrb[133].mxu1  ;;  %v4496_v54 = vsel %vm4208_vm12, %v7612_v30, %v4448_v48  ;;  %v7694_v25 = vcombine.low %v3892_v13, %v3904_v12  ;;  %vm4214_vm0 = vcmp.gt.bf16.partialorder %v7652_v33, 0 }
 0x404   :  { %5467 = vpow.bf16 %v4308_v34  ;;  %v3349_v19 = vpop.f32.mrb[134].mxu1  ;;  %v4497_v23 = vsel %vm4209_vm11, %v7616_v57, %v4449_v46  ;;  %v5034_v37 = vpop.f32.mrb[176].mxu0 }
 0x405   :  { %v3609_v10 = vpack.c.bf16 %v3349_v19, %v3345_v4  ;;  %v3351_v62 = vpop.f32.mrb[135].mxu1  ;;  %4553 = vmatprep.subr.bf16.mxu1 %v4497_v23  ;;  %v5035_v29 = vpop.f32.mrb[177].mxu0  ;;  %v7820_v18 = vadd.bf16 %v7694_v25, %v3614_v59 }
 0x406   :  { %v5462_v8 = vpop.eup %5461  ;;  %v3610_v22 = vpack.c.bf16 %v3351_v62, %v3347_v1  ;;  %4554 = vmatpush1.bf16.msra.mxu1 %v4496_v54  ;;  %v7673_v14 = vadd.f32 %v5035_v29, %v5034_v37  ;;  %v5037_v6 = vpop.f32.mrb[178].mxu0 }
 0x407   :  { %v5464_v7 = vpop.eup %5463  ;;  %v7676_v57 = vadd.bf16 %v7670_v50, %v3609_v10  ;;  %v4403_v60 = vsub.bf16 %v5462_v8, %v5586_v41  ;;  %v5038_v63 = vpop.f32.mrb[179].mxu0 }
 0x408   :  { %v7681_v24 = vadd.bf16 %v7670_v50, %v3610_v22  ;;  %v4404_v30 = vsub.bf16 %v5464_v7, %v5586_v41  ;;  %v7685_v15 = vadd.f32 %v5038_v63, %v5037_v6  ;;  %v3920_v4 = vpop.permute.xlu1 %3919  ;;  %v3908_v54 = vpop.permute.xlu0 %3907 }
 0x409   :  { %v4314_v44 = vmul.bf16 1069105081, %v7676_v57  ;;  %v4451_v11 = vmul.bf16 1071005654, %v4403_v60  ;;  %v3928_v60 = vrot.slane %v3920_v4, %v6098_v17  ;;  %vm4217_vm2 = vcmp.gt.bf16.partialorder %v7676_v57, 0 }
 0x40a   :  { %v4317_v51 = vmul.bf16 1069105081, %v7681_v24  ;;  %v3355_v58 = vpop.f32.mrb[136].mxu1  ;;  %v4452_v21 = vmul.bf16 1071005654, %v4404_v30  ;;  %v3626_v48 = vpack.c.bf16 %v7685_v15, %v7673_v14  ;;  %v3916_v30 = vrot.slane %v3908_v54, %v6098_v17 }
 0x40b   :  { %5469 = vpow.bf16 %v4314_v44  ;;  %v3357_v34 = vpop.f32.mrb[137].mxu1  ;;  %v4499_v10 = vsel %vm4211_vm14, %v7632_v26, %v4451_v11  ;;  %vm4218_vm1 = vcmp.gt.bf16.partialorder %v7681_v24, 0  ;;  %v4284_v14 = vmul.bf16 1069105081, %v7506_v28 }
 0x40c   :  { %5471 = vpow.bf16 %v4317_v51  ;;  %v3359_v46 = vpop.f32.mrb[138].mxu1  ;;  %v4500_v1 = vsel %vm4212_vm13, %v7636_v53, %v4452_v21  ;;  %v5040_v19 = vpop.f32.mrb[180].mxu0 }
 0x40d   :  { %v3612_v23 = vpack.c.bf16 %v3359_v46, %v3355_v58  ;;  %v3361_v37 = vpop.f32.mrb[139].mxu1  ;;  %4555 = vmatprep.subr.bf16.mxu1 %v4500_v1  ;;  %v5041_v8 = vpop.f32.mrb[181].mxu0 }
 0x40e   :  { %v5466_v62 = vpop.eup %5465  ;;  %v3613_v5 = vpack.c.bf16 %v3361_v37, %v3357_v34  ;;  %4556 = vmatpush1.bf16.msra.mxu1 %v4499_v10  ;;  %v7697_v22 = vadd.f32 %v5041_v8, %v5040_v19  ;;  %v5043_v7 = vpop.f32.mrb[182].mxu0 }
 0x40f   :  { %v5468_v29 = vpop.eup %5467  ;;  %v7700_v53 = vadd.bf16 %v7694_v25, %v3612_v23  ;;  %v4406_v6 = vsub.bf16 %v5466_v62, %v5586_v41  ;;  %v5044_v12 = vpop.f32.mrb[183].mxu0  ;;  %v7718_v23 = vcombine.low %v3916_v30, %v3928_v60 }
 0x410   :  { %v7705_v63 = vadd.bf16 %v7694_v25, %v3613_v5  ;;  %v4407_v26 = vsub.bf16 %v5468_v29, %v5586_v41  ;;  %v7709_v13 = vadd.f32 %v5044_v12, %v5043_v7  ;;  %v3944_v46 = vpop.permute.xlu1 %3943  ;;  %v3932_v5 = vpop.permute.xlu0 %3931 }
 0x411   :  { %v4323_v44 = vmul.bf16 1069105081, %v7700_v53  ;;  %v4454_v11 = vmul.bf16 1071005654, %v4406_v6  ;;  %v3952_v30 = vrot.slane %v3944_v46, %v6098_v17  ;;  %vm4220_vm4 = vcmp.gt.bf16.partialorder %v7700_v53, 0 }
 0x412   :  { %v4326_v51 = vmul.bf16 1069105081, %v7705_v63  ;;  %v3365_v58 = vpop.f32.mrb[140].mxu1  ;;  %v4455_v21 = vmul.bf16 1071005654, %v4407_v26  ;;  %vm4221_vm3 = vcmp.gt.bf16.partialorder %v7705_v63, 0 }
 0x413   :  { %5473 = vpow.bf16 %v4323_v44  ;;  %v3367_v4 = vpop.f32.mrb[141].mxu1  ;;  %v4502_v54 = vsel %vm4214_vm0, %v7652_v33, %v4454_v11  ;;  %v3940_v11 = vrot.slane %v3932_v5, %v6098_v17 }
 0x414   :  { %5475 = vpow.bf16 %v4326_v51  ;;  %v3369_v1 = vpop.f32.mrb[142].mxu1  ;;  %v4503_v19 = vsel %vm4215_vm15, %v7657_v3, %v4455_v21  ;;  %v5046_v37 = vpop.f32.mrb[184].mxu0 }
 0x415   :  { %v3615_v10 = vpack.c.bf16 %v3369_v1, %v3365_v58  ;;  %v3371_v62 = vpop.f32.mrb[143].mxu1  ;;  %4557 = vmatprep.subr.bf16.mxu1 %v4503_v19  ;;  %v5047_v29 = vpop.f32.mrb[185].mxu0 }
 0x416   :  { %v5470_v8 = vpop.eup %5469  ;;  %v3616_v7 = vpack.c.bf16 %v3371_v62, %v3367_v4  ;;  %4558 = vmatpush1.bf16.msra.mxu1 %v4502_v54  ;;  %v7721_v12 = vadd.f32 %v5047_v29, %v5046_v37  ;;  %v5049_v26 = vpop.f32.mrb[186].mxu0 }
 0x417   :  { %v5472_v6 = vpop.eup %5471  ;;  %v7724_v3 = vadd.bf16 %v7718_v23, %v3615_v10  ;;  %v4409_v60 = vsub.bf16 %v5470_v8, %v5586_v41  ;;  %v5050_v44 = vpop.f32.mrb[187].mxu0  ;;  %v7742_v8 = vcombine.low %v3940_v11, %v3952_v30 }
 0x418   :  { %v7729_v51 = vadd.bf16 %v7718_v23, %v3616_v7  ;;  %v4410_v33 = vsub.bf16 %v5472_v6, %v5586_v41  ;;  %v7733_v58 = vadd.f32 %v5050_v44, %v5049_v26  ;;  %v3968_v26 = vpop.permute.xlu1 %3967 }
 0x419   :  { %v4332_v21 = vmul.bf16 1069105081, %v7724_v3  ;;  %v4457_v4 = vmul.bf16 1071005654, %v4409_v60  ;;  %v3956_v60 = vpop.permute.xlu0 %3955  ;;  %v3976_v11 = vrot.slane %v3968_v26, %v6098_v17  ;;  %vm4223_vm6 = vcmp.gt.bf16.partialorder %v7724_v3, 0 }
 0x41a   :  { %v4335_v1 = vmul.bf16 1069105081, %v7729_v51  ;;  %v3375_v19 = vpop.f32.mrb[144].mxu1  ;;  %v4458_v37 = vmul.bf16 1071005654, %v4410_v33  ;;  %vm4224_vm5 = vcmp.gt.bf16.partialorder %v7729_v51, 0 }
 0x41b   :  { %5477 = vpow.bf16 %v4332_v21  ;;  %v3377_v10 = vpop.f32.mrb[145].mxu1  ;;  %v4505_v7 = vsel %vm4217_vm2, %v7676_v57, %v4457_v4  ;;  %v3964_v57 = vrot.slane %v3956_v60, %v6098_v17  ;;  %vm4195_vm2 = vcmp.gt.bf16.partialorder %v7478_v61, 0 }
 0x41c   :  { %5479 = vpow.bf16 %v4335_v1  ;;  %v3379_v62 = vpop.f32.mrb[146].mxu1  ;;  %v4506_v54 = vsel %vm4218_vm1, %v7681_v24, %v4458_v37 }
 0x41d   :  { %v3618_v5 = vpack.c.bf16 %v3379_v62, %v3375_v19  ;;  %v3381_v29 = vpop.f32.mrb[147].mxu1  ;;  %4559 = vmatprep.subr.bf16.mxu1 %v4506_v54 }
 0x41e   :  { %v5474_v6 = vpop.eup %5473  ;;  %v3619_v44 = vpack.c.bf16 %v3381_v29, %v3377_v10  ;;  %4560 = vmatpush1.bf16.msra.mxu1 %v4505_v7  ;;  %v7760_v7 = vcombine.low %v3964_v57, %v3976_v11 }
 0x41f   :  { %v5476_v33 = vpop.eup %5475  ;;  %v7746_v21 = vadd.bf16 %v7742_v8, %v3618_v5  ;;  %v4412_v24 = vsub.bf16 %v5474_v6, %v5586_v41 }
 0x420   :  { %v7750_v1 = vadd.bf16 %v7742_v8, %v3619_v44  ;;  %v4413_v30 = vsub.bf16 %v5476_v33, %v5586_v41  ;;  %v3992_v33 = vpop.permute.xlu1 %3991  ;;  %v7867_v36 = vadd.bf16 %v7760_v7, %v3623_v40 }
 0x421   :  { %v4341_v4 = vmul.bf16 1069105081, %v7746_v21  ;;  %v4460_v19 = vmul.bf16 1071005654, %v4412_v24  ;;  %v3980_v24 = vpop.permute.xlu0 %3979  ;;  %v4000_v57 = vrot.slane %v3992_v33, %v6098_v17  ;;  %vm4226_vm8 = vcmp.gt.bf16.partialorder %v7746_v21, 0 }
 0x422   :  { %v4344_v37 = vmul.bf16 1069105081, %v7750_v1  ;;  %v3385_v10 = vpop.f32.mrb[148].mxu1  ;;  %v4461_v62 = vmul.bf16 1071005654, %v4413_v30  ;;  %vm4227_vm7 = vcmp.gt.bf16.partialorder %v7750_v1, 0 }
 0x423   :  { %5481 = vpow.bf16 %v4341_v4  ;;  %v3387_v54 = vpop.f32.mrb[149].mxu1  ;;  %v4508_v60 = vsel %vm4220_vm4, %v7700_v53, %v4460_v19  ;;  %v3988_v53 = vrot.slane %v3980_v24, %v6098_v17  ;;  %v4356_v27 = vmul.bf16 1069105081, %v7867_v36 }
 0x424   :  { %5483 = vpow.bf16 %v4344_v37  ;;  %v3389_v5 = vpop.f32.mrb[150].mxu1  ;;  %v4509_v29 = vsel %vm4221_vm3, %v7705_v63, %v4461_v62  ;;  %vm4222_vm3 = vcmp.gt.bf16.partialorder %v7820_v18, 0  ;;  %vm4198_vm4 = vcmp.gt.bf16.partialorder %v7485_v0, 0 }
 0x425   :  { %v3621_v6 = vpack.c.bf16 %v3389_v5, %v3385_v10  ;;  %v3391_v26 = vpop.f32.mrb[151].mxu1  ;;  %4561 = vmatprep.subr.bf16.mxu1 %v4509_v29 }
 0x426   :  { %v5478_v44 = vpop.eup %5477  ;;  %v3622_v30 = vpack.c.bf16 %v3391_v26, %v3387_v54  ;;  %4562 = vmatpush1.bf16.msra.mxu1 %v4508_v60 }
 0x427   :  { %v5480_v4 = vpop.eup %5479  ;;  %v7764_v37 = vadd.bf16 %v7760_v7, %v3621_v6  ;;  %v4415_v63 = vsub.bf16 %v5478_v44, %v5586_v41  ;;  %v7778_v44 = vcombine.low %v3988_v53, %v4000_v57 }
 0x428   :  { %v7768_v62 = vadd.bf16 %v7760_v7, %v3622_v30  ;;  %v4416_v11 = vsub.bf16 %v5480_v4, %v5586_v41 }
 0x429   :  { %v4350_v19 = vmul.bf16 1069105081, %v7764_v37  ;;  %v4463_v10 = vmul.bf16 1071005654, %v4415_v63  ;;  %v4016_v63 = vpop.permute.xlu1 %4015  ;;  %vm4229_vm10 = vcmp.gt.bf16.partialorder %v7764_v37, 0 }
 0x42a   :  { %v4353_v54 = vmul.bf16 1069105081, %v7768_v62  ;;  %v3395_v5 = vpop.f32.mrb[152].mxu1  ;;  %v4464_v29 = vmul.bf16 1071005654, %v4416_v11  ;;  %v4004_v11 = vpop.permute.xlu0 %4003  ;;  %v4024_v53 = vrot.slane %v4016_v63, %v6098_v17  ;;  %vm4230_vm9 = vcmp.gt.bf16.partialorder %v7768_v62, 0 }
 0x42b   :  { %5485 = vpow.bf16 %v4350_v19  ;;  %v3397_v6 = vpop.f32.mrb[153].mxu1  ;;  %v4511_v30 = vsel %vm4223_vm6, %v7724_v3, %v4463_v10  ;;  %v4012_v3 = vrot.slane %v4004_v11, %v6098_v17  ;;  %vm4201_vm6 = vcmp.gt.bf16.partialorder %v7492_v42, 0 }
 0x42c   :  { %5487 = vpow.bf16 %v4353_v54  ;;  %v3399_v26 = vpop.f32.mrb[154].mxu1  ;;  %v4512_v60 = vsel %vm4224_vm5, %v7729_v51, %v4464_v29 }
 0x42d   :  { %v3624_v33 = vpack.c.bf16 %v3399_v26, %v3395_v5  ;;  %v3401_v24 = vpop.f32.mrb[155].mxu1  ;;  %4563 = vmatprep.subr.bf16.mxu1 %v4512_v60 }
 0x42e   :  { %v5482_v4 = vpop.eup %5481  ;;  %v3625_v19 = vpack.c.bf16 %v3401_v24, %v3397_v6  ;;  %4564 = vmatpush1.bf16.msra.mxu1 %v4511_v30 }
 0x42f   :  { %v5484_v46 = vpop.eup %5483  ;;  %v7782_v54 = vadd.bf16 %v7778_v44, %v3624_v33  ;;  %v4418_v51 = vsub.bf16 %v5482_v4, %v5586_v41 }
 0x430   :  { %v7786_v29 = vadd.bf16 %v7778_v44, %v3625_v19  ;;  %v4419_v57 = vsub.bf16 %v5484_v46, %v5586_v41  ;;  %v7796_v46 = vcombine.low %v4012_v3, %v4024_v53  ;;  %v7807_v53 = vadd.bf16 %v7670_v50, %v3611_v47 }
 0x431   :  { %v4359_v10 = vmul.bf16 1069105081, %v7782_v54  ;;  %v4466_v5 = vmul.bf16 1071005654, %v4418_v51  ;;  %v4040_v51 = vpop.permute.xlu1 %4039  ;;  %vm4232_vm12 = vcmp.gt.bf16.partialorder %v7782_v54, 0 }
 0x432   :  { %v4362_v6 = vmul.bf16 1069105081, %v7786_v29  ;;  %v3405_v26 = vpop.f32.mrb[156].mxu1  ;;  %v4467_v60 = vmul.bf16 1071005654, %v4419_v57  ;;  %v4028_v57 = vpop.permute.xlu0 %4027  ;;  %vm4233_vm11 = vcmp.gt.bf16.partialorder %v7786_v29, 0 }
 0x433   :  { %5489 = vpow.bf16 %v4359_v10  ;;  %v3407_v33 = vpop.f32.mrb[157].mxu1  ;;  %v4514_v11 = vsel %vm4226_vm8, %v7746_v21, %v4466_v5  ;;  %v4048_v5 = vrot.slane %v4040_v51, %v6098_v17  ;;  %vm4219_vm1 = vcmp.gt.bf16.partialorder %v7807_v53, 0 }
 0x434   :  { %5491 = vpow.bf16 %v4362_v6  ;;  %v3409_v24 = vpop.f32.mrb[158].mxu1  ;;  %v4515_v30 = vsel %vm4227_vm7, %v7750_v1, %v4467_v60  ;;  %vm4204_vm8 = vcmp.gt.bf16.partialorder %v7499_v55, 0 }
 0x435   :  { %v3627_v4 = vpack.c.bf16 %v3409_v24, %v3405_v26  ;;  %v3411_v63 = vpop.f32.mrb[159].mxu1  ;;  %4565 = vmatprep.subr.bf16.mxu1 %v4515_v30  ;;  %v4036_v26 = vrot.slane %v4028_v57, %v6098_v17 }
 0x436   :  { %v5486_v19 = vpop.eup %5485  ;;  %v3628_v10 = vpack.c.bf16 %v3411_v63, %v3407_v33  ;;  %4566 = vmatpush1.bf16.msra.mxu1 %v4514_v11  ;;  %v4329_v11 = vmul.bf16 1069105081, %v7820_v18 }
 0x437   :  { %v5488_v34 = vpop.eup %5487  ;;  %v7800_v6 = vadd.bf16 %v7796_v46, %v3627_v4  ;;  %v4421_v1 = vsub.bf16 %v5486_v19, %v5586_v41  ;;  %v7827_v31 = vcombine.low %v4036_v26, %v4048_v5  ;;  %v7855_v26 = vadd.bf16 %v7742_v8, %v3620_v56 }
 0x438   :  { %v7810_v3 = vadd.bf16 %v7796_v46, %v3628_v10  ;;  %v4422_v21 = vsub.bf16 %v5488_v34, %v5586_v41  ;;  %v4320_v34 = vmul.bf16 1069105081, %v7807_v53 }
 0x439   :  { %v4368_v60 = vmul.bf16 1069105081, %v7800_v6  ;;  %v4469_v33 = vmul.bf16 1071005654, %v4421_v1  ;;  %v4347_v43 = vmul.bf16 1069105081, %v7855_v26 }
 0x43a   :  { %v4371_v38 = vmul.bf16 1069105081, %v7810_v3  ;;  %v3415_v47 = vpop.f32.mrb[160].mxu1  ;;  %v4470_v50 = vmul.bf16 1071005654, %v4422_v21  ;;  %vm4236_vm13 = vcmp.gt.bf16.partialorder %v7810_v3, 0 }
 0x43b   :  { %5493 = vpow.bf16 %v4368_v60  ;;  %v3417_v24 = vpop.f32.mrb[161].mxu1  ;;  %v4517_v4 = vsel %vm4229_vm10, %v7764_v37, %v4469_v33  ;;  %vm4235_vm14 = vcmp.gt.bf16.partialorder %v7800_v6, 0  ;;  %vm4228_vm7 = vcmp.gt.bf16.partialorder %v7855_v26, 0 }
 0x43c   :  { %5495 = vpow.bf16 %v4371_v38  ;;  %v3419_v17 = vpop.f32.mrb[162].mxu1  ;;  %v4518_v30 = vsel %vm4230_vm9, %v7768_v62, %v4470_v50  ;;  %v7836_v62 = vadd.bf16 %v7718_v23, %v3617_v2  ;;  %v4257_v2 = vmul.bf16 1069105081, %v7485_v0 }
 0x43d   :  { %v3630_v59 = vpack.c.bf16 %v3419_v17, %v3415_v47  ;;  %v3421_v25 = vpop.f32.mrb[163].mxu1  ;;  %4567 = vmatprep.subr.bf16.mxu1 %v4518_v30  ;;  %5497 = vpow.bf16 %v4320_v34  ;;  %v4266_v50 = vmul.bf16 1069105081, %v7492_v42  ;;  %v4275_v34 = vmul.bf16 1069105081, %v7499_v55 }
 0x43e   :  { %v5490_v63 = vpop.eup %5489  ;;  %v3631_v19 = vpack.c.bf16 %v3421_v25, %v3417_v24  ;;  %4568 = vmatpush1.bf16.msra.mxu1 %v4517_v4  ;;  %5499 = vpow.bf16 %v4248_v32  ;;  %v4338_v23 = vmul.bf16 1069105081, %v7836_v62  ;;  %v7875_v17 = vadd.bf16 %v7778_v44, %v3626_v48 }
 0x43f   :  { %v5492_v51 = vpop.eup %5491  ;;  %v7839_v57 = vadd.bf16 %v7827_v31, %v3630_v59  ;;  %v4424_v10 = vsub.bf16 %v5490_v63, %v5586_v41  ;;  %5501 = vpow.bf16 %v4329_v11  ;;  %v7996_v25 = vpack.c.bf16 %v7709_v13, %v7697_v22 }
 0x440   :  { %v7843_v37 = vadd.bf16 %v7827_v31, %v3631_v19  ;;  %v4425_v1 = vsub.bf16 %v5492_v51, %v5586_v41  ;;  %v4365_v44 = vmul.bf16 1069105081, %v7875_v17  ;;  %v7997_v13 = vpack.c.bf16 %v7733_v58, %v7721_v12 }
 0x441   :  { %v4377_v21 = vmul.bf16 1069105081, %v7839_v57  ;;  %v4472_v5 = vmul.bf16 1071005654, %v4424_v10  ;;  %vm4238_vm0 = vcmp.gt.bf16.partialorder %v7839_v57, 0  ;;  %vm4225_vm5 = vcmp.gt.bf16.partialorder %v7836_v62, 0 }
 0x442   :  { %v4380_v52 = vmul.bf16 1069105081, %v7843_v37  ;;  %v4473_v20 = vmul.bf16 1071005654, %v4425_v1  ;;  %vm4239_vm15 = vcmp.gt.bf16.partialorder %v7843_v37, 0  ;;  %vm4231_vm9 = vcmp.gt.bf16.partialorder %v7867_v36, 0 }
 0x443   :  { %5503 = vpow.bf16 %v4377_v21  ;;  %v4520_v33 = vsel %vm4232_vm12, %v7782_v54, %v4472_v5  ;;  %v4293_v21 = vmul.bf16 1069105081, %v7521_v49  ;;  %vm4207_vm10 = vcmp.gt.bf16.partialorder %v7506_v28, 0 }
 0x444   :  { %5505 = vpow.bf16 %v4380_v52  ;;  %v4521_v60 = vsel %vm4233_vm11, %v7786_v29, %v4473_v20  ;;  %vm4234_vm11 = vcmp.gt.bf16.partialorder %v7875_v17, 0  ;;  %vm4210_vm12 = vcmp.gt.bf16.partialorder %v7521_v49, 0 }
 0x445   :  { %4569 = vmatprep.subr.bf16.mxu1 %v4521_v60  ;;  %5507 = vpow.bf16 %v4257_v2  ;;  %v7910_v2 = vcombine.low %v7547_v45, %v7547_v45 }
 0x446   :  { %v5494_v38 = vpop.eup %5493  ;;  %4570 = vmatpush1.bf16.msra.mxu1 %v4520_v33  ;;  %5509 = vpow.bf16 %v4338_v23  ;;  %v4302_v33 = vmul.bf16 1069105081, %v7536_v39 }
 0x447   :  { %v5496_v47 = vpop.eup %5495  ;;  %v4427_v24 = vsub.bf16 %v5494_v38, %v5586_v41  ;;  %5511 = vpow.bf16 %v4266_v50 }
 0x448   :  { %v4428_v56 = vsub.bf16 %v5496_v47, %v5586_v41  ;;  %v5498_v29 = vpop.eup %5497  ;;  %5513 = vpow.bf16 %v4347_v43 }
 0x449   :  { %v4475_v8 = vmul.bf16 1071005654, %v4427_v24  ;;  %v5500_v35 = vpop.eup %5499  ;;  %v4411_v15 = vsub.bf16 %v5498_v29, %v5586_v41  ;;  %5515 = vpow.bf16 %v4275_v34 }
 0x44a   :  { %v4476_v54 = vmul.bf16 1071005654, %v4428_v56  ;;  %v5502_v7 = vpop.eup %5501  ;;  %5517 = vpow.bf16 %v4356_v27 }
 0x44b   :  { %v4523_v30 = vsel %vm4235_vm14, %v7800_v6, %v4475_v8  ;;  %v7891_v6 = vadd.bf16 %v7796_v46, %v7996_v25  ;;  %5519 = vpow.bf16 %v4284_v14  ;;  %v4459_v51 = vmul.bf16 1071005654, %v4411_v15 }
 0x44c   :  { %v4524_v40 = vsel %vm4236_vm13, %v7810_v3, %v4476_v54  ;;  %v4387_v3 = vsub.bf16 %v5500_v35, %v5586_v41  ;;  %v4414_v10 = vsub.bf16 %v5502_v7, %v5586_v41  ;;  %5521 = vpow.bf16 %v4365_v44 }
 0x44d   :  { %4571 = vmatprep.subr.bf16.mxu1 %v4524_v40  ;;  %v4374_v22 = vmul.bf16 1069105081, %v7891_v6  ;;  %v7902_v46 = vadd.bf16 %v7827_v31, %v7997_v13  ;;  %v4507_v12 = vsel %vm4219_vm1, %v7807_v53, %v4459_v51  ;;  %5523 = vpow.bf16 %v4293_v21 }
 0x44e   :  { %v5504_v32 = vpop.eup %5503  ;;  %4572 = vmatpush1.bf16.msra.mxu1 %v4523_v30  ;;  %v4435_v5 = vmul.bf16 1071005654, %v4387_v3  ;;  %v4462_v58 = vmul.bf16 1071005654, %v4414_v10  ;;  %v4311_v8 = vmul.bf16 1069105081, %v7566_v9 }
 0x44f   :  { %v5506_v48 = vpop.eup %5505  ;;  %v4430_v59 = vsub.bf16 %v5504_v32, %v5586_v41  ;;  %5525 = vpow.bf16 %v4374_v22  ;;  %vm4237_vm13 = vcmp.gt.bf16.partialorder %v7891_v6, 0  ;;  %vm4213_vm14 = vcmp.gt.bf16.partialorder %v7536_v39, 0 }
 0x450   :  { %v4431_v4 = vsub.bf16 %v5506_v48, %v5586_v41  ;;  %v5508_v11 = vpop.eup %5507  ;;  %v4483_v45 = vsel %vm4195_vm2, %v7478_v61, %v4435_v5  ;;  %v4510_v50 = vsel %vm4222_vm3, %v7820_v18, %v4462_v58  ;;  %5527 = vpow.bf16 %v4302_v33 }
 0x451   :  { %v4478_v63 = vmul.bf16 1071005654, %v4430_v59  ;;  %v5510_v1 = vpop.eup %5509  ;;  %v4390_v23 = vsub.bf16 %v5508_v11, %v5586_v41 }
 0x452   :  { %v4479_v19 = vmul.bf16 1071005654, %v4431_v4  ;;  %v5512_v60 = vpop.eup %5511  ;;  %v4417_v31 = vsub.bf16 %v5510_v1, %v5586_v41 }
 0x453   :  { %v4526_v20 = vsel %vm4238_vm0, %v7839_v57, %v4478_v63  ;;  %v4383_v57 = vmul.bf16 1069105081, %v7902_v46  ;;  %v4438_v53 = vmul.bf16 1071005654, %v4390_v23  ;;  %v4393_v38 = vsub.bf16 %v5512_v60, %v5586_v41 }
 0x454   :  { %v4527_v52 = vsel %vm4239_vm15, %v7843_v37, %v4479_v19  ;;  %v5514_v37 = vpop.eup %5513  ;;  %v4465_v24 = vmul.bf16 1071005654, %v4417_v31  ;;  %vm4240_vm15 = vcmp.gt.bf16.partialorder %v7902_v46, 0  ;;  %vm4216_vm0 = vcmp.gt.bf16.partialorder %v7566_v9, 0 }
 0x455   :  { %4573 = vmatprep.subr.bf16.mxu1 %v4527_v52  ;;  %v5516_v47 = vpop.eup %5515  ;;  %v4420_v43 = vsub.bf16 %v5514_v37, %v5586_v41  ;;  %5529 = vpow.bf16 %v4383_v57  ;;  %v4486_v54 = vsel %vm4198_vm4, %v7485_v0, %v4438_v53  ;;  %v4441_v29 = vmul.bf16 1071005654, %v4393_v38 }
 0x456   :  { %4574 = vmatpush1.bf16.msra.mxu1 %v4526_v20  ;;  %v5518_v56 = vpop.eup %5517  ;;  %v4396_v18 = vsub.bf16 %v5516_v47, %v5586_v41  ;;  %5531 = vpow.bf16 %v4311_v8 }
 0x457   :  { %5052 = vmatprep.subr.bf16.mxu1 %v4507_v12  ;;  %v5520_v61 = vpop.eup %5519  ;;  %v4468_v35 = vmul.bf16 1071005654, %v4420_v43  ;;  %v4423_v27 = vsub.bf16 %v5518_v56, %v5586_v41  ;;  %v4489_v40 = vsel %vm4201_vm6, %v7492_v42, %v4441_v29 }
 0x458   :  { %v5522_v34 = vpop.eup %5521  ;;  %v4444_v0 = vmul.bf16 1071005654, %v4396_v18  ;;  %v4399_v7 = vsub.bf16 %v5520_v61, %v5586_v41 }
 0x459   :  { %4576 = vmatmul.mubr.bf16.vlgmr.msra.gmra.mrb[164].mxu1 %v7910_v2  ;;  %v5524_v30 = vpop.eup %5523  ;;  %v4516_v32 = vsel %vm4228_vm7, %v7855_v26, %v4468_v35  ;;  %v4471_v14 = vmul.bf16 1071005654, %v4423_v27 }
 0x45a   :  { %5053 = vmatpush3.bf16.msra.mxu1 %v4483_v45  ;;  %4616 = vmatprep.mubr.bf16.mxu1 %v7555_v16  ;;  %v4513_v16 = vsel %vm4225_vm5, %v7836_v62, %v4465_v24  ;;  %v4426_v62 = vsub.bf16 %v5522_v34, %v5586_v41  ;;  %v5526_v15 = vpop.eup %5525  ;;  %v4492_v48 = vsel %vm4204_vm8, %v7499_v55, %v4444_v0  ;;  %v4447_v42 = vmul.bf16 1071005654, %v4399_v7 }
 0x45b   :  { %5054 = vmatprep.subr.bf16.mxu1 %v4510_v50  ;;  %v4402_v44 = vsub.bf16 %v5524_v30, %v5586_v41  ;;  %v5528_v59 = vpop.eup %5527  ;;  %v4519_v3 = vsel %vm4231_vm9, %v7867_v36, %v4471_v14  ;;  %v4429_v26 = vsub.bf16 %v5526_v15, %v5586_v41 }
 0x45c   :  { %v4474_v25 = vmul.bf16 1071005654, %v4426_v62  ;;  %v4495_v63 = vsel %vm4207_vm10, %v7506_v28, %v4447_v42  ;;  %v4405_v11 = vsub.bf16 %v5528_v59, %v5586_v41 }
 0x45d   :  { %v4450_v55 = vmul.bf16 1071005654, %v4402_v44  ;;  %v4477_v10 = vmul.bf16 1071005654, %v4429_v26 }
 0x45e   :  { %5055 = vmatpush3.bf16.msra.mxu1 %v4486_v54  ;;  %v4522_v51 = vsel %vm4234_vm11, %v7875_v17, %v4474_v25  ;;  %v4453_v28 = vmul.bf16 1071005654, %v4405_v11 }
 0x45f   :  { %5056 = vmatprep.subr.bf16.mxu1 %v4513_v16  ;;  %v4498_v1 = vsel %vm4210_vm12, %v7521_v49, %v4450_v55  ;;  %v4525_v5 = vsel %vm4237_vm13, %v7891_v6, %v4477_v10  ;;  %v4534_v6 = vpop.permute.xlu0 %4533 }
 0x460   :  { %v5530_v4 = vpop.eup %5529  ;;  %v4501_v17 = vsel %vm4213_vm14, %v7536_v39, %v4453_v28 }
 0x461   :  { %v5532_v19 = vpop.eup %5531  ;;  %v4432_v36 = vsub.bf16 %v5530_v4, %v5586_v41 }
 0x462   :  { %5057 = vmatpush3.bf16.msra.mxu1 %v4489_v40  ;;  %v4408_v21 = vsub.bf16 %v5532_v19, %v5586_v41 }
 0x463   :  { %5058 = vmatprep.subr.bf16.mxu1 %v4516_v32  ;;  %v4480_v22 = vmul.bf16 1071005654, %v4432_v36 }
 0x464   :  { %v4456_v13 = vmul.bf16 1071005654, %v4408_v21 }
 0x465   :  { %v4528_v49 = vsel %vm4240_vm15, %v7902_v46, %v4480_v22 }
 0x466   :  { %5059 = vmatpush3.bf16.msra.mxu1 %v4492_v48  ;;  %v4504_v41 = vsel %vm4216_vm0, %v7566_v9, %v4456_v13 }
 0x467   :  { %5060 = vmatprep.subr.bf16.mxu1 %v4519_v3 }
 0x46a   :  { %5061 = vmatpush3.bf16.msra.mxu1 %v4495_v63 }
 0x46b   :  { %5062 = vmatprep.subr.bf16.mxu1 %v4522_v51 }
 0x46e   :  { %5063 = vmatpush3.bf16.msra.mxu1 %v4498_v1 }
 0x46f   :  { %5064 = vmatprep.subr.bf16.mxu1 %v4525_v5 }
 0x472   :  { %5065 = vmatpush3.bf16.msra.mxu1 %v4501_v17 }
 0x473   :  { %5066 = vmatprep.subr.bf16.mxu1 %v4528_v49 }
 0x476   :  { %5067 = vmatpush3.bf16.msra.mxu1 %v4504_v41 }
 0x479   :  { %4617 = vmatmul.mubr.bf16.vlgmr.msra.gmra.mrb[168].mxu1 %v7910_v2 }
 0x52c   :  { %v4577_v52 = vpop.f32.mrb[164].mxu1 }
 0x52d   :  { %v4578_v20 = vadd.f32 %v4577_v52, %v4534_v6  ;;  %v4579_v23 = vpop.f32.mrb[165].mxu1 }
 0x52e   :  { %v4580_v60 = vadd.f32 %v4579_v23, %v4534_v6  ;;  %v4581_v39 = vpop.f32.mrb[166].mxu1 }
 0x52f   :  { %4624 = vst [vmem:[#allocation5] sm:$0xff] %v4578_v20  ;;  %v4582_v12 = vpop.f32.mrb[167].mxu1 }
 0x530   :  { %4625 = vst [vmem:[#allocation5 + $0x8] sm:$0xff] %v4580_v60 }
 0x54c   :  { %v5068_v58 = vpop.f32.mrb[168].mxu1 }
 0x54d   :  { %v5069_v31 = vpop.f32.mrb[169].mxu1 }
 0x54e   :  { %v5070_v46 = vadd.f32 %v5069_v31, %v5068_v58  ;;  %v5071_v37 = vpop.f32.mrb[170].mxu1 }
 0x54f   :  { %v5072_v33 = vpop.f32.mrb[171].mxu1 }
 0x550   :  { %v4619_v9 = vadd.f32 %v5070_v46, %v4534_v6 }
 0x552   :  { %4626 = vst [vmem:[#allocation5 + $0x10] sm:$0xff] %v4619_v9 }
 0x553   :  { %5566 = shalt.err (!%p5563_p12)
}
 0x554   :  { %s5567_s10 = scalar_lea.hbm %s7983_s9, 384 }
 0x555   :  { %p5568_p13 = scmp.ne.s32.totalorder %s7983_s9, %s5567_s10  ;;  %p5571_p0 = scmp.lt.u32.totalorder %s5567_s10, %s7983_s9 }
 0x557   :  { %p5573_p1 = pnand %p5571_p0, %p5568_p13 }
 0x559   :  { %5576 = shalt.err (!%p5573_p1)
}
 0x55a   :  { %4636 = dma.vmem_to_hbm [thread:$0]  %s4634_s28, 384, %s7983_s9, [#allocation4]  }
 0x55b   :  { %5579 = dma.done.wait [#allocation4], 384  }
 0x55c   :  { %5580 = vsyncadd [#allocation4], 4294966912 }
 0x55d   :  { %4640 = vsyncpa [#allocation3], 1 }
 0x55e   :  { %4641 = vsyncpa [#allocation4], 1 }

</bundles_post_ra>
